<compile_context>
chip_gen: v7x
topology: tpu7x:2x2x1
jax: 0.10.0
libtpu: 0.0.40
codegen_flags: <defaults>
</compile_context>

<pallas_src>
import jax
import jax.numpy as jnp
from jax import lax
from jax.experimental import pallas as pl
from jax.experimental.pallas import tpu as pltpu


# -----------------------------------------------------------------------------
# Pallas kernel: one (batch-tile, time-chunk) grid step
# -----------------------------------------------------------------------------
def dual_lstm_kernel(
    home_ref, away_ref, elo_ref, xgb_ref,
    wih_h_ref, wih_a_ref, whh_h_ref, whh_a_ref, bh_ref, ba_ref,
    g_h_ref, beta_h_ref, g_a_ref, beta_a_ref,
    we1_ref, be1_ref, we2_ref, be2_ref,
    wfh_ref, wfa_ref, wfe_ref, wfx_ref, bf1_ref, wf2_ref, bf2_ref,
    out_ref,
    hh_ref, ch_ref, ha_ref, ca_ref,        # persistent (BT, H) f32 state scratch
):
    BT, TC, D = home_ref.shape
    H = whh_h_ref.shape[0]
    G = 4 * H
    f32 = jnp.float32

    c_idx = pl.program_id(1)
    last_c = pl.num_programs(1) - 1

    # ---- chunk 0: zero the carried LSTM state ------------------------------
    @pl.when(c_idx == 0)
    def _init_state():
        hh_ref[...] = jnp.zeros_like(hh_ref)
        ch_ref[...] = jnp.zeros_like(ch_ref)
        ha_ref[...] = jnp.zeros_like(ha_ref)
        ca_ref[...] = jnp.zeros_like(ca_ref)

    # ---- hoisted input projection for this chunk: one dense matmul per
    #      stream (bias folded), completely off the recurrent critical path ---
    xh = home_ref[...].reshape(BT * TC, D)
    xa = away_ref[...].reshape(BT * TC, D)
    gx_h = (jnp.dot(xh, wih_h_ref[...], preferred_element_type=f32)
            + bh_ref[...]).reshape(BT, TC, G)
    gx_a = (jnp.dot(xa, wih_a_ref[...], preferred_element_type=f32)
            + ba_ref[...]).reshape(BT, TC, G)

    whh_h = whh_h_ref[...]
    whh_a = whh_a_ref[...]

    def lstm_step(gx_t, h, c, w_rec):
        # gate columns are pre-ordered [i | f | o | g]: one contiguous sigmoid
        # region (3H) + one tanh region (H) per stream (fewer EUP pushes).
        gates = gx_t + jnp.dot(h, w_rec, preferred_element_type=f32)
        sig = jax.nn.sigmoid(gates[:, :3 * H])
        i_g = sig[:, 0:H]
        f_g = sig[:, H:2 * H]
        o_g = sig[:, 2 * H:3 * H]
        g_g = jnp.tanh(gates[:, 3 * H:])
        c_new = f_g * c + i_g * g_g
        h_new = o_g * jnp.tanh(c_new)
        return h_new, c_new

    h_h = hh_ref[...]
    c_h = ch_ref[...]
    h_a = ha_ref[...]
    c_a = ca_ref[...]
    # capped unroll (= TC); the time-chunk grid axis bounds live ranges.
    for t in range(TC):
        h_h, c_h = lstm_step(gx_h[:, t, :], h_h, c_h, whh_h)
        h_a, c_a = lstm_step(gx_a[:, t, :], h_a, c_a, whh_a)
    hh_ref[...] = h_h
    ch_ref[...] = c_h
    ha_ref[...] = h_a
    ca_ref[...] = c_a

    # ---- last chunk: LayerNorm + elo MLP + final layers --------------------
    @pl.when(c_idx == last_c)
    def _finalize():
        def layer_norm(x, gamma, beta, eps=1e-5):
            mu = jnp.mean(x, axis=-1, keepdims=True)
            var = jnp.mean((x - mu) ** 2, axis=-1, keepdims=True)
            return (x - mu) * lax.rsqrt(var + eps) * gamma + beta

        hn = layer_norm(h_h, g_h_ref[...], beta_h_ref[...])
        an = layer_norm(h_a, g_a_ref[...], beta_a_ref[...])

        # elo MLP: Linear -> ReLU -> (Dropout=id) -> Linear -> ReLU -> (Dropout=id)
        e1 = jnp.maximum(
            jnp.dot(elo_ref[...], we1_ref[...], preferred_element_type=f32)
            + be1_ref[...], 0.0)
        e2 = jnp.maximum(
            jnp.dot(e1, we2_ref[...], preferred_element_type=f32)
            + be2_ref[...], 0.0)

        # final layer on concat([hn, an, e2, xgb]) as split matmuls (avoids an
        # unaligned lane concat; a single lane-padded matmul only pays off for
        # very large batch tiles).
        z = (jnp.dot(hn, wfh_ref[...], preferred_element_type=f32)
             + jnp.dot(an, wfa_ref[...], preferred_element_type=f32)
             + jnp.dot(e2, wfe_ref[...], preferred_element_type=f32)
             + jnp.dot(xgb_ref[...], wfx_ref[...], preferred_element_type=f32)
             + bf1_ref[...])
        z = jnp.maximum(z, 0.0)
        out_ref[...] = (jnp.dot(z, wf2_ref[...], preferred_element_type=f32)
                        + bf2_ref[...])


# -----------------------------------------------------------------------------
# Parameter construction (deterministic, PyTorch-style shapes, lstm_layers=1)
# -----------------------------------------------------------------------------
def init_params(key, lstm_input_size, lstm_hidden_size, mlp_input_size,
                mlp_hidden_size, xgb_input_size, num_classes):
    H = lstm_hidden_size
    mlp_half = mlp_hidden_size // 2
    comb = 2 * H + mlp_half + xgb_input_size
    f1 = comb // 2

    def uni(k, shape, bound):
        return jax.random.uniform(k, shape, jnp.float32, -bound, bound)

    ks = jax.random.split(key, 24)
    bd = 1.0 / (H ** 0.5)
    p = {}
    # LSTMs (single layer). PyTorch: weight_ih (4H, D), weight_hh (4H, H), biases (4H,)
    p["wih_h"] = uni(ks[0], (4 * H, lstm_input_size), bd)
    p["whh_h"] = uni(ks[1], (4 * H, H), bd)
    p["bih_h"] = uni(ks[2], (4 * H,), bd)
    p["bhh_h"] = uni(ks[3], (4 * H,), bd)
    p["wih_a"] = uni(ks[4], (4 * H, lstm_input_size), bd)
    p["whh_a"] = uni(ks[5], (4 * H, H), bd)
    p["bih_a"] = uni(ks[6], (4 * H,), bd)
    p["bhh_a"] = uni(ks[7], (4 * H,), bd)
    # LayerNorms
    p["ln_h_g"] = jnp.ones((H,), jnp.float32)
    p["ln_h_b"] = jnp.zeros((H,), jnp.float32)
    p["ln_a_g"] = jnp.ones((H,), jnp.float32)
    p["ln_a_b"] = jnp.zeros((H,), jnp.float32)
    # elo MLP
    b1 = 1.0 / (mlp_input_size ** 0.5)
    p["we1"] = uni(ks[8], (mlp_hidden_size, mlp_input_size), b1)
    p["be1"] = uni(ks[9], (mlp_hidden_size,), b1)
    b2 = 1.0 / (mlp_hidden_size ** 0.5)
    p["we2"] = uni(ks[10], (mlp_half, mlp_hidden_size), b2)
    p["be2"] = uni(ks[11], (mlp_half,), b2)
    # final
    b3 = 1.0 / (comb ** 0.5)
    p["wf1"] = uni(ks[12], (f1, comb), b3)
    p["bf1"] = uni(ks[13], (f1,), b3)
    b4 = 1.0 / (f1 ** 0.5)
    p["wf2"] = uni(ks[14], (num_classes, f1), b4)
    p["bf2"] = uni(ks[15], (num_classes,), b4)
    return p


# -----------------------------------------------------------------------------
# One-time weight preparation (OUTSIDE the jitted forward)
# -----------------------------------------------------------------------------
def prepare_params(params):
    """Kernel-ready weights: transposed, gate columns reordered [i f o g]."""
    H = params["whh_h"].shape[1]
    mlp_half = params["we2"].shape[0]
    comb = params["wf1"].shape[1]
    perm = jnp.array([0, 1, 3, 2])          # PyTorch [i f g o] -> [i f o g]

    def reorder_cols(w_t):                  # (K, 4H), gate-major column blocks
        K = w_t.shape[0]
        return w_t.reshape(K, 4, H)[:, perm, :].reshape(K, 4 * H)

    def reorder_bias(b):                    # (4H,) -> (1, 4H)
        return b.reshape(4, H)[perm, :].reshape(1, 4 * H)

    wf1_t = params["wf1"].T                 # (comb, F1)
    return dict(
        wih_h=reorder_cols(params["wih_h"].T),
        wih_a=reorder_cols(params["wih_a"].T),
        whh_h=reorder_cols(params["whh_h"].T),
        whh_a=reorder_cols(params["whh_a"].T),
        b_h=reorder_bias(params["bih_h"] + params["bhh_h"]),
        b_a=reorder_bias(params["bih_a"] + params["bhh_a"]),
        g_h=params["ln_h_g"].reshape(1, -1), beta_h=params["ln_h_b"].reshape(1, -1),
        g_a=params["ln_a_g"].reshape(1, -1), beta_a=params["ln_a_b"].reshape(1, -1),
        we1=params["we1"].T, be1=params["be1"].reshape(1, -1),
        we2=params["we2"].T, be2=params["be2"].reshape(1, -1),
        wfh=wf1_t[0:H, :], wfa=wf1_t[H:2 * H, :],
        wfe=wf1_t[2 * H:2 * H + mlp_half, :],
        wfx=wf1_t[2 * H + mlp_half:, :],
        bf1=params["bf1"].reshape(1, -1),
        wf2=params["wf2"].T, bf2=params["bf2"].reshape(1, -1),
    )


# -----------------------------------------------------------------------------
# Jitted wrapper: no per-call data movement, just the pallas_call
# -----------------------------------------------------------------------------
@jax.jit
def dual_lstm_forward(kparams, home_seq, away_seq, elo, xgb):
    B, T, D = home_seq.shape
    H = kparams["whh_h"].shape[0]
    C = kparams["bf2"].shape[1]
    E = elo.shape[1]
    X = xgb.shape[1]
    G = 4 * H

    # Batch tile (rows per recurrence step / per core).  Review: 128 (v5e),
    # up to 256 on v6e/v7x.  Ragged last tile is handled by Pallas masking.
    MAX_BT = 128
    BT = B if B <= MAX_BT else MAX_BT
    n_bt = pl.cdiv(B, BT)
    # Time chunk: multiple of 8 dividing T when possible (free in-kernel reshape).
    TC = next((c for c in (32, 16, 8) if T % c == 0), T)
    n_tc = T // TC

    data = [
        (home_seq, pl.BlockSpec((BT, TC, D), lambda i, c: (i, c, 0))),
        (away_seq, pl.BlockSpec((BT, TC, D), lambda i, c: (i, c, 0))),
        (elo,      pl.BlockSpec((BT, E),     lambda i, c: (i, 0))),
        (xgb,      pl.BlockSpec((BT, X),     lambda i, c: (i, 0))),
    ]
    weight_keys = ["wih_h", "wih_a", "whh_h", "whh_a", "b_h", "b_a",
                   "g_h", "beta_h", "g_a", "beta_a",
                   "we1", "be1", "we2", "be2",
                   "wfh", "wfa", "wfe", "wfx", "bf1", "wf2", "bf2"]

    def _wspec(a):
        nd = a.ndim
        return pl.BlockSpec(a.shape, lambda i, c, _nd=nd: (0,) * _nd)

    weights = [(kparams[k], _wspec(kparams[k])) for k in weight_keys]
    all_in = data + weights
    args = tuple(a for a, _ in all_in)
    in_specs = [s for _, s in all_in]

    # Explicit VMEM budget: weights + double-buffered chunk blocks + transients.
    BYTES = 4
    weight_bytes = BYTES * sum(int(kparams[k].size) for k in weight_keys)
    data_block_bytes = BYTES * (2 * BT * TC * D + BT * (E + X) + BT * C)
    gx_bytes = BYTES * 2 * BT * TC * G
    state_bytes = BYTES * 4 * BT * H
    budget = (2 * weight_bytes + 2 * data_block_bytes + 2 * gx_bytes
              + state_bytes + (4 << 20))
    vmem_limit = int(min(max(budget, 16 << 20), 56 << 20))

    # Advisory cost estimate (static shapes at trace time).
    M1 = kparams["we1"].shape[1]
    M2 = kparams["we2"].shape[1]
    F1 = kparams["bf1"].shape[1]
    comb = 2 * H + M2 + X
    flops = (2 * 2 * B * T * D * G          # dense per-stream input projections
             + 2 * 2 * B * T * H * G        # per-stream recurrent matmuls
             + 2 * B * (E * M1 + M1 * M2)   # elo MLP
             + 2 * B * (comb * F1 + F1 * C))
    transcendentals = 2 * B * T * 5 * H     # 4 gate activations + tanh(c) per stream
    bytes_accessed = BYTES * (2 * B * T * D + B * (E + X + C)) + weight_bytes
    cost = pl.CostEstimate(flops=int(flops), transcendentals=int(transcendentals),
                           bytes_accessed=int(bytes_accessed))

    grid_spec = pltpu.PrefetchScalarGridSpec(
        num_scalar_prefetch=0,
        grid=(n_bt, n_tc),
        in_specs=in_specs,
        out_specs=pl.BlockSpec((BT, C), lambda i, c: (i, 0)),
        scratch_shapes=[pltpu.VMEM((BT, H), jnp.float32)] * 4,
    )

    return pl.pallas_call(
        dual_lstm_kernel,
        grid_spec=grid_spec,
        out_shape=jax.ShapeDtypeStruct((B, C), jnp.float32),
        compiler_params=pltpu.CompilerParams(
            dimension_semantics=("parallel", "arbitrary"),
            vmem_limit_bytes=vmem_limit),
        cost_estimate=cost,
    )(*args)


# -----------------------------------------------------------------------------
# Pure-JAX reference (mirrors PyTorch eval-mode forward) for validation
# -----------------------------------------------------------------------------
def reference_forward(params, home_seq, away_seq, elo, xgb):
    H = params["whh_h"].shape[1]

    def lstm(seq, wih, whh, bih, bhh):
        B, T, _ = seq.shape
        h = jnp.zeros((B, H), jnp.float32)
        c = jnp.zeros((B, H), jnp.float32)
        for t in range(T):
            x_t = seq[:, t, :]
            gates = x_t @ wih.T + h @ whh.T + bih + bhh
            i = jax.nn.sigmoid(gates[:, 0:H])
            f = jax.nn.sigmoid(gates[:, H:2 * H])
            g = jnp.tanh(gates[:, 2 * H:3 * H])
            o = jax.nn.sigmoid(gates[:, 3 * H:4 * H])
            c = f * c + i * g
            h = o * jnp.tanh(c)
        return h

    def ln(x, g, b, eps=1e-5):
        mu = jnp.mean(x, -1, keepdims=True)
        var = jnp.mean((x - mu) ** 2, -1, keepdims=True)
        return (x - mu) / jnp.sqrt(var + eps) * g + b

    hh = ln(lstm(home_seq, params["wih_h"], params["whh_h"], params["bih_h"], params["bhh_h"]),
            params["ln_h_g"], params["ln_h_b"])
    ha = ln(lstm(away_seq, params["wih_a"], params["whh_a"], params["bih_a"], params["bhh_a"]),
            params["ln_a_g"], params["ln_a_b"])
    e1 = jnp.maximum(elo @ params["we1"].T + params["be1"], 0.0)
    e2 = jnp.maximum(e1 @ params["we2"].T + params["be2"], 0.0)
    comb = jnp.concatenate([hh, ha, e2, xgb], axis=1)
    z = jnp.maximum(comb @ params["wf1"].T + params["bf1"], 0.0)
    return z @ params["wf2"].T + params["bf2"]


if __name__ == "__main__":
    # Small, forward-consistent config (lstm_layers=1 => dropout unused).
    B, T = 2, 8
    lstm_input_size = 16
    lstm_hidden_size = 32
    mlp_input_size = 8
    mlp_hidden_size = 32
    xgb_input_size = 8
    num_classes = 3

    key = jax.random.PRNGKey(0)
    k_p, k_h, k_a, k_e, k_x = jax.random.split(key, 5)
    params = init_params(k_p, lstm_input_size, lstm_hidden_size,
                         mlp_input_size, mlp_hidden_size, xgb_input_size, num_classes)
    kparams = prepare_params(params)   # one-time fused/reordered weights (outside jit)

    home_seq = jax.random.normal(k_h, (B, T, lstm_input_size), jnp.float32)
    away_seq = jax.random.normal(k_a, (B, T, lstm_input_size), jnp.float32)
    elo = jax.random.normal(k_e, (B, mlp_input_size), jnp.float32)
    xgb = jax.random.normal(k_x, (B, xgb_input_size), jnp.float32)

    out = dual_lstm_forward(kparams, home_seq, away_seq, elo, xgb)
    out = jax.block_until_ready(out)

    ref = reference_forward(params, home_seq, away_seq, elo, xgb)
    assert out.shape == (B, num_classes)
    assert jnp.allclose(out, ref, rtol=1e-4, atol=1e-4), (out, ref)
    print("KERNEL_OK")
</pallas_src>

<mosaic_0001>
module attributes {stable_mosaic.version = 11 : i64} {
  func.func @dual_lstm_kernel(%arg0: i32, %arg1: i32, %arg2: memref<2x8x16xf32, #tpu.memory_space<vmem>>, %arg3: memref<2x8x16xf32, #tpu.memory_space<vmem>>, %arg4: memref<2x8xf32, #tpu.memory_space<vmem>>, %arg5: memref<2x8xf32, #tpu.memory_space<vmem>>, %arg6: memref<16x128xf32, #tpu.memory_space<vmem>>, %arg7: memref<16x128xf32, #tpu.memory_space<vmem>>, %arg8: memref<32x128xf32, #tpu.memory_space<vmem>>, %arg9: memref<32x128xf32, #tpu.memory_space<vmem>>, %arg10: memref<1x128xf32, #tpu.memory_space<vmem>>, %arg11: memref<1x128xf32, #tpu.memory_space<vmem>>, %arg12: memref<1x32xf32, #tpu.memory_space<vmem>>, %arg13: memref<1x32xf32, #tpu.memory_space<vmem>>, %arg14: memref<1x32xf32, #tpu.memory_space<vmem>>, %arg15: memref<1x32xf32, #tpu.memory_space<vmem>>, %arg16: memref<8x32xf32, #tpu.memory_space<vmem>>, %arg17: memref<1x32xf32, #tpu.memory_space<vmem>>, %arg18: memref<32x16xf32, #tpu.memory_space<vmem>>, %arg19: memref<1x16xf32, #tpu.memory_space<vmem>>, %arg20: memref<32x44xf32, #tpu.memory_space<vmem>>, %arg21: memref<32x44xf32, #tpu.memory_space<vmem>>, %arg22: memref<16x44xf32, #tpu.memory_space<vmem>>, %arg23: memref<8x44xf32, #tpu.memory_space<vmem>>, %arg24: memref<1x44xf32, #tpu.memory_space<vmem>>, %arg25: memref<44x3xf32, #tpu.memory_space<vmem>>, %arg26: memref<1x3xf32, #tpu.memory_space<vmem>>, %arg27: memref<2x3xf32, #tpu.memory_space<vmem>>, %arg28: memref<2x32xf32, #tpu.memory_space<vmem>>, %arg29: memref<2x32xf32, #tpu.memory_space<vmem>>, %arg30: memref<2x32xf32, #tpu.memory_space<vmem>>, %arg31: memref<2x32xf32, #tpu.memory_space<vmem>>) attributes {dimension_semantics = [#tpu.dimension_semantics<parallel>, #tpu.dimension_semantics<arbitrary>], iteration_bounds = array<i64: 1, 1>, scalar_prefetch = 0 : i64, scratch_operands = 4 : i64, tpu.core_type = #tpu.core_type<tc>, window_params = [{transform_indices = @transform_0, window_bounds = array<i64: 2, 8, 16>}, {transform_indices = @transform_1, window_bounds = array<i64: 2, 8, 16>}, {transform_indices = @transform_2, window_bounds = array<i64: 2, 8>}, {transform_indices = @transform_3, window_bounds = array<i64: 2, 8>}, {pipeline_mode = #tpu.pipeline_mode<synchronous>, transform_indices = @transform_4, window_bounds = array<i64: 16, 128>}, {pipeline_mode = #tpu.pipeline_mode<synchronous>, transform_indices = @transform_5, window_bounds = array<i64: 16, 128>}, {pipeline_mode = #tpu.pipeline_mode<synchronous>, transform_indices = @transform_6, window_bounds = array<i64: 32, 128>}, {pipeline_mode = #tpu.pipeline_mode<synchronous>, transform_indices = @transform_7, window_bounds = array<i64: 32, 128>}, {pipeline_mode = #tpu.pipeline_mode<synchronous>, transform_indices = @transform_8, window_bounds = array<i64: 1, 128>}, {pipeline_mode = #tpu.pipeline_mode<synchronous>, transform_indices = @transform_9, window_bounds = array<i64: 1, 128>}, {pipeline_mode = #tpu.pipeline_mode<synchronous>, transform_indices = @transform_10, window_bounds = array<i64: 1, 32>}, {pipeline_mode = #tpu.pipeline_mode<synchronous>, transform_indices = @transform_11, window_bounds = array<i64: 1, 32>}, {pipeline_mode = #tpu.pipeline_mode<synchronous>, transform_indices = @transform_12, window_bounds = array<i64: 1, 32>}, {pipeline_mode = #tpu.pipeline_mode<synchronous>, transform_indices = @transform_13, window_bounds = array<i64: 1, 32>}, {pipeline_mode = #tpu.pipeline_mode<synchronous>, transform_indices = @transform_14, window_bounds = array<i64: 8, 32>}, {pipeline_mode = #tpu.pipeline_mode<synchronous>, transform_indices = @transform_15, window_bounds = array<i64: 1, 32>}, {pipeline_mode = #tpu.pipeline_mode<synchronous>, transform_indices = @transform_16, window_bounds = array<i64: 32, 16>}, {pipeline_mode = #tpu.pipeline_mode<synchronous>, transform_indices = @transform_17, window_bounds = array<i64: 1, 16>}, {pipeline_mode = #tpu.pipeline_mode<synchronous>, transform_indices = @transform_18, window_bounds = array<i64: 32, 44>}, {pipeline_mode = #tpu.pipeline_mode<synchronous>, transform_indices = @transform_19, window_bounds = array<i64: 32, 44>}, {pipeline_mode = #tpu.pipeline_mode<synchronous>, transform_indices = @transform_20, window_bounds = array<i64: 16, 44>}, {pipeline_mode = #tpu.pipeline_mode<synchronous>, transform_indices = @transform_21, window_bounds = array<i64: 8, 44>}, {pipeline_mode = #tpu.pipeline_mode<synchronous>, transform_indices = @transform_22, window_bounds = array<i64: 1, 44>}, {pipeline_mode = #tpu.pipeline_mode<synchronous>, transform_indices = @transform_23, window_bounds = array<i64: 44, 3>}, {pipeline_mode = #tpu.pipeline_mode<synchronous>, transform_indices = @transform_24, window_bounds = array<i64: 1, 3>}, {transform_indices = @transform_25, window_bounds = array<i64: 2, 3>}]} {
    %c0_i32 = arith.constant 0 : i32
    %0 = arith.cmpi eq, %arg1, %c0_i32 : i32
    %1 = arith.extui %0 : i1 to i32
    %c0_i32_0 = arith.constant 0 : i32
    %2 = arith.cmpi ne, %1, %c0_i32_0 : i32
    scf.if %2 {
      %cst_69 = arith.constant 0.000000e+00 : f32
      %352 = vector.broadcast %cst_69 : f32 to vector<2x32xf32>
      %c0_70 = arith.constant 0 : index
      %c0_71 = arith.constant 0 : index
      %353 = vector.load %arg28[%c0_70, %c0_71] : memref<2x32xf32, #tpu.memory_space<vmem>>, vector<2x32xf32>
      tpu.vector_store %arg28[%c0_70, %c0_71], %352 {strides = array<i32>} : memref<2x32xf32, #tpu.memory_space<vmem>>, vector<2x32xf32>,
      %cst_72 = arith.constant 0.000000e+00 : f32
      %354 = vector.broadcast %cst_72 : f32 to vector<2x32xf32>
      %c0_73 = arith.constant 0 : index
      %c0_74 = arith.constant 0 : index
      %355 = vector.load %arg29[%c0_73, %c0_74] : memref<2x32xf32, #tpu.memory_space<vmem>>, vector<2x32xf32>
      tpu.vector_store %arg29[%c0_73, %c0_74], %354 {strides = array<i32>} : memref<2x32xf32, #tpu.memory_space<vmem>>, vector<2x32xf32>,
      %cst_75 = arith.constant 0.000000e+00 : f32
      %356 = vector.broadcast %cst_75 : f32 to vector<2x32xf32>
      %c0_76 = arith.constant 0 : index
      %c0_77 = arith.constant 0 : index
      %357 = vector.load %arg30[%c0_76, %c0_77] : memref<2x32xf32, #tpu.memory_space<vmem>>, vector<2x32xf32>
      tpu.vector_store %arg30[%c0_76, %c0_77], %356 {strides = array<i32>} : memref<2x32xf32, #tpu.memory_space<vmem>>, vector<2x32xf32>,
      %cst_78 = arith.constant 0.000000e+00 : f32
      %358 = vector.broadcast %cst_78 : f32 to vector<2x32xf32>
      %c0_79 = arith.constant 0 : index
      %c0_80 = arith.constant 0 : index
      %359 = vector.load %arg31[%c0_79, %c0_80] : memref<2x32xf32, #tpu.memory_space<vmem>>, vector<2x32xf32>
      tpu.vector_store %arg31[%c0_79, %c0_80], %358 {strides = array<i32>} : memref<2x32xf32, #tpu.memory_space<vmem>>, vector<2x32xf32>,
    } else {
    }
    %c0 = arith.constant 0 : index
    %c0_1 = arith.constant 0 : index
    %c0_2 = arith.constant 0 : index
    %3 = vector.load %arg2[%c0, %c0_1, %c0_2] : memref<2x8x16xf32, #tpu.memory_space<vmem>>, vector<2x8x16xf32>
    %4 = vector.shape_cast %3 : vector<2x8x16xf32> to vector<16x16xf32>
    %c0_3 = arith.constant 0 : index
    %c0_4 = arith.constant 0 : index
    %c0_5 = arith.constant 0 : index
    %5 = vector.load %arg3[%c0_3, %c0_4, %c0_5] : memref<2x8x16xf32, #tpu.memory_space<vmem>>, vector<2x8x16xf32>
    %6 = vector.shape_cast %5 : vector<2x8x16xf32> to vector<16x16xf32>
    %c0_6 = arith.constant 0 : index
    %c0_7 = arith.constant 0 : index
    %7 = vector.load %arg6[%c0_6, %c0_7] : memref<16x128xf32, #tpu.memory_space<vmem>>, vector<16x128xf32>
    %cst = arith.constant dense<0.000000e+00> : vector<16x128xf32>
    %8 = tpu.matmul %4, %7, %cst {dimension_numbers = #tpu.dot_dimension_numbers<[1], [0], [0], [1], [0, 0, 1, 1], [], []>} : vector<16x16xf32>, vector<16x128xf32>, vector<16x128xf32> -> vector<16x128xf32>
    %c0_8 = arith.constant 0 : index
    %c0_9 = arith.constant 0 : index
    %9 = vector.load %arg10[%c0_8, %c0_9] : memref<1x128xf32, #tpu.memory_space<vmem>>, vector<1x128xf32>
    %10 = vector.broadcast %9 : vector<1x128xf32> to vector<16x128xf32>
    %11 = arith.addf %8, %10 : vector<16x128xf32>
    %12 = vector.shape_cast %11 : vector<16x128xf32> to vector<2x8x128xf32>
    %c0_10 = arith.constant 0 : index
    %c0_11 = arith.constant 0 : index
    %13 = vector.load %arg7[%c0_10, %c0_11] : memref<16x128xf32, #tpu.memory_space<vmem>>, vector<16x128xf32>
    %cst_12 = arith.constant dense<0.000000e+00> : vector<16x128xf32>
    %14 = tpu.matmul %6, %13, %cst_12 {dimension_numbers = #tpu.dot_dimension_numbers<[1], [0], [0], [1], [0, 0, 1, 1], [], []>} : vector<16x16xf32>, vector<16x128xf32>, vector<16x128xf32> -> vector<16x128xf32>
    %c0_13 = arith.constant 0 : index
    %c0_14 = arith.constant 0 : index
    %15 = vector.load %arg11[%c0_13, %c0_14] : memref<1x128xf32, #tpu.memory_space<vmem>>, vector<1x128xf32>
    %16 = vector.broadcast %15 : vector<1x128xf32> to vector<16x128xf32>
    %17 = arith.addf %14, %16 : vector<16x128xf32>
    %18 = vector.shape_cast %17 : vector<16x128xf32> to vector<2x8x128xf32>
    %c0_15 = arith.constant 0 : index
    %c0_16 = arith.constant 0 : index
    %19 = vector.load %arg8[%c0_15, %c0_16] : memref<32x128xf32, #tpu.memory_space<vmem>>, vector<32x128xf32>
    %c0_17 = arith.constant 0 : index
    %c0_18 = arith.constant 0 : index
    %20 = vector.load %arg9[%c0_17, %c0_18] : memref<32x128xf32, #tpu.memory_space<vmem>>, vector<32x128xf32>
    %c0_19 = arith.constant 0 : index
    %c0_20 = arith.constant 0 : index
    %21 = vector.load %arg28[%c0_19, %c0_20] : memref<2x32xf32, #tpu.memory_space<vmem>>, vector<2x32xf32>
    %c0_21 = arith.constant 0 : index
    %c0_22 = arith.constant 0 : index
    %22 = vector.load %arg29[%c0_21, %c0_22] : memref<2x32xf32, #tpu.memory_space<vmem>>, vector<2x32xf32>
    %c0_23 = arith.constant 0 : index
    %c0_24 = arith.constant 0 : index
    %23 = vector.load %arg30[%c0_23, %c0_24] : memref<2x32xf32, #tpu.memory_space<vmem>>, vector<2x32xf32>
    %c0_25 = arith.constant 0 : index
    %c0_26 = arith.constant 0 : index
    %24 = vector.load %arg31[%c0_25, %c0_26] : memref<2x32xf32, #tpu.memory_space<vmem>>, vector<2x32xf32>
    %25 = vector.extract_strided_slice %12 {offsets = [0, 0, 0], sizes = [2, 1, 128], strides = [1, 1, 1]} : vector<2x8x128xf32> to vector<2x1x128xf32>
    %26 = vector.shape_cast %25 : vector<2x1x128xf32> to vector<2x128xf32>
    %cst_27 = arith.constant dense<0.000000e+00> : vector<2x128xf32>
    %27 = tpu.matmul %21, %19, %cst_27 {dimension_numbers = #tpu.dot_dimension_numbers<[1], [0], [0], [1], [0, 0, 1, 1], [], []>} : vector<2x32xf32>, vector<32x128xf32>, vector<2x128xf32> -> vector<2x128xf32>
    %28 = arith.addf %26, %27 : vector<2x128xf32>
    %29 = vector.extract_strided_slice %28 {offsets = [0, 0], sizes = [2, 96], strides = [1, 1]} : vector<2x128xf32> to vector<2x96xf32>
    %30 = arith.negf %29 : vector<2x96xf32>
    %31 = math.exp %30 : vector<2x96xf32>
    %cst_28 = arith.constant 1.000000e+00 : f32
    %32 = vector.broadcast %cst_28 : f32 to vector<2x96xf32>
    %33 = arith.addf %32, %31 : vector<2x96xf32>
    %34 = arith.divf %32, %33 : vector<2x96xf32>
    %35 = vector.extract_strided_slice %34 {offsets = [0, 0], sizes = [2, 32], strides = [1, 1]} : vector<2x96xf32> to vector<2x32xf32>
    %36 = vector.extract_strided_slice %34 {offsets = [0, 32], sizes = [2, 32], strides = [1, 1]} : vector<2x96xf32> to vector<2x32xf32>
    %37 = vector.extract_strided_slice %34 {offsets = [0, 64], sizes = [2, 32], strides = [1, 1]} : vector<2x96xf32> to vector<2x32xf32>
    %38 = vector.extract_strided_slice %28 {offsets = [0, 96], sizes = [2, 32], strides = [1, 1]} : vector<2x128xf32> to vector<2x32xf32>
    %39 = math.tanh %38 : vector<2x32xf32>
    %40 = arith.mulf %36, %22 : vector<2x32xf32>
    %41 = arith.mulf %35, %39 : vector<2x32xf32>
    %42 = arith.addf %40, %41 : vector<2x32xf32>
    %43 = math.tanh %42 : vector<2x32xf32>
    %44 = arith.mulf %37, %43 : vector<2x32xf32>
    %45 = vector.extract_strided_slice %18 {offsets = [0, 0, 0], sizes = [2, 1, 128], strides = [1, 1, 1]} : vector<2x8x128xf32> to vector<2x1x128xf32>
    %46 = vector.shape_cast %45 : vector<2x1x128xf32> to vector<2x128xf32>
    %cst_29 = arith.constant dense<0.000000e+00> : vector<2x128xf32>
    %47 = tpu.matmul %23, %20, %cst_29 {dimension_numbers = #tpu.dot_dimension_numbers<[1], [0], [0], [1], [0, 0, 1, 1], [], []>} : vector<2x32xf32>, vector<32x128xf32>, vector<2x128xf32> -> vector<2x128xf32>
    %48 = arith.addf %46, %47 : vector<2x128xf32>
    %49 = vector.extract_strided_slice %48 {offsets = [0, 0], sizes = [2, 96], strides = [1, 1]} : vector<2x128xf32> to vector<2x96xf32>
    %50 = arith.negf %49 : vector<2x96xf32>
    %51 = math.exp %50 : vector<2x96xf32>
    %cst_30 = arith.constant 1.000000e+00 : f32
    %52 = vector.broadcast %cst_30 : f32 to vector<2x96xf32>
    %53 = arith.addf %52, %51 : vector<2x96xf32>
    %54 = arith.divf %52, %53 : vector<2x96xf32>
    %55 = vector.extract_strided_slice %54 {offsets = [0, 0], sizes = [2, 32], strides = [1, 1]} : vector<2x96xf32> to vector<2x32xf32>
    %56 = vector.extract_strided_slice %54 {offsets = [0, 32], sizes = [2, 32], strides = [1, 1]} : vector<2x96xf32> to vector<2x32xf32>
    %57 = vector.extract_strided_slice %54 {offsets = [0, 64], sizes = [2, 32], strides = [1, 1]} : vector<2x96xf32> to vector<2x32xf32>
    %58 = vector.extract_strided_slice %48 {offsets = [0, 96], sizes = [2, 32], strides = [1, 1]} : vector<2x128xf32> to vector<2x32xf32>
    %59 = math.tanh %58 : vector<2x32xf32>
    %60 = arith.mulf %56, %24 : vector<2x32xf32>
    %61 = arith.mulf %55, %59 : vector<2x32xf32>
    %62 = arith.addf %60, %61 : vector<2x32xf32>
    %63 = math.tanh %62 : vector<2x32xf32>
    %64 = arith.mulf %57, %63 : vector<2x32xf32>
    %65 = vector.extract_strided_slice %12 {offsets = [0, 1, 0], sizes = [2, 1, 128], strides = [1, 1, 1]} : vector<2x8x128xf32> to vector<2x1x128xf32>
    %66 = vector.shape_cast %65 : vector<2x1x128xf32> to vector<2x128xf32>
    %cst_31 = arith.constant dense<0.000000e+00> : vector<2x128xf32>
    %67 = tpu.matmul %44, %19, %cst_31 {dimension_numbers = #tpu.dot_dimension_numbers<[1], [0], [0], [1], [0, 0, 1, 1], [], []>} : vector<2x32xf32>, vector<32x128xf32>, vector<2x128xf32> -> vector<2x128xf32>
    %68 = arith.addf %66, %67 : vector<2x128xf32>
    %69 = vector.extract_strided_slice %68 {offsets = [0, 0], sizes = [2, 96], strides = [1, 1]} : vector<2x128xf32> to vector<2x96xf32>
    %70 = arith.negf %69 : vector<2x96xf32>
    %71 = math.exp %70 : vector<2x96xf32>
    %cst_32 = arith.constant 1.000000e+00 : f32
    %72 = vector.broadcast %cst_32 : f32 to vector<2x96xf32>
    %73 = arith.addf %72, %71 : vector<2x96xf32>
    %74 = arith.divf %72, %73 : vector<2x96xf32>
    %75 = vector.extract_strided_slice %74 {offsets = [0, 0], sizes = [2, 32], strides = [1, 1]} : vector<2x96xf32> to vector<2x32xf32>
    %76 = vector.extract_strided_slice %74 {offsets = [0, 32], sizes = [2, 32], strides = [1, 1]} : vector<2x96xf32> to vector<2x32xf32>
    %77 = vector.extract_strided_slice %74 {offsets = [0, 64], sizes = [2, 32], strides = [1, 1]} : vector<2x96xf32> to vector<2x32xf32>
    %78 = vector.extract_strided_slice %68 {offsets = [0, 96], sizes = [2, 32], strides = [1, 1]} : vector<2x128xf32> to vector<2x32xf32>
    %79 = math.tanh %78 : vector<2x32xf32>
    %80 = arith.mulf %76, %42 : vector<2x32xf32>
    %81 = arith.mulf %75, %79 : vector<2x32xf32>
    %82 = arith.addf %80, %81 : vector<2x32xf32>
    %83 = math.tanh %82 : vector<2x32xf32>
    %84 = arith.mulf %77, %83 : vector<2x32xf32>
    %85 = vector.extract_strided_slice %18 {offsets = [0, 1, 0], sizes = [2, 1, 128], strides = [1, 1, 1]} : vector<2x8x128xf32> to vector<2x1x128xf32>
    %86 = vector.shape_cast %85 : vector<2x1x128xf32> to vector<2x128xf32>
    %cst_33 = arith.constant dense<0.000000e+00> : vector<2x128xf32>
    %87 = tpu.matmul %64, %20, %cst_33 {dimension_numbers = #tpu.dot_dimension_numbers<[1], [0], [0], [1], [0, 0, 1, 1], [], []>} : vector<2x32xf32>, vector<32x128xf32>, vector<2x128xf32> -> vector<2x128xf32>
    %88 = arith.addf %86, %87 : vector<2x128xf32>
    %89 = vector.extract_strided_slice %88 {offsets = [0, 0], sizes = [2, 96], strides = [1, 1]} : vector<2x128xf32> to vector<2x96xf32>
    %90 = arith.negf %89 : vector<2x96xf32>
    %91 = math.exp %90 : vector<2x96xf32>
    %cst_34 = arith.constant 1.000000e+00 : f32
    %92 = vector.broadcast %cst_34 : f32 to vector<2x96xf32>
    %93 = arith.addf %92, %91 : vector<2x96xf32>
    %94 = arith.divf %92, %93 : vector<2x96xf32>
    %95 = vector.extract_strided_slice %94 {offsets = [0, 0], sizes = [2, 32], strides = [1, 1]} : vector<2x96xf32> to vector<2x32xf32>
    %96 = vector.extract_strided_slice %94 {offsets = [0, 32], sizes = [2, 32], strides = [1, 1]} : vector<2x96xf32> to vector<2x32xf32>
    %97 = vector.extract_strided_slice %94 {offsets = [0, 64], sizes = [2, 32], strides = [1, 1]} : vector<2x96xf32> to vector<2x32xf32>
    %98 = vector.extract_strided_slice %88 {offsets = [0, 96], sizes = [2, 32], strides = [1, 1]} : vector<2x128xf32> to vector<2x32xf32>
    %99 = math.tanh %98 : vector<2x32xf32>
    %100 = arith.mulf %96, %62 : vector<2x32xf32>
    %101 = arith.mulf %95, %99 : vector<2x32xf32>
    %102 = arith.addf %100, %101 : vector<2x32xf32>
    %103 = math.tanh %102 : vector<2x32xf32>
    %104 = arith.mulf %97, %103 : vector<2x32xf32>
    %105 = vector.extract_strided_slice %12 {offsets = [0, 2, 0], sizes = [2, 1, 128], strides = [1, 1, 1]} : vector<2x8x128xf32> to vector<2x1x128xf32>
    %106 = vector.shape_cast %105 : vector<2x1x128xf32> to vector<2x128xf32>
    %cst_35 = arith.constant dense<0.000000e+00> : vector<2x128xf32>
    %107 = tpu.matmul %84, %19, %cst_35 {dimension_numbers = #tpu.dot_dimension_numbers<[1], [0], [0], [1], [0, 0, 1, 1], [], []>} : vector<2x32xf32>, vector<32x128xf32>, vector<2x128xf32> -> vector<2x128xf32>
    %108 = arith.addf %106, %107 : vector<2x128xf32>
    %109 = vector.extract_strided_slice %108 {offsets = [0, 0], sizes = [2, 96], strides = [1, 1]} : vector<2x128xf32> to vector<2x96xf32>
    %110 = arith.negf %109 : vector<2x96xf32>
    %111 = math.exp %110 : vector<2x96xf32>
    %cst_36 = arith.constant 1.000000e+00 : f32
    %112 = vector.broadcast %cst_36 : f32 to vector<2x96xf32>
    %113 = arith.addf %112, %111 : vector<2x96xf32>
    %114 = arith.divf %112, %113 : vector<2x96xf32>
    %115 = vector.extract_strided_slice %114 {offsets = [0, 0], sizes = [2, 32], strides = [1, 1]} : vector<2x96xf32> to vector<2x32xf32>
    %116 = vector.extract_strided_slice %114 {offsets = [0, 32], sizes = [2, 32], strides = [1, 1]} : vector<2x96xf32> to vector<2x32xf32>
    %117 = vector.extract_strided_slice %114 {offsets = [0, 64], sizes = [2, 32], strides = [1, 1]} : vector<2x96xf32> to vector<2x32xf32>
    %118 = vector.extract_strided_slice %108 {offsets = [0, 96], sizes = [2, 32], strides = [1, 1]} : vector<2x128xf32> to vector<2x32xf32>
    %119 = math.tanh %118 : vector<2x32xf32>
    %120 = arith.mulf %116, %82 : vector<2x32xf32>
    %121 = arith.mulf %115, %119 : vector<2x32xf32>
    %122 = arith.addf %120, %121 : vector<2x32xf32>
    %123 = math.tanh %122 : vector<2x32xf32>
    %124 = arith.mulf %117, %123 : vector<2x32xf32>
    %125 = vector.extract_strided_slice %18 {offsets = [0, 2, 0], sizes = [2, 1, 128], strides = [1, 1, 1]} : vector<2x8x128xf32> to vector<2x1x128xf32>
    %126 = vector.shape_cast %125 : vector<2x1x128xf32> to vector<2x128xf32>
    %cst_37 = arith.constant dense<0.000000e+00> : vector<2x128xf32>
    %127 = tpu.matmul %104, %20, %cst_37 {dimension_numbers = #tpu.dot_dimension_numbers<[1], [0], [0], [1], [0, 0, 1, 1], [], []>} : vector<2x32xf32>, vector<32x128xf32>, vector<2x128xf32> -> vector<2x128xf32>
    %128 = arith.addf %126, %127 : vector<2x128xf32>
    %129 = vector.extract_strided_slice %128 {offsets = [0, 0], sizes = [2, 96], strides = [1, 1]} : vector<2x128xf32> to vector<2x96xf32>
    %130 = arith.negf %129 : vector<2x96xf32>
    %131 = math.exp %130 : vector<2x96xf32>
    %cst_38 = arith.constant 1.000000e+00 : f32
    %132 = vector.broadcast %cst_38 : f32 to vector<2x96xf32>
    %133 = arith.addf %132, %131 : vector<2x96xf32>
    %134 = arith.divf %132, %133 : vector<2x96xf32>
    %135 = vector.extract_strided_slice %134 {offsets = [0, 0], sizes = [2, 32], strides = [1, 1]} : vector<2x96xf32> to vector<2x32xf32>
    %136 = vector.extract_strided_slice %134 {offsets = [0, 32], sizes = [2, 32], strides = [1, 1]} : vector<2x96xf32> to vector<2x32xf32>
    %137 = vector.extract_strided_slice %134 {offsets = [0, 64], sizes = [2, 32], strides = [1, 1]} : vector<2x96xf32> to vector<2x32xf32>
    %138 = vector.extract_strided_slice %128 {offsets = [0, 96], sizes = [2, 32], strides = [1, 1]} : vector<2x128xf32> to vector<2x32xf32>
    %139 = math.tanh %138 : vector<2x32xf32>
    %140 = arith.mulf %136, %102 : vector<2x32xf32>
    %141 = arith.mulf %135, %139 : vector<2x32xf32>
    %142 = arith.addf %140, %141 : vector<2x32xf32>
    %143 = math.tanh %142 : vector<2x32xf32>
    %144 = arith.mulf %137, %143 : vector<2x32xf32>
    %145 = vector.extract_strided_slice %12 {offsets = [0, 3, 0], sizes = [2, 1, 128], strides = [1, 1, 1]} : vector<2x8x128xf32> to vector<2x1x128xf32>
    %146 = vector.shape_cast %145 : vector<2x1x128xf32> to vector<2x128xf32>
    %cst_39 = arith.constant dense<0.000000e+00> : vector<2x128xf32>
    %147 = tpu.matmul %124, %19, %cst_39 {dimension_numbers = #tpu.dot_dimension_numbers<[1], [0], [0], [1], [0, 0, 1, 1], [], []>} : vector<2x32xf32>, vector<32x128xf32>, vector<2x128xf32> -> vector<2x128xf32>
    %148 = arith.addf %146, %147 : vector<2x128xf32>
    %149 = vector.extract_strided_slice %148 {offsets = [0, 0], sizes = [2, 96], strides = [1, 1]} : vector<2x128xf32> to vector<2x96xf32>
    %150 = arith.negf %149 : vector<2x96xf32>
    %151 = math.exp %150 : vector<2x96xf32>
    %cst_40 = arith.constant 1.000000e+00 : f32
    %152 = vector.broadcast %cst_40 : f32 to vector<2x96xf32>
    %153 = arith.addf %152, %151 : vector<2x96xf32>
    %154 = arith.divf %152, %153 : vector<2x96xf32>
    %155 = vector.extract_strided_slice %154 {offsets = [0, 0], sizes = [2, 32], strides = [1, 1]} : vector<2x96xf32> to vector<2x32xf32>
    %156 = vector.extract_strided_slice %154 {offsets = [0, 32], sizes = [2, 32], strides = [1, 1]} : vector<2x96xf32> to vector<2x32xf32>
    %157 = vector.extract_strided_slice %154 {offsets = [0, 64], sizes = [2, 32], strides = [1, 1]} : vector<2x96xf32> to vector<2x32xf32>
    %158 = vector.extract_strided_slice %148 {offsets = [0, 96], sizes = [2, 32], strides = [1, 1]} : vector<2x128xf32> to vector<2x32xf32>
    %159 = math.tanh %158 : vector<2x32xf32>
    %160 = arith.mulf %156, %122 : vector<2x32xf32>
    %161 = arith.mulf %155, %159 : vector<2x32xf32>
    %162 = arith.addf %160, %161 : vector<2x32xf32>
    %163 = math.tanh %162 : vector<2x32xf32>
    %164 = arith.mulf %157, %163 : vector<2x32xf32>
    %165 = vector.extract_strided_slice %18 {offsets = [0, 3, 0], sizes = [2, 1, 128], strides = [1, 1, 1]} : vector<2x8x128xf32> to vector<2x1x128xf32>
    %166 = vector.shape_cast %165 : vector<2x1x128xf32> to vector<2x128xf32>
    %cst_41 = arith.constant dense<0.000000e+00> : vector<2x128xf32>
    %167 = tpu.matmul %144, %20, %cst_41 {dimension_numbers = #tpu.dot_dimension_numbers<[1], [0], [0], [1], [0, 0, 1, 1], [], []>} : vector<2x32xf32>, vector<32x128xf32>, vector<2x128xf32> -> vector<2x128xf32>
    %168 = arith.addf %166, %167 : vector<2x128xf32>
    %169 = vector.extract_strided_slice %168 {offsets = [0, 0], sizes = [2, 96], strides = [1, 1]} : vector<2x128xf32> to vector<2x96xf32>
    %170 = arith.negf %169 : vector<2x96xf32>
    %171 = math.exp %170 : vector<2x96xf32>
    %cst_42 = arith.constant 1.000000e+00 : f32
    %172 = vector.broadcast %cst_42 : f32 to vector<2x96xf32>
    %173 = arith.addf %172, %171 : vector<2x96xf32>
    %174 = arith.divf %172, %173 : vector<2x96xf32>
    %175 = vector.extract_strided_slice %174 {offsets = [0, 0], sizes = [2, 32], strides = [1, 1]} : vector<2x96xf32> to vector<2x32xf32>
    %176 = vector.extract_strided_slice %174 {offsets = [0, 32], sizes = [2, 32], strides = [1, 1]} : vector<2x96xf32> to vector<2x32xf32>
    %177 = vector.extract_strided_slice %174 {offsets = [0, 64], sizes = [2, 32], strides = [1, 1]} : vector<2x96xf32> to vector<2x32xf32>
    %178 = vector.extract_strided_slice %168 {offsets = [0, 96], sizes = [2, 32], strides = [1, 1]} : vector<2x128xf32> to vector<2x32xf32>
    %179 = math.tanh %178 : vector<2x32xf32>
    %180 = arith.mulf %176, %142 : vector<2x32xf32>
    %181 = arith.mulf %175, %179 : vector<2x32xf32>
    %182 = arith.addf %180, %181 : vector<2x32xf32>
    %183 = math.tanh %182 : vector<2x32xf32>
    %184 = arith.mulf %177, %183 : vector<2x32xf32>
    %185 = vector.extract_strided_slice %12 {offsets = [0, 4, 0], sizes = [2, 1, 128], strides = [1, 1, 1]} : vector<2x8x128xf32> to vector<2x1x128xf32>
    %186 = vector.shape_cast %185 : vector<2x1x128xf32> to vector<2x128xf32>
    %cst_43 = arith.constant dense<0.000000e+00> : vector<2x128xf32>
    %187 = tpu.matmul %164, %19, %cst_43 {dimension_numbers = #tpu.dot_dimension_numbers<[1], [0], [0], [1], [0, 0, 1, 1], [], []>} : vector<2x32xf32>, vector<32x128xf32>, vector<2x128xf32> -> vector<2x128xf32>
    %188 = arith.addf %186, %187 : vector<2x128xf32>
    %189 = vector.extract_strided_slice %188 {offsets = [0, 0], sizes = [2, 96], strides = [1, 1]} : vector<2x128xf32> to vector<2x96xf32>
    %190 = arith.negf %189 : vector<2x96xf32>
    %191 = math.exp %190 : vector<2x96xf32>
    %cst_44 = arith.constant 1.000000e+00 : f32
    %192 = vector.broadcast %cst_44 : f32 to vector<2x96xf32>
    %193 = arith.addf %192, %191 : vector<2x96xf32>
    %194 = arith.divf %192, %193 : vector<2x96xf32>
    %195 = vector.extract_strided_slice %194 {offsets = [0, 0], sizes = [2, 32], strides = [1, 1]} : vector<2x96xf32> to vector<2x32xf32>
    %196 = vector.extract_strided_slice %194 {offsets = [0, 32], sizes = [2, 32], strides = [1, 1]} : vector<2x96xf32> to vector<2x32xf32>
    %197 = vector.extract_strided_slice %194 {offsets = [0, 64], sizes = [2, 32], strides = [1, 1]} : vector<2x96xf32> to vector<2x32xf32>
    %198 = vector.extract_strided_slice %188 {offsets = [0, 96], sizes = [2, 32], strides = [1, 1]} : vector<2x128xf32> to vector<2x32xf32>
    %199 = math.tanh %198 : vector<2x32xf32>
    %200 = arith.mulf %196, %162 : vector<2x32xf32>
    %201 = arith.mulf %195, %199 : vector<2x32xf32>
    %202 = arith.addf %200, %201 : vector<2x32xf32>
    %203 = math.tanh %202 : vector<2x32xf32>
    %204 = arith.mulf %197, %203 : vector<2x32xf32>
    %205 = vector.extract_strided_slice %18 {offsets = [0, 4, 0], sizes = [2, 1, 128], strides = [1, 1, 1]} : vector<2x8x128xf32> to vector<2x1x128xf32>
    %206 = vector.shape_cast %205 : vector<2x1x128xf32> to vector<2x128xf32>
    %cst_45 = arith.constant dense<0.000000e+00> : vector<2x128xf32>
    %207 = tpu.matmul %184, %20, %cst_45 {dimension_numbers = #tpu.dot_dimension_numbers<[1], [0], [0], [1], [0, 0, 1, 1], [], []>} : vector<2x32xf32>, vector<32x128xf32>, vector<2x128xf32> -> vector<2x128xf32>
    %208 = arith.addf %206, %207 : vector<2x128xf32>
    %209 = vector.extract_strided_slice %208 {offsets = [0, 0], sizes = [2, 96], strides = [1, 1]} : vector<2x128xf32> to vector<2x96xf32>
    %210 = arith.negf %209 : vector<2x96xf32>
    %211 = math.exp %210 : vector<2x96xf32>
    %cst_46 = arith.constant 1.000000e+00 : f32
    %212 = vector.broadcast %cst_46 : f32 to vector<2x96xf32>
    %213 = arith.addf %212, %211 : vector<2x96xf32>
    %214 = arith.divf %212, %213 : vector<2x96xf32>
    %215 = vector.extract_strided_slice %214 {offsets = [0, 0], sizes = [2, 32], strides = [1, 1]} : vector<2x96xf32> to vector<2x32xf32>
    %216 = vector.extract_strided_slice %214 {offsets = [0, 32], sizes = [2, 32], strides = [1, 1]} : vector<2x96xf32> to vector<2x32xf32>
    %217 = vector.extract_strided_slice %214 {offsets = [0, 64], sizes = [2, 32], strides = [1, 1]} : vector<2x96xf32> to vector<2x32xf32>
    %218 = vector.extract_strided_slice %208 {offsets = [0, 96], sizes = [2, 32], strides = [1, 1]} : vector<2x128xf32> to vector<2x32xf32>
    %219 = math.tanh %218 : vector<2x32xf32>
    %220 = arith.mulf %216, %182 : vector<2x32xf32>
    %221 = arith.mulf %215, %219 : vector<2x32xf32>
    %222 = arith.addf %220, %221 : vector<2x32xf32>
    %223 = math.tanh %222 : vector<2x32xf32>
    %224 = arith.mulf %217, %223 : vector<2x32xf32>
    %225 = vector.extract_strided_slice %12 {offsets = [0, 5, 0], sizes = [2, 1, 128], strides = [1, 1, 1]} : vector<2x8x128xf32> to vector<2x1x128xf32>
    %226 = vector.shape_cast %225 : vector<2x1x128xf32> to vector<2x128xf32>
    %cst_47 = arith.constant dense<0.000000e+00> : vector<2x128xf32>
    %227 = tpu.matmul %204, %19, %cst_47 {dimension_numbers = #tpu.dot_dimension_numbers<[1], [0], [0], [1], [0, 0, 1, 1], [], []>} : vector<2x32xf32>, vector<32x128xf32>, vector<2x128xf32> -> vector<2x128xf32>
    %228 = arith.addf %226, %227 : vector<2x128xf32>
    %229 = vector.extract_strided_slice %228 {offsets = [0, 0], sizes = [2, 96], strides = [1, 1]} : vector<2x128xf32> to vector<2x96xf32>
    %230 = arith.negf %229 : vector<2x96xf32>
    %231 = math.exp %230 : vector<2x96xf32>
    %cst_48 = arith.constant 1.000000e+00 : f32
    %232 = vector.broadcast %cst_48 : f32 to vector<2x96xf32>
    %233 = arith.addf %232, %231 : vector<2x96xf32>
    %234 = arith.divf %232, %233 : vector<2x96xf32>
    %235 = vector.extract_strided_slice %234 {offsets = [0, 0], sizes = [2, 32], strides = [1, 1]} : vector<2x96xf32> to vector<2x32xf32>
    %236 = vector.extract_strided_slice %234 {offsets = [0, 32], sizes = [2, 32], strides = [1, 1]} : vector<2x96xf32> to vector<2x32xf32>
    %237 = vector.extract_strided_slice %234 {offsets = [0, 64], sizes = [2, 32], strides = [1, 1]} : vector<2x96xf32> to vector<2x32xf32>
    %238 = vector.extract_strided_slice %228 {offsets = [0, 96], sizes = [2, 32], strides = [1, 1]} : vector<2x128xf32> to vector<2x32xf32>
    %239 = math.tanh %238 : vector<2x32xf32>
    %240 = arith.mulf %236, %202 : vector<2x32xf32>
    %241 = arith.mulf %235, %239 : vector<2x32xf32>
    %242 = arith.addf %240, %241 : vector<2x32xf32>
    %243 = math.tanh %242 : vector<2x32xf32>
    %244 = arith.mulf %237, %243 : vector<2x32xf32>
    %245 = vector.extract_strided_slice %18 {offsets = [0, 5, 0], sizes = [2, 1, 128], strides = [1, 1, 1]} : vector<2x8x128xf32> to vector<2x1x128xf32>
    %246 = vector.shape_cast %245 : vector<2x1x128xf32> to vector<2x128xf32>
    %cst_49 = arith.constant dense<0.000000e+00> : vector<2x128xf32>
    %247 = tpu.matmul %224, %20, %cst_49 {dimension_numbers = #tpu.dot_dimension_numbers<[1], [0], [0], [1], [0, 0, 1, 1], [], []>} : vector<2x32xf32>, vector<32x128xf32>, vector<2x128xf32> -> vector<2x128xf32>
    %248 = arith.addf %246, %247 : vector<2x128xf32>
    %249 = vector.extract_strided_slice %248 {offsets = [0, 0], sizes = [2, 96], strides = [1, 1]} : vector<2x128xf32> to vector<2x96xf32>
    %250 = arith.negf %249 : vector<2x96xf32>
    %251 = math.exp %250 : vector<2x96xf32>
    %cst_50 = arith.constant 1.000000e+00 : f32
    %252 = vector.broadcast %cst_50 : f32 to vector<2x96xf32>
    %253 = arith.addf %252, %251 : vector<2x96xf32>
    %254 = arith.divf %252, %253 : vector<2x96xf32>
    %255 = vector.extract_strided_slice %254 {offsets = [0, 0], sizes = [2, 32], strides = [1, 1]} : vector<2x96xf32> to vector<2x32xf32>
    %256 = vector.extract_strided_slice %254 {offsets = [0, 32], sizes = [2, 32], strides = [1, 1]} : vector<2x96xf32> to vector<2x32xf32>
    %257 = vector.extract_strided_slice %254 {offsets = [0, 64], sizes = [2, 32], strides = [1, 1]} : vector<2x96xf32> to vector<2x32xf32>
    %258 = vector.extract_strided_slice %248 {offsets = [0, 96], sizes = [2, 32], strides = [1, 1]} : vector<2x128xf32> to vector<2x32xf32>
    %259 = math.tanh %258 : vector<2x32xf32>
    %260 = arith.mulf %256, %222 : vector<2x32xf32>
    %261 = arith.mulf %255, %259 : vector<2x32xf32>
    %262 = arith.addf %260, %261 : vector<2x32xf32>
    %263 = math.tanh %262 : vector<2x32xf32>
    %264 = arith.mulf %257, %263 : vector<2x32xf32>
    %265 = vector.extract_strided_slice %12 {offsets = [0, 6, 0], sizes = [2, 1, 128], strides = [1, 1, 1]} : vector<2x8x128xf32> to vector<2x1x128xf32>
    %266 = vector.shape_cast %265 : vector<2x1x128xf32> to vector<2x128xf32>
    %cst_51 = arith.constant dense<0.000000e+00> : vector<2x128xf32>
    %267 = tpu.matmul %244, %19, %cst_51 {dimension_numbers = #tpu.dot_dimension_numbers<[1], [0], [0], [1], [0, 0, 1, 1], [], []>} : vector<2x32xf32>, vector<32x128xf32>, vector<2x128xf32> -> vector<2x128xf32>
    %268 = arith.addf %266, %267 : vector<2x128xf32>
    %269 = vector.extract_strided_slice %268 {offsets = [0, 0], sizes = [2, 96], strides = [1, 1]} : vector<2x128xf32> to vector<2x96xf32>
    %270 = arith.negf %269 : vector<2x96xf32>
    %271 = math.exp %270 : vector<2x96xf32>
    %cst_52 = arith.constant 1.000000e+00 : f32
    %272 = vector.broadcast %cst_52 : f32 to vector<2x96xf32>
    %273 = arith.addf %272, %271 : vector<2x96xf32>
    %274 = arith.divf %272, %273 : vector<2x96xf32>
    %275 = vector.extract_strided_slice %274 {offsets = [0, 0], sizes = [2, 32], strides = [1, 1]} : vector<2x96xf32> to vector<2x32xf32>
    %276 = vector.extract_strided_slice %274 {offsets = [0, 32], sizes = [2, 32], strides = [1, 1]} : vector<2x96xf32> to vector<2x32xf32>
    %277 = vector.extract_strided_slice %274 {offsets = [0, 64], sizes = [2, 32], strides = [1, 1]} : vector<2x96xf32> to vector<2x32xf32>
    %278 = vector.extract_strided_slice %268 {offsets = [0, 96], sizes = [2, 32], strides = [1, 1]} : vector<2x128xf32> to vector<2x32xf32>
    %279 = math.tanh %278 : vector<2x32xf32>
    %280 = arith.mulf %276, %242 : vector<2x32xf32>
    %281 = arith.mulf %275, %279 : vector<2x32xf32>
    %282 = arith.addf %280, %281 : vector<2x32xf32>
    %283 = math.tanh %282 : vector<2x32xf32>
    %284 = arith.mulf %277, %283 : vector<2x32xf32>
    %285 = vector.extract_strided_slice %18 {offsets = [0, 6, 0], sizes = [2, 1, 128], strides = [1, 1, 1]} : vector<2x8x128xf32> to vector<2x1x128xf32>
    %286 = vector.shape_cast %285 : vector<2x1x128xf32> to vector<2x128xf32>
    %cst_53 = arith.constant dense<0.000000e+00> : vector<2x128xf32>
    %287 = tpu.matmul %264, %20, %cst_53 {dimension_numbers = #tpu.dot_dimension_numbers<[1], [0], [0], [1], [0, 0, 1, 1], [], []>} : vector<2x32xf32>, vector<32x128xf32>, vector<2x128xf32> -> vector<2x128xf32>
    %288 = arith.addf %286, %287 : vector<2x128xf32>
    %289 = vector.extract_strided_slice %288 {offsets = [0, 0], sizes = [2, 96], strides = [1, 1]} : vector<2x128xf32> to vector<2x96xf32>
    %290 = arith.negf %289 : vector<2x96xf32>
    %291 = math.exp %290 : vector<2x96xf32>
    %cst_54 = arith.constant 1.000000e+00 : f32
    %292 = vector.broadcast %cst_54 : f32 to vector<2x96xf32>
    %293 = arith.addf %292, %291 : vector<2x96xf32>
    %294 = arith.divf %292, %293 : vector<2x96xf32>
    %295 = vector.extract_strided_slice %294 {offsets = [0, 0], sizes = [2, 32], strides = [1, 1]} : vector<2x96xf32> to vector<2x32xf32>
    %296 = vector.extract_strided_slice %294 {offsets = [0, 32], sizes = [2, 32], strides = [1, 1]} : vector<2x96xf32> to vector<2x32xf32>
    %297 = vector.extract_strided_slice %294 {offsets = [0, 64], sizes = [2, 32], strides = [1, 1]} : vector<2x96xf32> to vector<2x32xf32>
    %298 = vector.extract_strided_slice %288 {offsets = [0, 96], sizes = [2, 32], strides = [1, 1]} : vector<2x128xf32> to vector<2x32xf32>
    %299 = math.tanh %298 : vector<2x32xf32>
    %300 = arith.mulf %296, %262 : vector<2x32xf32>
    %301 = arith.mulf %295, %299 : vector<2x32xf32>
    %302 = arith.addf %300, %301 : vector<2x32xf32>
    %303 = math.tanh %302 : vector<2x32xf32>
    %304 = arith.mulf %297, %303 : vector<2x32xf32>
    %305 = vector.extract_strided_slice %12 {offsets = [0, 7, 0], sizes = [2, 1, 128], strides = [1, 1, 1]} : vector<2x8x128xf32> to vector<2x1x128xf32>
    %306 = vector.shape_cast %305 : vector<2x1x128xf32> to vector<2x128xf32>
    %cst_55 = arith.constant dense<0.000000e+00> : vector<2x128xf32>
    %307 = tpu.matmul %284, %19, %cst_55 {dimension_numbers = #tpu.dot_dimension_numbers<[1], [0], [0], [1], [0, 0, 1, 1], [], []>} : vector<2x32xf32>, vector<32x128xf32>, vector<2x128xf32> -> vector<2x128xf32>
    %308 = arith.addf %306, %307 : vector<2x128xf32>
    %309 = vector.extract_strided_slice %308 {offsets = [0, 0], sizes = [2, 96], strides = [1, 1]} : vector<2x128xf32> to vector<2x96xf32>
    %310 = arith.negf %309 : vector<2x96xf32>
    %311 = math.exp %310 : vector<2x96xf32>
    %cst_56 = arith.constant 1.000000e+00 : f32
    %312 = vector.broadcast %cst_56 : f32 to vector<2x96xf32>
    %313 = arith.addf %312, %311 : vector<2x96xf32>
    %314 = arith.divf %312, %313 : vector<2x96xf32>
    %315 = vector.extract_strided_slice %314 {offsets = [0, 0], sizes = [2, 32], strides = [1, 1]} : vector<2x96xf32> to vector<2x32xf32>
    %316 = vector.extract_strided_slice %314 {offsets = [0, 32], sizes = [2, 32], strides = [1, 1]} : vector<2x96xf32> to vector<2x32xf32>
    %317 = vector.extract_strided_slice %314 {offsets = [0, 64], sizes = [2, 32], strides = [1, 1]} : vector<2x96xf32> to vector<2x32xf32>
    %318 = vector.extract_strided_slice %308 {offsets = [0, 96], sizes = [2, 32], strides = [1, 1]} : vector<2x128xf32> to vector<2x32xf32>
    %319 = math.tanh %318 : vector<2x32xf32>
    %320 = arith.mulf %316, %282 : vector<2x32xf32>
    %321 = arith.mulf %315, %319 : vector<2x32xf32>
    %322 = arith.addf %320, %321 : vector<2x32xf32>
    %323 = math.tanh %322 : vector<2x32xf32>
    %324 = arith.mulf %317, %323 : vector<2x32xf32>
    %325 = vector.extract_strided_slice %18 {offsets = [0, 7, 0], sizes = [2, 1, 128], strides = [1, 1, 1]} : vector<2x8x128xf32> to vector<2x1x128xf32>
    %326 = vector.shape_cast %325 : vector<2x1x128xf32> to vector<2x128xf32>
    %cst_57 = arith.constant dense<0.000000e+00> : vector<2x128xf32>
    %327 = tpu.matmul %304, %20, %cst_57 {dimension_numbers = #tpu.dot_dimension_numbers<[1], [0], [0], [1], [0, 0, 1, 1], [], []>} : vector<2x32xf32>, vector<32x128xf32>, vector<2x128xf32> -> vector<2x128xf32>
    %328 = arith.addf %326, %327 : vector<2x128xf32>
    %329 = vector.extract_strided_slice %328 {offsets = [0, 0], sizes = [2, 96], strides = [1, 1]} : vector<2x128xf32> to vector<2x96xf32>
    %330 = arith.negf %329 : vector<2x96xf32>
    %331 = math.exp %330 : vector<2x96xf32>
    %cst_58 = arith.constant 1.000000e+00 : f32
    %332 = vector.broadcast %cst_58 : f32 to vector<2x96xf32>
    %333 = arith.addf %332, %331 : vector<2x96xf32>
    %334 = arith.divf %332, %333 : vector<2x96xf32>
    %335 = vector.extract_strided_slice %334 {offsets = [0, 0], sizes = [2, 32], strides = [1, 1]} : vector<2x96xf32> to vector<2x32xf32>
    %336 = vector.extract_strided_slice %334 {offsets = [0, 32], sizes = [2, 32], strides = [1, 1]} : vector<2x96xf32> to vector<2x32xf32>
    %337 = vector.extract_strided_slice %334 {offsets = [0, 64], sizes = [2, 32], strides = [1, 1]} : vector<2x96xf32> to vector<2x32xf32>
    %338 = vector.extract_strided_slice %328 {offsets = [0, 96], sizes = [2, 32], strides = [1, 1]} : vector<2x128xf32> to vector<2x32xf32>
    %339 = math.tanh %338 : vector<2x32xf32>
    %340 = arith.mulf %336, %302 : vector<2x32xf32>
    %341 = arith.mulf %335, %339 : vector<2x32xf32>
    %342 = arith.addf %340, %341 : vector<2x32xf32>
    %343 = math.tanh %342 : vector<2x32xf32>
    %344 = arith.mulf %337, %343 : vector<2x32xf32>
    %c0_59 = arith.constant 0 : index
    %c0_60 = arith.constant 0 : index
    %345 = vector.load %arg28[%c0_59, %c0_60] : memref<2x32xf32, #tpu.memory_space<vmem>>, vector<2x32xf32>
    tpu.vector_store %arg28[%c0_59, %c0_60], %324 {strides = array<i32>} : memref<2x32xf32, #tpu.memory_space<vmem>>, vector<2x32xf32>,
    %c0_61 = arith.constant 0 : index
    %c0_62 = arith.constant 0 : index
    %346 = vector.load %arg29[%c0_61, %c0_62] : memref<2x32xf32, #tpu.memory_space<vmem>>, vector<2x32xf32>
    tpu.vector_store %arg29[%c0_61, %c0_62], %322 {strides = array<i32>} : memref<2x32xf32, #tpu.memory_space<vmem>>, vector<2x32xf32>,
    %c0_63 = arith.constant 0 : index
    %c0_64 = arith.constant 0 : index
    %347 = vector.load %arg30[%c0_63, %c0_64] : memref<2x32xf32, #tpu.memory_space<vmem>>, vector<2x32xf32>
    tpu.vector_store %arg30[%c0_63, %c0_64], %344 {strides = array<i32>} : memref<2x32xf32, #tpu.memory_space<vmem>>, vector<2x32xf32>,
    %c0_65 = arith.constant 0 : index
    %c0_66 = arith.constant 0 : index
    %348 = vector.load %arg31[%c0_65, %c0_66] : memref<2x32xf32, #tpu.memory_space<vmem>>, vector<2x32xf32>
    tpu.vector_store %arg31[%c0_65, %c0_66], %342 {strides = array<i32>} : memref<2x32xf32, #tpu.memory_space<vmem>>, vector<2x32xf32>,
    %c0_i32_67 = arith.constant 0 : i32
    %349 = arith.cmpi eq, %arg1, %c0_i32_67 : i32
    %350 = arith.extui %349 : i1 to i32
    %c0_i32_68 = arith.constant 0 : i32
    %351 = arith.cmpi ne, %350, %c0_i32_68 : i32
    scf.if %351 {
      %c0_69 = arith.constant 0 : index
      %c0_70 = arith.constant 0 : index
      %352 = vector.load %arg12[%c0_69, %c0_70] : memref<1x32xf32, #tpu.memory_space<vmem>>, vector<1x32xf32>
      %c0_71 = arith.constant 0 : index
      %c0_72 = arith.constant 0 : index
      %353 = vector.load %arg13[%c0_71, %c0_72] : memref<1x32xf32, #tpu.memory_space<vmem>>, vector<1x32xf32>
      %cst_73 = arith.constant dense<0.000000e+00> : vector<2xf32>
      %354 = vector.multi_reduction <add>, %324, %cst_73 [1] : vector<2x32xf32> to vector<2xf32>
      %355 = vector.shape_cast %354 : vector<2xf32> to vector<2x1xf32>
      %cst_74 = arith.constant 3.200000e+01 : f32
      %356 = vector.broadcast %cst_74 : f32 to vector<2x1xf32>
      %357 = arith.divf %355, %356 : vector<2x1xf32>
      %358 = vector.broadcast %357 : vector<2x1xf32> to vector<2x32xf32>
      %359 = arith.subf %324, %358 : vector<2x32xf32>
      %360 = arith.mulf %359, %359 : vector<2x32xf32>
      %cst_75 = arith.constant dense<0.000000e+00> : vector<2xf32>
      %361 = vector.multi_reduction <add>, %360, %cst_75 [1] : vector<2x32xf32> to vector<2xf32>
      %362 = vector.shape_cast %361 : vector<2xf32> to vector<2x1xf32>
      %cst_76 = arith.constant 3.200000e+01 : f32
      %363 = vector.broadcast %cst_76 : f32 to vector<2x1xf32>
      %364 = arith.divf %362, %363 : vector<2x1xf32>
      %365 = vector.broadcast %357 : vector<2x1xf32> to vector<2x32xf32>
      %366 = arith.subf %324, %365 : vector<2x32xf32>
      %cst_77 = arith.constant 9.99999974E-6 : f32
      %367 = vector.broadcast %cst_77 : f32 to vector<2x1xf32>
      %368 = arith.addf %364, %367 : vector<2x1xf32>
      %369 = math.rsqrt %368 : vector<2x1xf32>
      %370 = vector.broadcast %369 : vector<2x1xf32> to vector<2x32xf32>
      %371 = arith.mulf %366, %370 : vector<2x32xf32>
      %372 = vector.broadcast %352 : vector<1x32xf32> to vector<2x32xf32>
      %373 = arith.mulf %371, %372 : vector<2x32xf32>
      %374 = vector.broadcast %353 : vector<1x32xf32> to vector<2x32xf32>
      %375 = arith.addf %373, %374 : vector<2x32xf32>
      %c0_78 = arith.constant 0 : index
      %c0_79 = arith.constant 0 : index
      %376 = vector.load %arg14[%c0_78, %c0_79] : memref<1x32xf32, #tpu.memory_space<vmem>>, vector<1x32xf32>
      %c0_80 = arith.constant 0 : index
      %c0_81 = arith.constant 0 : index
      %377 = vector.load %arg15[%c0_80, %c0_81] : memref<1x32xf32, #tpu.memory_space<vmem>>, vector<1x32xf32>
      %cst_82 = arith.constant dense<0.000000e+00> : vector<2xf32>
      %378 = vector.multi_reduction <add>, %344, %cst_82 [1] : vector<2x32xf32> to vector<2xf32>
      %379 = vector.shape_cast %378 : vector<2xf32> to vector<2x1xf32>
      %cst_83 = arith.constant 3.200000e+01 : f32
      %380 = vector.broadcast %cst_83 : f32 to vector<2x1xf32>
      %381 = arith.divf %379, %380 : vector<2x1xf32>
      %382 = vector.broadcast %381 : vector<2x1xf32> to vector<2x32xf32>
      %383 = arith.subf %344, %382 : vector<2x32xf32>
      %384 = arith.mulf %383, %383 : vector<2x32xf32>
      %cst_84 = arith.constant dense<0.000000e+00> : vector<2xf32>
      %385 = vector.multi_reduction <add>, %384, %cst_84 [1] : vector<2x32xf32> to vector<2xf32>
      %386 = vector.shape_cast %385 : vector<2xf32> to vector<2x1xf32>
      %cst_85 = arith.constant 3.200000e+01 : f32
      %387 = vector.broadcast %cst_85 : f32 to vector<2x1xf32>
      %388 = arith.divf %386, %387 : vector<2x1xf32>
      %389 = vector.broadcast %381 : vector<2x1xf32> to vector<2x32xf32>
      %390 = arith.subf %344, %389 : vector<2x32xf32>
      %cst_86 = arith.constant 9.99999974E-6 : f32
      %391 = vector.broadcast %cst_86 : f32 to vector<2x1xf32>
      %392 = arith.addf %388, %391 : vector<2x1xf32>
      %393 = math.rsqrt %392 : vector<2x1xf32>
      %394 = vector.broadcast %393 : vector<2x1xf32> to vector<2x32xf32>
      %395 = arith.mulf %390, %394 : vector<2x32xf32>
      %396 = vector.broadcast %376 : vector<1x32xf32> to vector<2x32xf32>
      %397 = arith.mulf %395, %396 : vector<2x32xf32>
      %398 = vector.broadcast %377 : vector<1x32xf32> to vector<2x32xf32>
      %399 = arith.addf %397, %398 : vector<2x32xf32>
      %c0_87 = arith.constant 0 : index
      %c0_88 = arith.constant 0 : index
      %400 = vector.load %arg4[%c0_87, %c0_88] : memref<2x8xf32, #tpu.memory_space<vmem>>, vector<2x8xf32>
      %c0_89 = arith.constant 0 : index
      %c0_90 = arith.constant 0 : index
      %401 = vector.load %arg16[%c0_89, %c0_90] : memref<8x32xf32, #tpu.memory_space<vmem>>, vector<8x32xf32>
      %cst_91 = arith.constant dense<0.000000e+00> : vector<2x32xf32>
      %402 = tpu.matmul %400, %401, %cst_91 {dimension_numbers = #tpu.dot_dimension_numbers<[1], [0], [0], [1], [0, 0, 1, 1], [], []>} : vector<2x8xf32>, vector<8x32xf32>, vector<2x32xf32> -> vector<2x32xf32>
      %c0_92 = arith.constant 0 : index
      %c0_93 = arith.constant 0 : index
      %403 = vector.load %arg17[%c0_92, %c0_93] : memref<1x32xf32, #tpu.memory_space<vmem>>, vector<1x32xf32>
      %404 = vector.broadcast %403 : vector<1x32xf32> to vector<2x32xf32>
      %405 = arith.addf %402, %404 : vector<2x32xf32>
      %cst_94 = arith.constant 0.000000e+00 : f32
      %406 = vector.broadcast %cst_94 : f32 to vector<2x32xf32>
      %407 = arith.maximumf %405, %406 : vector<2x32xf32>
      %c0_95 = arith.constant 0 : index
      %c0_96 = arith.constant 0 : index
      %408 = vector.load %arg18[%c0_95, %c0_96] : memref<32x16xf32, #tpu.memory_space<vmem>>, vector<32x16xf32>
      %cst_97 = arith.constant dense<0.000000e+00> : vector<2x16xf32>
      %409 = tpu.matmul %407, %408, %cst_97 {dimension_numbers = #tpu.dot_dimension_numbers<[1], [0], [0], [1], [0, 0, 1, 1], [], []>} : vector<2x32xf32>, vector<32x16xf32>, vector<2x16xf32> -> vector<2x16xf32>
      %c0_98 = arith.constant 0 : index
      %c0_99 = arith.constant 0 : index
      %410 = vector.load %arg19[%c0_98, %c0_99] : memref<1x16xf32, #tpu.memory_space<vmem>>, vector<1x16xf32>
      %411 = vector.broadcast %410 : vector<1x16xf32> to vector<2x16xf32>
      %412 = arith.addf %409, %411 : vector<2x16xf32>
      %cst_100 = arith.constant 0.000000e+00 : f32
      %413 = vector.broadcast %cst_100 : f32 to vector<2x16xf32>
      %414 = arith.maximumf %412, %413 : vector<2x16xf32>
      %c0_101 = arith.constant 0 : index
      %c0_102 = arith.constant 0 : index
      %415 = vector.load %arg20[%c0_101, %c0_102] : memref<32x44xf32, #tpu.memory_space<vmem>>, vector<32x44xf32>
      %cst_103 = arith.constant dense<0.000000e+00> : vector<2x44xf32>
      %416 = tpu.matmul %375, %415, %cst_103 {dimension_numbers = #tpu.dot_dimension_numbers<[1], [0], [0], [1], [0, 0, 1, 1], [], []>} : vector<2x32xf32>, vector<32x44xf32>, vector<2x44xf32> -> vector<2x44xf32>
      %c0_104 = arith.constant 0 : index
      %c0_105 = arith.constant 0 : index
      %417 = vector.load %arg21[%c0_104, %c0_105] : memref<32x44xf32, #tpu.memory_space<vmem>>, vector<32x44xf32>
      %cst_106 = arith.constant dense<0.000000e+00> : vector<2x44xf32>
      %418 = tpu.matmul %399, %417, %cst_106 {dimension_numbers = #tpu.dot_dimension_numbers<[1], [0], [0], [1], [0, 0, 1, 1], [], []>} : vector<2x32xf32>, vector<32x44xf32>, vector<2x44xf32> -> vector<2x44xf32>
      %419 = arith.addf %416, %418 : vector<2x44xf32>
      %c0_107 = arith.constant 0 : index
      %c0_108 = arith.constant 0 : index
      %420 = vector.load %arg22[%c0_107, %c0_108] : memref<16x44xf32, #tpu.memory_space<vmem>>, vector<16x44xf32>
      %cst_109 = arith.constant dense<0.000000e+00> : vector<2x44xf32>
      %421 = tpu.matmul %414, %420, %cst_109 {dimension_numbers = #tpu.dot_dimension_numbers<[1], [0], [0], [1], [0, 0, 1, 1], [], []>} : vector<2x16xf32>, vector<16x44xf32>, vector<2x44xf32> -> vector<2x44xf32>
      %422 = arith.addf %419, %421 : vector<2x44xf32>
      %c0_110 = arith.constant 0 : index
      %c0_111 = arith.constant 0 : index
      %423 = vector.load %arg5[%c0_110, %c0_111] : memref<2x8xf32, #tpu.memory_space<vmem>>, vector<2x8xf32>
      %c0_112 = arith.constant 0 : index
      %c0_113 = arith.constant 0 : index
      %424 = vector.load %arg23[%c0_112, %c0_113] : memref<8x44xf32, #tpu.memory_space<vmem>>, vector<8x44xf32>
      %cst_114 = arith.constant dense<0.000000e+00> : vector<2x44xf32>
      %425 = tpu.matmul %423, %424, %cst_114 {dimension_numbers = #tpu.dot_dimension_numbers<[1], [0], [0], [1], [0, 0, 1, 1], [], []>} : vector<2x8xf32>, vector<8x44xf32>, vector<2x44xf32> -> vector<2x44xf32>
      %426 = arith.addf %422, %425 : vector<2x44xf32>
      %c0_115 = arith.constant 0 : index
      %c0_116 = arith.constant 0 : index
      %427 = vector.load %arg24[%c0_115, %c0_116] : memref<1x44xf32, #tpu.memory_space<vmem>>, vector<1x44xf32>
      %428 = vector.broadcast %427 : vector<1x44xf32> to vector<2x44xf32>
      %429 = arith.addf %426, %428 : vector<2x44xf32>
      %cst_117 = arith.constant 0.000000e+00 : f32
      %430 = vector.broadcast %cst_117 : f32 to vector<2x44xf32>
      %431 = arith.maximumf %429, %430 : vector<2x44xf32>
      %c0_118 = arith.constant 0 : index
      %c0_119 = arith.constant 0 : index
      %432 = vector.load %arg25[%c0_118, %c0_119] : memref<44x3xf32, #tpu.memory_space<vmem>>, vector<44x3xf32>
      %cst_120 = arith.constant dense<0.000000e+00> : vector<2x3xf32>
      %433 = tpu.matmul %431, %432, %cst_120 {dimension_numbers = #tpu.dot_dimension_numbers<[1], [0], [0], [1], [0, 0, 1, 1], [], []>} : vector<2x44xf32>, vector<44x3xf32>, vector<2x3xf32> -> vector<2x3xf32>
      %c0_121 = arith.constant 0 : index
      %c0_122 = arith.constant 0 : index
      %434 = vector.load %arg26[%c0_121, %c0_122] : memref<1x3xf32, #tpu.memory_space<vmem>>, vector<1x3xf32>
      %435 = vector.broadcast %434 : vector<1x3xf32> to vector<2x3xf32>
      %436 = arith.addf %433, %435 : vector<2x3xf32>
      %c0_123 = arith.constant 0 : index
      %c0_124 = arith.constant 0 : index
      %437 = vector.load %arg27[%c0_123, %c0_124] : memref<2x3xf32, #tpu.memory_space<vmem>>, vector<2x3xf32>
      tpu.vector_store %arg27[%c0_123, %c0_124], %436 {strides = array<i32>} : memref<2x3xf32, #tpu.memory_space<vmem>>, vector<2x3xf32>,
    } else {
    }
    return
  }
  func.func @transform_0(%arg0: i32, %arg1: i32) -> (i32, i32, i32) {
    %c0_i32 = arith.constant 0 : i32
    %c0_i32_0 = arith.constant 0 : i32
    return %arg0, %arg1, %c0_i32 : i32, i32, i32
  }
  func.func @transform_1(%arg0: i32, %arg1: i32) -> (i32, i32, i32) {
    %c0_i32 = arith.constant 0 : i32
    %c0_i32_0 = arith.constant 0 : i32
    return %arg0, %arg1, %c0_i32 : i32, i32, i32
  }
  func.func @transform_2(%arg0: i32, %arg1: i32) -> (i32, i32) {
    %c0_i32 = arith.constant 0 : i32
    %c0_i32_0 = arith.constant 0 : i32
    return %arg0, %c0_i32 : i32, i32
  }
  func.func @transform_3(%arg0: i32, %arg1: i32) -> (i32, i32) {
    %c0_i32 = arith.constant 0 : i32
    %c0_i32_0 = arith.constant 0 : i32
    return %arg0, %c0_i32 : i32, i32
  }
  func.func @transform_4(%arg0: i32, %arg1: i32) -> (i32, i32) {
    %c0_i32 = arith.constant 0 : i32
    %c0_i32_0 = arith.constant 0 : i32
    %c0_i32_1 = arith.constant 0 : i32
    return %c0_i32, %c0_i32_0 : i32, i32
  }
  func.func @transform_5(%arg0: i32, %arg1: i32) -> (i32, i32) {
    %c0_i32 = arith.constant 0 : i32
    %c0_i32_0 = arith.constant 0 : i32
    %c0_i32_1 = arith.constant 0 : i32
    return %c0_i32, %c0_i32_0 : i32, i32
  }
  func.func @transform_6(%arg0: i32, %arg1: i32) -> (i32, i32) {
    %c0_i32 = arith.constant 0 : i32
    %c0_i32_0 = arith.constant 0 : i32
    %c0_i32_1 = arith.constant 0 : i32
    return %c0_i32, %c0_i32_0 : i32, i32
  }
  func.func @transform_7(%arg0: i32, %arg1: i32) -> (i32, i32) {
    %c0_i32 = arith.constant 0 : i32
    %c0_i32_0 = arith.constant 0 : i32
    %c0_i32_1 = arith.constant 0 : i32
    return %c0_i32, %c0_i32_0 : i32, i32
  }
  func.func @transform_8(%arg0: i32, %arg1: i32) -> (i32, i32) {
    %c0_i32 = arith.constant 0 : i32
    %c0_i32_0 = arith.constant 0 : i32
    %c0_i32_1 = arith.constant 0 : i32
    return %c0_i32, %c0_i32_0 : i32, i32
  }
  func.func @transform_9(%arg0: i32, %arg1: i32) -> (i32, i32) {
    %c0_i32 = arith.constant 0 : i32
    %c0_i32_0 = arith.constant 0 : i32
    %c0_i32_1 = arith.constant 0 : i32
    return %c0_i32, %c0_i32_0 : i32, i32
  }
  func.func @transform_10(%arg0: i32, %arg1: i32) -> (i32, i32) {
    %c0_i32 = arith.constant 0 : i32
    %c0_i32_0 = arith.constant 0 : i32
    %c0_i32_1 = arith.constant 0 : i32
    return %c0_i32, %c0_i32_0 : i32, i32
  }
  func.func @transform_11(%arg0: i32, %arg1: i32) -> (i32, i32) {
    %c0_i32 = arith.constant 0 : i32
    %c0_i32_0 = arith.constant 0 : i32
    %c0_i32_1 = arith.constant 0 : i32
    return %c0_i32, %c0_i32_0 : i32, i32
  }
  func.func @transform_12(%arg0: i32, %arg1: i32) -> (i32, i32) {
    %c0_i32 = arith.constant 0 : i32
    %c0_i32_0 = arith.constant 0 : i32
    %c0_i32_1 = arith.constant 0 : i32
    return %c0_i32, %c0_i32_0 : i32, i32
  }
  func.func @transform_13(%arg0: i32, %arg1: i32) -> (i32, i32) {
    %c0_i32 = arith.constant 0 : i32
    %c0_i32_0 = arith.constant 0 : i32
    %c0_i32_1 = arith.constant 0 : i32
    return %c0_i32, %c0_i32_0 : i32, i32
  }
  func.func @transform_14(%arg0: i32, %arg1: i32) -> (i32, i32) {
    %c0_i32 = arith.constant 0 : i32
    %c0_i32_0 = arith.constant 0 : i32
    %c0_i32_1 = arith.constant 0 : i32
    return %c0_i32, %c0_i32_0 : i32, i32
  }
  func.func @transform_15(%arg0: i32, %arg1: i32) -> (i32, i32) {
    %c0_i32 = arith.constant 0 : i32
    %c0_i32_0 = arith.constant 0 : i32
    %c0_i32_1 = arith.constant 0 : i32
    return %c0_i32, %c0_i32_0 : i32, i32
  }
  func.func @transform_16(%arg0: i32, %arg1: i32) -> (i32, i32) {
    %c0_i32 = arith.constant 0 : i32
    %c0_i32_0 = arith.constant 0 : i32
    %c0_i32_1 = arith.constant 0 : i32
    return %c0_i32, %c0_i32_0 : i32, i32
  }
  func.func @transform_17(%arg0: i32, %arg1: i32) -> (i32, i32) {
    %c0_i32 = arith.constant 0 : i32
    %c0_i32_0 = arith.constant 0 : i32
    %c0_i32_1 = arith.constant 0 : i32
    return %c0_i32, %c0_i32_0 : i32, i32
  }
  func.func @transform_18(%arg0: i32, %arg1: i32) -> (i32, i32) {
    %c0_i32 = arith.constant 0 : i32
    %c0_i32_0 = arith.constant 0 : i32
    %c0_i32_1 = arith.constant 0 : i32
    return %c0_i32, %c0_i32_0 : i32, i32
  }
  func.func @transform_19(%arg0: i32, %arg1: i32) -> (i32, i32) {
    %c0_i32 = arith.constant 0 : i32
    %c0_i32_0 = arith.constant 0 : i32
    %c0_i32_1 = arith.constant 0 : i32
    return %c0_i32, %c0_i32_0 : i32, i32
  }
  func.func @transform_20(%arg0: i32, %arg1: i32) -> (i32, i32) {
    %c0_i32 = arith.constant 0 : i32
    %c0_i32_0 = arith.constant 0 : i32
    %c0_i32_1 = arith.constant 0 : i32
    return %c0_i32, %c0_i32_0 : i32, i32
  }
  func.func @transform_21(%arg0: i32, %arg1: i32) -> (i32, i32) {
    %c0_i32 = arith.constant 0 : i32
    %c0_i32_0 = arith.constant 0 : i32
    %c0_i32_1 = arith.constant 0 : i32
    return %c0_i32, %c0_i32_0 : i32, i32
  }
  func.func @transform_22(%arg0: i32, %arg1: i32) -> (i32, i32) {
    %c0_i32 = arith.constant 0 : i32
    %c0_i32_0 = arith.constant 0 : i32
    %c0_i32_1 = arith.constant 0 : i32
    return %c0_i32, %c0_i32_0 : i32, i32
  }
  func.func @transform_23(%arg0: i32, %arg1: i32) -> (i32, i32) {
    %c0_i32 = arith.constant 0 : i32
    %c0_i32_0 = arith.constant 0 : i32
    %c0_i32_1 = arith.constant 0 : i32
    return %c0_i32, %c0_i32_0 : i32, i32
  }
  func.func @transform_24(%arg0: i32, %arg1: i32) -> (i32, i32) {
    %c0_i32 = arith.constant 0 : i32
    %c0_i32_0 = arith.constant 0 : i32
    %c0_i32_1 = arith.constant 0 : i32
    return %c0_i32, %c0_i32_0 : i32, i32
  }
  func.func @transform_25(%arg0: i32, %arg1: i32) -> (i32, i32) {
    %c0_i32 = arith.constant 0 : i32
    %c0_i32_0 = arith.constant 0 : i32
    return %arg0, %c0_i32 : i32, i32
  }
}

</mosaic_0001>

<bundles_post_ra>
// kernel: dual_lstm_forward.1
= control target key start
LH: loop header
LB: loop body
LE: loop exit
PB: predicated region body
PF: predicated region fallthrough
CT: control target
= control target key end

     0   :  { %s5705_s0 = inlined_call_operand.vmem [shape: f32[2,8,16], index: 0, kind: input, shape index: {}]   ;;  %s5706_s1 = inlined_call_operand.vmem [shape: f32[2,8,16], index: 1, kind: input, shape index: {}]   ;;  %s5707_s2 = inlined_call_operand.vmem [shape: f32[2,8], index: 2, kind: input, shape index: {}]   ;;  %s5708_s3 = inlined_call_operand.vmem [shape: f32[2,8], index: 3, kind: input, shape index: {}]   ;;  %s5709_s4 = inlined_call_operand.hbm [shape: f32[16,128], index: 4, kind: input, shape index: {}]   ;;  %s5710_s5 = inlined_call_operand.hbm [shape: f32[16,128], index: 5, kind: input, shape index: {}]   ;;  %s5711_s6 = inlined_call_operand.vmem [shape: f32[32,128], index: 6, kind: input, shape index: {}]   ;;  %s5712_s7 = inlined_call_operand.vmem [shape: f32[32,128], index: 7, kind: input, shape index: {}]   ;;  %s5713_s8 = inlined_call_operand.hbm [shape: f32[1,128], index: 8, kind: input, shape index: {}]   ;;  %s5714_s9 = inlined_call_operand.hbm [shape: f32[1,128], index: 9, kind: input, shape index: {}]   ;;  %s5715_s10 = inlined_call_operand.hbm [shape: f32[1,32], index: 10, kind: input, shape index: {}]   ;;  %s5716_s11 = inlined_call_operand.hbm [shape: f32[1,32], index: 11, kind: input, shape index: {}]   ;;  %s5717_s12 = inlined_call_operand.hbm [shape: f32[1,32], index: 12, kind: input, shape index: {}]   ;;  %s5718_s13 = inlined_call_operand.hbm [shape: f32[1,32], index: 13, kind: input, shape index: {}]   ;;  %s5719_s14 = inlined_call_operand.hbm [shape: f32[8,32], index: 14, kind: input, shape index: {}]   ;;  %s5720_s15 = inlined_call_operand.hbm [shape: f32[1,32], index: 15, kind: input, shape index: {}]   ;;  %s5721_s16 = inlined_call_operand.vmem [shape: f32[32,16], index: 16, kind: input, shape index: {}]   ;;  %s5722_s17 = inlined_call_operand.hbm [shape: f32[1,16], index: 17, kind: input, shape index: {}]   ;;  %s5723_s18 = inlined_call_operand.vmem [shape: f32[32,44], index: 18, kind: input, shape index: {}]   ;;  %s5724_s19 = inlined_call_operand.vmem [shape: f32[32,44], index: 19, kind: input, shape index: {}]   ;;  %s5725_s20 = inlined_call_operand.hbm [shape: f32[16,44], index: 20, kind: input, shape index: {}]   ;;  %s5726_s21 = inlined_call_operand.hbm [shape: f32[8,44], index: 21, kind: input, shape index: {}]   ;;  %s5727_s22 = inlined_call_operand.hbm [shape: f32[1,44], index: 22, kind: input, shape index: {}]   ;;  %s5728_s23 = inlined_call_operand.vmem [shape: f32[44,3], index: 23, kind: input, shape index: {}]   ;;  %s5729_s24 = inlined_call_operand.hbm [shape: f32[1,3], index: 24, kind: input, shape index: {}]   ;;  %s5730_s25 = inlined_call_operand.hbm [shape: f32[2,3], index: 25, kind: output, shape index: {}]  }
   0x1   :  { %5743 = sst [smem:[#allocation40_spill]] %s5705_s0 }
   0x2   :  { %5744 = sst [smem:[#allocation41_spill]] %s5706_s1 }
   0x3   :  { %5745 = sst [smem:[#allocation42_spill]] %s5707_s2 }
   0x4   :  { %5746 = sst [smem:[#allocation43_spill]] %s5708_s3 }
   0x5   :  { %5747 = sst [smem:[#allocation44_spill]] %s5709_s4 }
   0x6   :  { %5748 = sst [smem:[#allocation45_spill]] %s5710_s5 }
   0x7   :  { %5749 = sst [smem:[#allocation46_spill]] %s5711_s6 }
   0x8   :  { %5750 = sst [smem:[#allocation47_spill]] %s5712_s7 }
   0x9   :  { %5751 = sst [smem:[#allocation48_spill]] %s5713_s8 }
   0xa   :  { %5752 = sst [smem:[#allocation49_spill]] %s5714_s9 }
   0xb   :  { %30 = vsyncpa [#allocation7], 0 }
   0xc   :  { %31 = vsyncpa [#allocation10], 0 }
   0xd   :  { %32 = vsyncpa [#allocation13], 0 }
   0xe   :  { %33 = vsyncpa [#allocation16], 0 }
   0xf   :  { %34 = vsyncpa [#allocation19], 0 }
  0x10   :  { %35 = vsyncpa [#allocation22], 0 }
  0x11   :  { %36 = vsyncpa [#allocation25], 0 }
  0x12   :  { %37 = vsyncpa [#allocation28], 0 }
  0x13   :  { %38 = vsyncpa [#allocation8], 0  ;;  %s4723_s29 = smov [#allocation9]   ;;  %s4724_s6 = smov [#allocation12]  }
  0x14   :  { %s64_s2 = sshll.u32 %s4723_s29, 4  ;;  %s91_s30 = sshll.u32 %s4724_s6, 4  ;;  %s65_s2 = int_to_ptr.vmem [resolvable:$true] %s64_s2  ;;  %s4878_s30 = int_to_ptr.vmem [resolvable:$true] %s91_s30 }
  0x15   :  { %s5753_s26 = sld [smem:[#allocation45_spill]] }
  0x1b   :  { %s4353_s1 = scalar_lea.hbm %s5753_s26, 256 }
  0x1c   :  { %p4354_p0 = scmp.ne.s32.totalorder %s5753_s26, %s4353_s1  ;;  %p4357_p1 = scmp.lt.u32.totalorder %s4353_s1, %s5753_s26 }
  0x1e   :  { %p4359_p2 = pnand %p4357_p1, %p4354_p0 }
  0x20   :  { %4362 = shalt.err (!%p4359_p2)
}
  0x21   :  { %s4363_s9 = scalar_lea.vmem %s65_s2, 256  ;;  %p4368_p4 = scmp.lt.s32.totalorder %s65_s2, %s65_s2 }
  0x22   :  { %p4364_p3 = scmp.ne.s32.totalorder %s65_s2, %s4363_s9  ;;  %p4369_p5 = scmp.lt.s32.totalorder %s4363_s9, %s4363_s9 }
  0x24   :  { %p4370_p6 = por %p4369_p5, %p4368_p4 }
  0x26   :  { %p4371_p7 = pnand %p4370_p6, %p4364_p3 }
  0x28   :  { %4374 = shalt.err (!%p4371_p7)
}
  0x29   :  { %s5739_s5 = smov 128   ;;  %s5741_s0 = smov 8  }
  0x2a   :  { %70 = dma.hbm_to_vmem [thread:$0]  %s5753_s26, 256, %s65_s2, [#allocation10], %s5739_s5, %s5739_s5, %s5741_s0  }
  0x2b   :  { %s5754_s1 = sld [smem:[#allocation49_spill]] }
  0x31   :  { %s4375_s8 = scalar_lea.hbm %s5754_s1, 16 }
  0x32   :  { %p4376_p8 = scmp.ne.s32.totalorder %s5754_s1, %s4375_s8  ;;  %p4379_p9 = scmp.lt.u32.totalorder %s4375_s8, %s5754_s1 }
  0x34   :  { %p4381_p10 = pnand %p4379_p9, %p4376_p8 }
  0x36   :  { %4384 = shalt.err (!%p4381_p10)
}
  0x37   :  { %s4385_s29 = scalar_lea.vmem %s4878_s30, 16  ;;  %s4389_s2 = scalar_lea.vmem %s4878_s30, 32 }
  0x38   :  { %p4386_p11 = scmp.ne.s32.totalorder %s4878_s30, %s4385_s29  ;;  %p4390_p12 = scmp.lt.s32.totalorder %s4878_s30, %s4878_s30 }
  0x39   :  { %p4391_p13 = scmp.lt.s32.totalorder %s4389_s2, %s4385_s29 }
  0x3b   :  { %p4392_p0 = por %p4391_p13, %p4390_p12 }
  0x3d   :  { %p4393_p1 = pnand %p4392_p0, %p4386_p11 }
  0x3f   :  { %4396 = shalt.err (!%p4393_p1)
}
  0x40   :  { %94 = dma.hbm_to_vmem [thread:$0]  %s5754_s1, 16, %s4878_s30, [#allocation13]  }
  0x41   :  { %s4727_s7 = smov [#allocation15]   ;;  %s4728_s8 = smov [#allocation18]  }
  0x42   :  { %s111_s3 = sshll.u32 %s4727_s7, 4  ;;  %s131_s27 = sshll.u32 %s4728_s8, 4  ;;  %s112_s3 = int_to_ptr.vmem [resolvable:$true] %s111_s3  ;;  %s132_s27 = int_to_ptr.vmem [resolvable:$true] %s131_s27 }
  0x43   :  { %s4397_s9 = scalar_lea.hbm %s5716_s11, 16 }
  0x44   :  { %p4398_p2 = scmp.ne.s32.totalorder %s5716_s11, %s4397_s9  ;;  %p4401_p3 = scmp.lt.u32.totalorder %s4397_s9, %s5716_s11 }
  0x46   :  { %p4403_p4 = pnand %p4401_p3, %p4398_p2 }
  0x48   :  { %4406 = shalt.err (!%p4403_p4)
}
  0x49   :  { %s4407_s30 = scalar_lea.vmem %s112_s3, 16  ;;  %s4411_s1 = scalar_lea.vmem %s112_s3, 32 }
  0x4a   :  { %p4408_p5 = scmp.ne.s32.totalorder %s112_s3, %s4407_s30  ;;  %p4412_p6 = scmp.lt.s32.totalorder %s112_s3, %s112_s3 }
  0x4b   :  { %p4413_p7 = scmp.lt.s32.totalorder %s4411_s1, %s4407_s30 }
  0x4d   :  { %p4414_p8 = por %p4413_p7, %p4412_p6 }
  0x4f   :  { %p4415_p9 = pnand %p4414_p8, %p4408_p5 }
  0x51   :  { %4418 = shalt.err (!%p4415_p9)
}
  0x52   :  { %114 = dma.hbm_to_vmem [thread:$0]  %s5716_s11, 16, %s112_s3, [#allocation16]  }
  0x53   :  { %s4419_s8 = scalar_lea.hbm %s5718_s13, 16 }
  0x54   :  { %p4420_p10 = scmp.ne.s32.totalorder %s5718_s13, %s4419_s8  ;;  %p4423_p11 = scmp.lt.u32.totalorder %s4419_s8, %s5718_s13 }
  0x56   :  { %p4425_p12 = pnand %p4423_p11, %p4420_p10 }
  0x58   :  { %4428 = shalt.err (!%p4425_p12)
}
  0x59   :  { %s4429_s29 = scalar_lea.vmem %s132_s27, 16  ;;  %s4433_s2 = scalar_lea.vmem %s132_s27, 32 }
  0x5a   :  { %p4430_p13 = scmp.ne.s32.totalorder %s132_s27, %s4429_s29  ;;  %p4434_p0 = scmp.lt.s32.totalorder %s132_s27, %s132_s27 }
  0x5b   :  { %p4435_p1 = scmp.lt.s32.totalorder %s4433_s2, %s4429_s29 }
  0x5d   :  { %p4436_p2 = por %p4435_p1, %p4434_p0 }
  0x5f   :  { %p4437_p3 = pnand %p4436_p2, %p4430_p13 }
  0x61   :  { %4440 = shalt.err (!%p4437_p3)
}
  0x62   :  { %134 = dma.hbm_to_vmem [thread:$0]  %s5718_s13, 16, %s132_s27, [#allocation19]  }
  0x63   :  { %s4729_s30 = smov [#allocation21]   ;;  %s4730_s26 = smov [#allocation24]  }
  0x64   :  { %s151_s1 = sshll.u32 %s4729_s30, 4  ;;  %s176_s6 = sshll.u32 %s4730_s26, 4  ;;  %s152_s1 = int_to_ptr.vmem [resolvable:$true] %s151_s1  ;;  %s4937_s6 = int_to_ptr.vmem [resolvable:$true] %s176_s6 }
  0x65   :  { %s4441_s8 = scalar_lea.hbm %s5720_s15, 16 }
  0x66   :  { %p4442_p4 = scmp.ne.s32.totalorder %s5720_s15, %s4441_s8  ;;  %p4445_p5 = scmp.lt.u32.totalorder %s4441_s8, %s5720_s15 }
  0x68   :  { %p4447_p6 = pnand %p4445_p5, %p4442_p4 }
  0x6a   :  { %4450 = shalt.err (!%p4447_p6)
}
  0x6b   :  { %s4451_s13 = scalar_lea.vmem %s152_s1, 16  ;;  %s4455_s27 = scalar_lea.vmem %s152_s1, 32 }
  0x6c   :  { %p4452_p7 = scmp.ne.s32.totalorder %s152_s1, %s4451_s13  ;;  %p4456_p8 = scmp.lt.s32.totalorder %s152_s1, %s152_s1 }
  0x6d   :  { %p4457_p9 = scmp.lt.s32.totalorder %s4455_s27, %s4451_s13 }
  0x6f   :  { %p4458_p10 = por %p4457_p9, %p4456_p8 }
  0x71   :  { %p4459_p11 = pnand %p4458_p10, %p4452_p7 }
  0x73   :  { %4462 = shalt.err (!%p4459_p11)
}
  0x74   :  { %154 = dma.hbm_to_vmem [thread:$0]  %s5720_s15, 16, %s152_s1, [#allocation22]  }
  0x75   :  { %s4463_s30 = scalar_lea.hbm %s5725_s20, 256 }
  0x76   :  { %p4464_p12 = scmp.ne.s32.totalorder %s5725_s20, %s4463_s30  ;;  %p4467_p13 = scmp.lt.u32.totalorder %s4463_s30, %s5725_s20 }
  0x78   :  { %p4469_p0 = pnand %p4467_p13, %p4464_p12 }
  0x7a   :  { %4472 = shalt.err (!%p4469_p0)
}
  0x7b   :  { %s4473_s0 = scalar_lea.vmem %s4937_s6, 256  ;;  %p4478_p2 = scmp.lt.s32.totalorder %s4937_s6, %s4937_s6 }
  0x7c   :  { %p4474_p1 = scmp.ne.s32.totalorder %s4937_s6, %s4473_s0  ;;  %p4479_p3 = scmp.lt.s32.totalorder %s4473_s0, %s4473_s0 }
  0x7e   :  { %p4480_p4 = por %p4479_p3, %p4478_p2 }
  0x80   :  { %p4481_p5 = pnand %p4480_p4, %p4474_p1 }
  0x82   :  { %4484 = shalt.err (!%p4481_p5)
}
  0x83   :  { %s5755_s15 = smov 8   ;;  %s5756_s1 = smov 128  }
  0x84   :  { %182 = dma.hbm_to_vmem [thread:$0]  %s5725_s20, 256, %s4937_s6, [#allocation25], %s5756_s1, %s5756_s1, %s5755_s15  }
  0x85   :  { %s4731_s9 = smov [#allocation27]   ;;  %s4732_s27 = smov [#allocation6]  }
  0x86   :  { %s199_s13 = sshll.u32 %s4731_s9, 4  ;;  %s52_s29 = sshll.u32 %s4732_s27, 4  ;;  %s200_s13 = int_to_ptr.vmem [resolvable:$true] %s199_s13  ;;  %s4971_s29 = int_to_ptr.vmem [resolvable:$true] %s52_s29 }
  0x87   :  { %s4485_s3 = scalar_lea.hbm %s5727_s22, 16 }
  0x88   :  { %p4486_p6 = scmp.ne.s32.totalorder %s5727_s22, %s4485_s3  ;;  %p4489_p7 = scmp.lt.u32.totalorder %s4485_s3, %s5727_s22 }
  0x8a   :  { %p4491_p8 = pnand %p4489_p7, %p4486_p6 }
  0x8c   :  { %4494 = shalt.err (!%p4491_p8)
}
  0x8d   :  { %s4495_s20 = scalar_lea.vmem %s200_s13, 16  ;;  %s4499_s6 = scalar_lea.vmem %s200_s13, 32 }
  0x8e   :  { %p4496_p9 = scmp.ne.s32.totalorder %s200_s13, %s4495_s20  ;;  %p4500_p10 = scmp.lt.s32.totalorder %s200_s13, %s200_s13 }
  0x8f   :  { %p4501_p11 = scmp.lt.s32.totalorder %s4499_s6, %s4495_s20 }
  0x91   :  { %p4502_p12 = por %p4501_p11, %p4500_p10 }
  0x93   :  { %p4503_p13 = pnand %p4502_p12, %p4496_p9 }
  0x95   :  { %4506 = shalt.err (!%p4503_p13)
}
  0x96   :  { %202 = dma.hbm_to_vmem [thread:$0]  %s5727_s22, 16, %s200_s13, [#allocation28]  }
  0x97   :  { %s5757_s9 = sld [smem:[#allocation44_spill]] }
  0x9d   :  { %s4507_s27 = scalar_lea.hbm %s5757_s9, 256 }
  0x9e   :  { %p4508_p0 = scmp.ne.s32.totalorder %s5757_s9, %s4507_s27  ;;  %p4511_p1 = scmp.lt.u32.totalorder %s4507_s27, %s5757_s9 }
  0xa0   :  { %p4513_p2 = pnand %p4511_p1, %p4508_p0 }
  0xa2   :  { %4516 = shalt.err (!%p4513_p2)
}
  0xa3   :  { %s4517_s26 = scalar_lea.vmem %s4971_s29, 256  ;;  %p4522_p4 = scmp.lt.s32.totalorder %s4971_s29, %s4971_s29 }
  0xa4   :  { %p4518_p3 = scmp.ne.s32.totalorder %s4971_s29, %s4517_s26  ;;  %p4523_p5 = scmp.lt.s32.totalorder %s4517_s26, %s4517_s26 }
  0xa6   :  { %p4524_p6 = por %p4523_p5, %p4522_p4 }
  0xa8   :  { %p4525_p7 = pnand %p4524_p6, %p4518_p3 }
  0xaa   :  { %4528 = shalt.err (!%p4525_p7)
}
  0xab   :  { %58 = dma.hbm_to_vmem [thread:$0]  %s5757_s9, 256, %s4971_s29, [#allocation7], %s5756_s1, %s5756_s1, %s5755_s15  }
  0xac   :  { %s4733_s5 = smov [#allocation11]   ;;  %s4734_s20 = smov [#allocation14]  }
  0xad   :  { %s81_s7 = sshll.u32 %s4733_s5, 4  ;;  %s101_s6 = sshll.u32 %s4734_s20, 4  ;;  %s82_s7 = int_to_ptr.vmem [resolvable:$true] %s81_s7  ;;  %s102_s6 = int_to_ptr.vmem [resolvable:$true] %s101_s6 }
  0xae   :  { %s5758_s4 = sld [smem:[#allocation48_spill]] }
  0xb4   :  { %s4529_s28 = scalar_lea.hbm %s5758_s4, 16 }
  0xb5   :  { %p4530_p8 = scmp.ne.s32.totalorder %s5758_s4, %s4529_s28  ;;  %p4533_p9 = scmp.lt.u32.totalorder %s4529_s28, %s5758_s4 }
  0xb7   :  { %p4535_p10 = pnand %p4533_p9, %p4530_p8 }
  0xb9   :  { %4538 = shalt.err (!%p4535_p10)
}
  0xba   :  { %s4539_s15 = scalar_lea.vmem %s82_s7, 16  ;;  %s4543_s1 = scalar_lea.vmem %s82_s7, 32 }
  0xbb   :  { %p4540_p11 = scmp.ne.s32.totalorder %s82_s7, %s4539_s15  ;;  %p4544_p12 = scmp.lt.s32.totalorder %s82_s7, %s82_s7 }
  0xbc   :  { %p4545_p13 = scmp.lt.s32.totalorder %s4543_s1, %s4539_s15 }
  0xbe   :  { %p4546_p0 = por %p4545_p13, %p4544_p12 }
  0xc0   :  { %p4547_p1 = pnand %p4546_p0, %p4540_p11 }
  0xc2   :  { %4550 = shalt.err (!%p4547_p1)
}
  0xc3   :  { %84 = dma.hbm_to_vmem [thread:$0]  %s5758_s4, 16, %s82_s7, [#allocation10]  }
  0xc4   :  { %s4551_s22 = scalar_lea.hbm %s5715_s10, 16 }
  0xc5   :  { %p4552_p2 = scmp.ne.s32.totalorder %s5715_s10, %s4551_s22  ;;  %p4555_p3 = scmp.lt.u32.totalorder %s4551_s22, %s5715_s10 }
  0xc7   :  { %p4557_p4 = pnand %p4555_p3, %p4552_p2 }
  0xc9   :  { %4560 = shalt.err (!%p4557_p4)
}
  0xca   :  { %s4561_s0 = scalar_lea.vmem %s102_s6, 16  ;;  %s4565_s28 = scalar_lea.vmem %s102_s6, 32 }
  0xcb   :  { %p4562_p5 = scmp.ne.s32.totalorder %s102_s6, %s4561_s0  ;;  %p4566_p6 = scmp.lt.s32.totalorder %s102_s6, %s102_s6 }
  0xcc   :  { %p4567_p7 = scmp.lt.s32.totalorder %s4565_s28, %s4561_s0 }
  0xce   :  { %p4568_p8 = por %p4567_p7, %p4566_p6 }
  0xd0   :  { %p4569_p9 = pnand %p4568_p8, %p4562_p5 }
  0xd2   :  { %4572 = shalt.err (!%p4569_p9)
}
  0xd3   :  { %104 = dma.hbm_to_vmem [thread:$0]  %s5715_s10, 16, %s102_s6, [#allocation13]  }
  0xd4   :  { %s4735_s27 = smov [#allocation17]   ;;  %s4736_s11 = smov [#allocation20]  }
  0xd5   :  { %s121_s2 = sshll.u32 %s4735_s27, 4  ;;  %s141_s3 = sshll.u32 %s4736_s11, 4  ;;  %s122_s2 = int_to_ptr.vmem [resolvable:$true] %s121_s2  ;;  %s142_s3 = int_to_ptr.vmem [resolvable:$true] %s141_s3 }
  0xd6   :  { %s4573_s29 = scalar_lea.hbm %s5717_s12, 16 }
  0xd7   :  { %p4574_p10 = scmp.ne.s32.totalorder %s5717_s12, %s4573_s29  ;;  %p4577_p11 = scmp.lt.u32.totalorder %s4573_s29, %s5717_s12 }
  0xd9   :  { %p4579_p12 = pnand %p4577_p11, %p4574_p10 }
  0xdb   :  { %4582 = shalt.err (!%p4579_p12)
}
  0xdc   :  { %s4583_s10 = scalar_lea.vmem %s122_s2, 16  ;;  %s4587_s6 = scalar_lea.vmem %s122_s2, 32 }
  0xdd   :  { %p4584_p13 = scmp.ne.s32.totalorder %s122_s2, %s4583_s10  ;;  %p4588_p0 = scmp.lt.s32.totalorder %s122_s2, %s122_s2 }
  0xde   :  { %p4589_p1 = scmp.lt.s32.totalorder %s4587_s6, %s4583_s10 }
  0xe0   :  { %p4590_p2 = por %p4589_p1, %p4588_p0 }
  0xe2   :  { %p4591_p3 = pnand %p4590_p2, %p4584_p13 }
  0xe4   :  { %4594 = shalt.err (!%p4591_p3)
}
  0xe5   :  { %124 = dma.hbm_to_vmem [thread:$0]  %s5717_s12, 16, %s122_s2, [#allocation16]  }
  0xe6   :  { %s4595_s0 = scalar_lea.hbm %s5719_s14, 128 }
  0xe7   :  { %p4596_p4 = scmp.ne.s32.totalorder %s5719_s14, %s4595_s0  ;;  %p4599_p5 = scmp.lt.u32.totalorder %s4595_s0, %s5719_s14 }
  0xe9   :  { %p4601_p6 = pnand %p4599_p5, %p4596_p4 }
  0xeb   :  { %4604 = shalt.err (!%p4601_p6)
}
  0xec   :  { %s4605_s11 = scalar_lea.vmem %s142_s3, 128  ;;  %p4610_p8 = scmp.lt.s32.totalorder %s142_s3, %s142_s3 }
  0xed   :  { %p4606_p7 = scmp.ne.s32.totalorder %s142_s3, %s4605_s11  ;;  %p4611_p9 = scmp.lt.s32.totalorder %s4605_s11, %s4605_s11 }
  0xef   :  { %p4612_p10 = por %p4611_p9, %p4610_p8 }
  0xf1   :  { %p4613_p11 = pnand %p4612_p10, %p4606_p7 }
  0xf3   :  { %4616 = shalt.err (!%p4613_p11)
}
  0xf4   :  { %144 = dma.hbm_to_vmem [thread:$0]  %s5719_s14, 128, %s142_s3, [#allocation19]  }
  0xf5   :  { %s4737_s15 = smov [#allocation23]   ;;  %s4738_s29 = smov [#allocation26]  }
  0xf6   :  { %s163_s1 = sshll.u32 %s4737_s15, 4  ;;  %s189_s9 = sshll.u32 %s4738_s29, 4  ;;  %s164_s1 = int_to_ptr.vmem [resolvable:$true] %s163_s1  ;;  %s190_s9 = int_to_ptr.vmem [resolvable:$true] %s189_s9 }
  0xf7   :  { %s4617_s22 = scalar_lea.hbm %s5722_s17, 16 }
  0xf8   :  { %p4618_p12 = scmp.ne.s32.totalorder %s5722_s17, %s4617_s22  ;;  %p4621_p13 = scmp.lt.u32.totalorder %s4617_s22, %s5722_s17 }
  0xfa   :  { %p4623_p0 = pnand %p4621_p13, %p4618_p12 }
  0xfc   :  { %4626 = shalt.err (!%p4623_p0)
}
  0xfd   :  { %s4627_s14 = scalar_lea.vmem %s164_s1, 16  ;;  %s4631_s3 = scalar_lea.vmem %s164_s1, 32 }
  0xfe   :  { %p4628_p1 = scmp.ne.s32.totalorder %s164_s1, %s4627_s14  ;;  %p4632_p2 = scmp.lt.s32.totalorder %s164_s1, %s164_s1 }
  0xff   :  { %p4633_p3 = scmp.lt.s32.totalorder %s4631_s3, %s4627_s14 }
 0x101   :  { %p4634_p4 = por %p4633_p3, %p4632_p2 }
 0x103   :  { %p4635_p5 = pnand %p4634_p4, %p4628_p1 }
 0x105   :  { %4638 = shalt.err (!%p4635_p5)
}
 0x106   :  { %166 = dma.hbm_to_vmem [thread:$0]  %s5722_s17, 16, %s164_s1, [#allocation22]  }
 0x107   :  { %s4639_s7 = scalar_lea.hbm %s5726_s21, 128 }
 0x108   :  { %p4640_p6 = scmp.ne.s32.totalorder %s5726_s21, %s4639_s7  ;;  %p4643_p7 = scmp.lt.u32.totalorder %s4639_s7, %s5726_s21 }
 0x10a   :  { %p4645_p8 = pnand %p4643_p7, %p4640_p6 }
 0x10c   :  { %4648 = shalt.err (!%p4645_p8)
}
 0x10d   :  { %s4649_s2 = scalar_lea.vmem %s190_s9, 128  ;;  %p4654_p10 = scmp.lt.s32.totalorder %s190_s9, %s190_s9 }
 0x10e   :  { %p4650_p9 = scmp.ne.s32.totalorder %s190_s9, %s4649_s2  ;;  %p4655_p11 = scmp.lt.s32.totalorder %s4649_s2, %s4649_s2 }
 0x110   :  { %p4656_p12 = por %p4655_p11, %p4654_p10 }
 0x112   :  { %p4657_p13 = pnand %p4656_p12, %p4650_p9 }
 0x114   :  { %4660 = shalt.err (!%p4657_p13)
}
 0x115   :  { %192 = dma.hbm_to_vmem [thread:$0]  %s5726_s21, 128, %s190_s9, [#allocation25]  }
 0x116   :  { %s4739_s1 = smov [#allocation29]   ;;  %s4661_s22 = scalar_lea.hbm %s5729_s24, 16 }
 0x117   :  { %s211_s29 = sshll.u32 %s4739_s1, 4  ;;  %p4662_p0 = scmp.ne.s32.totalorder %s5729_s24, %s4661_s22  ;;  %s212_s29 = int_to_ptr.vmem [resolvable:$true] %s211_s29 }
 0x118   :  { %p4665_p1 = scmp.lt.u32.totalorder %s4661_s22, %s5729_s24 }
 0x11a   :  { %p4667_p2 = pnand %p4665_p1, %p4662_p0 }
 0x11c   :  { %4670 = shalt.err (!%p4667_p2)
}
 0x11d   :  { %s4671_s14 = scalar_lea.vmem %s212_s29, 16  ;;  %s4675_s21 = scalar_lea.vmem %s212_s29, 32 }
 0x11e   :  { %p4672_p3 = scmp.ne.s32.totalorder %s212_s29, %s4671_s14  ;;  %p4676_p4 = scmp.lt.s32.totalorder %s212_s29, %s212_s29 }
 0x11f   :  { %p4677_p5 = scmp.lt.s32.totalorder %s4675_s21, %s4671_s14 }
 0x121   :  { %p4678_p6 = por %p4677_p5, %p4676_p4 }
 0x123   :  { %p4679_p7 = pnand %p4678_p6, %p4672_p3 }
 0x125   :  { %4682 = shalt.err (!%p4679_p7)
}
 0x126   :  { %214 = dma.hbm_to_vmem [thread:$0]  %s5729_s24, 16, %s212_s29, [#allocation28]  }
 0x127   :  { %4705 = dma.done.wait [#allocation7], 256  }
 0x128   :  { %4706 = vsyncadd [#allocation7], 4294967040 }
 0x129   :  { %4707 = dma.done.wait [#allocation10], 272  }
 0x12a   :  { %4708 = vsyncadd [#allocation10], 4294967024 }
 0x12b   :  { %4709 = dma.done.wait [#allocation13], 32  }
 0x12c   :  { %4710 = vsyncadd [#allocation13], 4294967264 }
 0x12d   :  { %4711 = dma.done.wait [#allocation16], 32  }
 0x12e   :  { %4712 = vsyncadd [#allocation16], 4294967264 }
 0x12f   :  { %4713 = dma.done.wait [#allocation19], 144  }
 0x130   :  { %4714 = vsyncadd [#allocation19], 4294967152 }
 0x131   :  { %4715 = dma.done.wait [#allocation22], 32  }
 0x132   :  { %4716 = vsyncadd [#allocation22], 4294967264 }
 0x133   :  { %4717 = dma.done.wait [#allocation25], 384  }
 0x134   :  { %4718 = vsyncadd [#allocation25], 4294966912 }
 0x135   :  { %4719 = dma.done.wait [#allocation28], 32  }
 0x136   :  { %4720 = vsyncadd [#allocation28], 4294967264  ;;  %v4740_v0 = vmov 0.0|0.0   ;;  %vm4741_vm0 = vmmov 0   ;;  %v4742_v1 = vmov 0.0   ;;  %vm264_vm1 = vcmask 254976  }
 0x137   :  { %3943 = vmatprep.subr.bf16.mxu1 %v4740_v0  ;;  %3707 = vmatprep.mubr.msk.f32.mxu1 %vm4741_vm0, %v4742_v1  ;;  %267 = vst.msk [vmem:[#allocation4] sm:$0x3] %vm264_vm1, %v4742_v1  ;;  %265 = vst.msk [vmem:[#allocation2] sm:$0x3] %vm264_vm1, %v4742_v1  ;;  %vm282_vm2 = vcmask 130048   ;;  %v273_v2 = vld [vmem:[#allocation6] sm:$0xff] }
 0x138   :  { %266 = vst.msk [vmem:[#allocation3] sm:$0x3] %vm264_vm1, %v4742_v1  ;;  %268 = vst.msk [vmem:[#allocation5] sm:$0x3] %vm264_vm1, %v4742_v1  ;;  %v274_v3 = vld [vmem:[#allocation6 + $0x8] sm:$0xff]  ;;  %s5759_s8 = sld [smem:[#allocation47_spill]] }
 0x139   :  { %v3929_v5 = vpack.c.bf16 %v274_v3, %v273_v2  ;;  %s5760_s27 = sld [smem:[#allocation40_spill]]  ;;  %v364_v9 = vld [vmem:[#allocation9] sm:$0xff]  ;;  %v365_v10 = vld [vmem:[#allocation9 + $0x8] sm:$0xff]  ;;  %s5761_s26 = sld [smem:[#allocation46_spill]]  ;;  %vm466_vm3 = vcmask 261120   ;;  %vm740_vm4 = vcmask 1041409  }
 0x13a   :  { %v3933_v12 = vpack.c.bf16 %v365_v10, %v364_v9  ;;  %s5762_s5 = sld [smem:[#allocation41_spill]]  ;;  %v3490_v28 = vld [vmem:[#allocation12] ss:$0 sm:$0xff]  ;;  %v3487_v38 = vld [vmem:[#allocation11] ss:$0 sm:$0xff]  ;;  %s4744_s0 = smov 64  }
 0x13b   :  { %3930 = vmatprep.subr.bf16.mxu0 %v3929_v5  ;;  %s5763_s4 = sld [smem:[#allocation42_spill]]  ;;  %vm2885_vm5 = vcmask 64512   ;;  %vm2703_vm6 = vcmask 253952   ;;  %vm2701_vm7 = vcmask 261127   ;;  %s4745_s28 = smov 96   ;;  %vm3389_vm8 = vcmask 1043456  }
 0x13c   :  { %3932 = vmatpush3.bf16.msra.mxu0 %v3929_v5  ;;  %s5764_s7 = sld [smem:[#allocation43_spill]]  ;;  %vm4746_vm9 = vmmov 1   ;;  %vm3385_vm11 = vcmask 359424   ;;  %vm3463_vm12 = vcmask 17408  }
 0x13d   :  { %3934 = vmatprep.subr.bf16.mxu0 %v3933_v12  ;;  %vm4062_vm10 = vmpackc.low %vm3389_vm8, %vm4746_vm9 }
 0x13e   :  { %v458_v4 = vld [vmem:[%s5759_s8] sm:$0xff]  ;;  %v459_v6 = vld [vmem:[%s5759_s8 + $0x8] sm:$0xff]  ;;  %v460_v11 = vld [vmem:[%s5759_s8 + $0x10] sm:$0xff] }
 0x13f   :  { %v269_v7 = vld [vmem:[%s5760_s27] sm:$0xff]  ;;  %v5105_v8 = vpack.c.bf16 %v459_v6, %v458_v4  ;;  %v461_v13 = vld [vmem:[%s5759_s8 + $0x18] sm:$0xff]  ;;  %v270_v14 = vld [vmem:[%s5760_s27 + $0x8] sm:$0xff]  ;;  %s4743_s8 = smov 32  }
 0x140   :  { %3678 = vmatprep.mubr.msk.f32.mxu0 %vm282_vm2, %v269_v7  ;;  %v5118_v15 = vpack.c.bf16 %v461_v13, %v460_v11  ;;  %v454_v16 = vld [vmem:[%s5761_s26] sm:$0xff]  ;;  %v455_v17 = vld [vmem:[%s5761_s26 + $0x8] sm:$0xff]  ;;  %v456_v22 = vld [vmem:[%s5761_s26 + $0x10] sm:$0xff] }
 0x141   :  { %3945 = vmatpush3.bf16.msra.mxu1 %v5105_v8  ;;  %v271_v18 = vld [vmem:[%s5762_s5] sm:$0xff]  ;;  %3679 = vmatmul.mubr.msk.f32.vlgmr.msra.gmra.mrb[0].mxu0 %vm282_vm2, %v270_v14  ;;  %v272_v19 = vld [vmem:[%s5762_s5 + $0x8] sm:$0xff]  ;;  %v5135_v21 = vpack.c.bf16 %v455_v17, %v454_v16  ;;  %v457_v23 = vld [vmem:[%s5761_s26 + $0x18] sm:$0xff] }
 0x142   :  { %3946 = vmatprep.subr.bf16.mxu1 %v4740_v0  ;;  %3936 = vmatpush3.bf16.msra.mxu0 %v3933_v12  ;;  %v464_v20 = vld [vmem:[#allocation4] sm:$0x3]  ;;  %v5149_v24 = vpack.c.bf16 %v457_v23, %v456_v22  ;;  %v462_v25 = vld [vmem:[#allocation2] sm:$0x3]  ;;  %v465_v47 = vld [vmem:[#allocation5] sm:$0x3] }
 0x143   :  { %3685 = vmatprep.mubr.msk.f32.mxu0 %vm282_vm2, %v271_v18  ;;  %3937 = vmatprep.subr.bf16.mxu0 %v4740_v0  ;;  %v696_v49 = vrot.slane %v465_v47, 1  ;;  %v463_v52 = vld [vmem:[#allocation3] sm:$0x3] }
 0x144   :  { %v561_v53 = vrot.slane %v463_v52, 1 }
 0x145   :  { %3948 = vmatpush3.bf16.msra.mxu1 %v5118_v15  ;;  %3686 = vmatmul.mubr.msk.f32.vlgmr.msra.gmra.mrb[2].mxu0 %vm282_vm2, %v272_v19 }
 0x146   :  { %3955 = vmatprep.subr.bf16.mxu1 %v4740_v0  ;;  %3939 = vmatpush3.bf16.msra.mxu0 %v5135_v21 }
 0x147   :  { %3696 = vmatprep.mubr.msk.f32.mxu0 %vm4741_vm0, %v4742_v1  ;;  %3940 = vmatprep.subr.bf16.mxu0 %v4740_v0 }
 0x148   :  { %3708 = vmatmul.mubr.msk.f32.vlgmr.msra.gmra.mrb[0].mxu1 %vm466_vm3, %v464_v20 }
 0x149   :  { %3957 = vmatpush3.bf16.msra.mxu1 %v5105_v8  ;;  %3729 = vmatprep.mubr.msk.f32.mxu1 %vm4741_vm0, %v4742_v1 }
 0x14a   :  { %3958 = vmatprep.subr.bf16.mxu1 %v4740_v0  ;;  %3942 = vmatpush3.bf16.msra.mxu0 %v5149_v24 }
 0x14b   :  { %3949 = vmatprep.subr.bf16.mxu0 %v4740_v0 }
 0x14d   :  { %3960 = vmatpush3.bf16.msra.mxu1 %v5118_v15  ;;  %3697 = vmatmul.mubr.msk.f32.vlgmr.msra.gmra.mrb[4].mxu0 %vm466_vm3, %v462_v25 }
 0x14e   :  { %3967 = vmatprep.subr.bf16.mxu1 %v4740_v0  ;;  %3951 = vmatpush3.bf16.msra.mxu0 %v5135_v21 }
 0x14f   :  { %3718 = vmatprep.mubr.msk.f32.mxu0 %vm4741_vm0, %v4742_v1  ;;  %3952 = vmatprep.subr.bf16.mxu0 %v4740_v0 }
 0x152   :  { %3954 = vmatpush3.bf16.msra.mxu0 %v5149_v24 }
 0x153   :  { %3961 = vmatprep.subr.bf16.mxu0 %v4740_v0 }
 0x214   :  { %v3680_v26 = vpop.f32.mrb[0].mxu0 }
 0x215   :  { %v355_v27 = vpop.f32.mrb[1].mxu0  ;;  %v5175_v40 = vadd.f32 %v3680_v26, %v3487_v38 }
 0x216   :  { %v5178_v44 = vadd.f32 %v3487_v38, %v355_v27 }
 0x218   :  { %v3687_v29 = vpop.f32.mrb[2].mxu0 }
 0x219   :  { %v5169_v31 = vadd.f32 %v3687_v29, %v3490_v28  ;;  %v445_v33 = vpop.f32.mrb[3].mxu0 }
 0x21a   :  { %v5171_v35 = vadd.f32 %v3490_v28, %v445_v33 }
 0x21b   :  { %v671_v30 = vpop.f32.mrb[0].mxu1 }
 0x21c   :  { %v676_v32 = vrot.slane %v671_v30, 1  ;;  %v3709_v34 = vpop.f32.mrb[1].mxu1  ;;  %v679_v37 = vadd.f32 %v671_v30, %v5171_v35 }
 0x21e   :  { %v680_v36 = vadd.f32 %v676_v32, %v5169_v31  ;;  %v3497_v55 = vmul.f32 -1.442695, %v679_v37 }
 0x220   :  { %4089 = vtanh.f32 %v680_v36  ;;  %v536_v39 = vpop.f32.mrb[4].mxu0  ;;  %v3498_v54 = vmul.f32 -1.442695, %v680_v36 }
 0x221   :  { %v541_v41 = vrot.slane %v536_v39, 1  ;;  %v3698_v42 = vpop.f32.mrb[5].mxu0  ;;  %4091 = vtanh.f32 %v679_v37  ;;  %v544_v45 = vadd.f32 %v536_v39, %v5178_v44 }
 0x223   :  { %v545_v43 = vadd.f32 %v541_v41, %v5175_v40  ;;  %v3494_v57 = vmul.f32 -1.442695, %v544_v45 }
 0x225   :  { %4093 = vtanh.f32 %v545_v43  ;;  %v3495_v56 = vmul.f32 -1.442695, %v545_v43 }
 0x226   :  { %4095 = vtanh.f32 %v544_v45 }
 0x227   :  { %4097 = vpow2.f32 %v3498_v54 }
 0x228   :  { %4099 = vpow2.f32 %v3497_v55 }
 0x229   :  { %4101 = vpow2.f32 %v3495_v56 }
 0x22a   :  { %v4090_v46 = vpop.eup %4089  ;;  %4103 = vpow2.f32 %v3494_v57 }
 0x22b   :  { %709 = vrot.lane.b32.xlu0 %v4090_v46, %s4743_s8  ;;  %v4092_v48 = vpop.eup %4091 }
 0x22f   :  { %707 = vrot.lane.b32.xlu0 %v4092_v48, %s4743_s8  ;;  %v4094_v50 = vpop.eup %4093 }
 0x230   :  { %574 = vrot.lane.b32.xlu1 %v4094_v50, %s4743_s8  ;;  %v4096_v51 = vpop.eup %4095 }
 0x231   :  { %v4098_v58 = vpop.eup %4097 }
 0x232   :  { %v688_v59 = vadd.f32 1.0, %v4098_v58  ;;  %v4100_v60 = vpop.eup %4099 }
 0x233   :  { %699 = vrot.lane.b32.xlu0 %v696_v49, %s4743_s8  ;;  %v687_v61 = vadd.f32 1.0, %v4100_v60  ;;  %v4102_v62 = vpop.eup %4101 }
 0x234   :  { %572 = vrot.lane.b32.xlu1 %v4096_v51, %s4743_s8  ;;  %4105 = vrcp.f32 %v688_v59  ;;  %v553_v63 = vadd.f32 1.0, %v4102_v62  ;;  %v4104_v2 = vpop.eup %4103 }
 0x235   :  { %4107 = vrcp.f32 %v687_v61  ;;  %v552_v3 = vadd.f32 1.0, %v4104_v2 }
 0x236   :  { %4109 = vrcp.f32 %v553_v63 }
 0x237   :  { %4111 = vrcp.f32 %v552_v3 }
 0x238   :  { %697 = vrot.lane.b32.xlu1 %v465_v47, %s4743_s8 }
 0x23c   :  { %564 = vrot.lane.b32.xlu1 %v561_v53, %s4743_s8 }
 0x23e   :  { %v4106_v4 = vpop.eup %4105 }
 0x23f   :  { %v4108_v7 = vpop.eup %4107 }
 0x240   :  { %562 = vrot.lane.b32.xlu1 %v463_v52, %s4743_s8  ;;  %v4110_v11 = vpop.eup %4109 }
 0x241   :  { %v4112_v14 = vpop.eup %4111 }
 0x29d   :  { %v710_v5 = vpop.permute.xlu0 %709 }
 0x29e   :  { %v714_v6 = vmul.f32 %v4106_v4, %v710_v5 }
 0x2a0   :  { %719 = vrot.lane.b32.xlu0 %v714_v6, %s4743_s8 }
 0x2a1   :  { %v708_v9 = vpop.permute.xlu0 %707 }
 0x2a2   :  { %v713_v10 = vmul.f32 %v4108_v7, %v708_v9  ;;  %v575_v12 = vpop.permute.xlu1 %574 }
 0x2a3   :  { %v579_v13 = vmul.f32 %v4110_v11, %v575_v12 }
 0x2a4   :  { %717 = vrot.lane.b32.xlu0 %v713_v10, %s4743_s8 }
 0x2a5   :  { %v700_v18 = vpop.permute.xlu0 %699 }
 0x2a6   :  { %v573_v16 = vpop.permute.xlu1 %572  ;;  %v704_v20 = vmul.f32 %v4106_v4, %v700_v18 }
 0x2a7   :  { %v578_v17 = vmul.f32 %v4112_v14, %v573_v16 }
 0x2a8   :  { %584 = vrot.lane.b32.xlu0 %v579_v13, %s4743_s8 }
 0x2a9   :  { %582 = vrot.lane.b32.xlu1 %v578_v17, %s4743_s8 }
 0x2aa   :  { %v698_v19 = vpop.permute.xlu1 %697 }
 0x2ab   :  { %v703_v25 = vmul.f32 %v4108_v7, %v698_v19 }
 0x2ae   :  { %v565_v26 = vpop.permute.xlu1 %564 }
 0x2af   :  { %v569_v29 = vmul.f32 %v4110_v11, %v565_v26 }
 0x2b2   :  { %v563_v30 = vpop.permute.xlu1 %562 }
 0x2b3   :  { %v568_v34 = vmul.f32 %v4112_v14, %v563_v30 }
 0x312   :  { %v720_v22 = vpop.permute.xlu0 %719 }
 0x313   :  { %v5193_v23 = vadd.f32 %v720_v22, %v704_v20 }
 0x315   :  { %4113 = vtanh.f32 %v5193_v23 }
 0x316   :  { %v718_v27 = vpop.permute.xlu0 %717 }
 0x317   :  { %v5196_v28 = vadd.f32 %v718_v27, %v703_v25 }
 0x319   :  { %4115 = vtanh.f32 %v5196_v28 }
 0x31a   :  { %v585_v32 = vpop.permute.xlu0 %584 }
 0x31b   :  { %v5199_v33 = vadd.f32 %v585_v32, %v569_v29  ;;  %v583_v37 = vpop.permute.xlu1 %582 }
 0x31c   :  { %v5202_v38 = vadd.f32 %v583_v37, %v568_v34 }
 0x31d   :  { %4117 = vtanh.f32 %v5199_v33 }
 0x31e   :  { %4119 = vtanh.f32 %v5202_v38 }
 0x31f   :  { %v4114_v36 = vpop.eup %4113 }
 0x320   :  { %731 = vrot.lane.b32.xlu0 %v4114_v36, %s4743_s8 }
 0x323   :  { %v4116_v39 = vpop.eup %4115 }
 0x324   :  { %729 = vrot.lane.b32.xlu1 %v4116_v39, %s4743_s8 }
 0x327   :  { %v4118_v41 = vpop.eup %4117 }
 0x328   :  { %596 = vrot.lane.b32.xlu0 %v4118_v41, %s4743_s8  ;;  %v4120_v42 = vpop.eup %4119 }
 0x329   :  { %594 = vrot.lane.b32.xlu1 %v4120_v42, %s4743_s8 }
 0x392   :  { %v732_v43 = vpop.permute.xlu0 %731 }
 0x393   :  { %v736_v45 = vmul.f32 %v4106_v4, %v732_v43 }
 0x395   :  { %v878_v47 = vrot.slane %v736_v45, 7 }
 0x396   :  { %v730_v46 = vpop.permute.xlu1 %729 }
 0x397   :  { %v735_v48 = vmul.f32 %v4108_v7, %v730_v46  ;;  %v977_v46 = vrot.slane %v5193_v23, 7 }
 0x399   :  { %v879_v49 = vsel %vm740_vm4, %v878_v47, %v735_v48  ;;  %v976_v48 = vrot.slane %v5196_v28, 7 }
 0x39a   :  { %880 = vrot.lane.b32.xlu0 %v879_v49, %s4744_s0  ;;  %v597_v50 = vpop.permute.xlu0 %596 }
 0x39b   :  { %v601_v51 = vmul.f32 %v4110_v11, %v597_v50  ;;  %v595_v52 = vpop.permute.xlu1 %594 }
 0x39c   :  { %v600_v54 = vmul.f32 %v4112_v14, %v595_v52 }
 0x39d   :  { %v739_v53 = vrot.slane %v601_v51, 7 }
 0x39f   :  { %v741_v55 = vsel %vm740_vm4, %v739_v53, %v600_v54  ;;  %v839_v54 = vrot.slane %v5199_v33, 7 }
 0x3a0   :  { %742 = vrot.lane.b32.xlu1 %v741_v55, %s4744_s0 }
 0x40c   :  { %v881_v56 = vpop.permute.xlu0 %880 }
 0x40d   :  { %3730 = vmatmul.mubr.msk.f32.vlgmr.msra.gmra.mrb[2].mxu1 %vm466_vm3, %v881_v56  ;;  %v838_v56 = vrot.slane %v5202_v38, 7 }
 0x40e   :  { %3969 = vmatpush3.bf16.msra.mxu1 %v5105_v8  ;;  %3751 = vmatprep.mubr.msk.f32.mxu1 %vm4741_vm0, %v4742_v1 }
 0x40f   :  { %3970 = vmatprep.subr.bf16.mxu1 %v4740_v0 }
 0x412   :  { %3972 = vmatpush3.bf16.msra.mxu1 %v5118_v15  ;;  %v743_v57 = vpop.permute.xlu1 %742 }
 0x413   :  { %3979 = vmatprep.subr.bf16.mxu1 %v4740_v0  ;;  %3719 = vmatmul.mubr.msk.f32.vlgmr.msra.gmra.mrb[6].mxu0 %vm466_vm3, %v743_v57 }
 0x414   :  { %3963 = vmatpush3.bf16.msra.mxu0 %v5135_v21  ;;  %3740 = vmatprep.mubr.msk.f32.mxu0 %vm4741_vm0, %v4742_v1 }
 0x415   :  { %3964 = vmatprep.subr.bf16.mxu0 %v4740_v0 }
 0x418   :  { %3966 = vmatpush3.bf16.msra.mxu0 %v5149_v24 }
 0x419   :  { %3973 = vmatprep.subr.bf16.mxu0 %v4740_v0 }
 0x4e0   :  { %v950_v58 = vpop.f32.mrb[2].mxu1 }
 0x4e1   :  { %v955_v59 = vrot.slane %v950_v58, 7  ;;  %v959_v60 = vadd.f32 %v950_v58, %v5169_v31  ;;  %v3731_v61 = vpop.f32.mrb[3].mxu1 }
 0x4e3   :  { %v958_v62 = vadd.f32 %v955_v59, %v5171_v35  ;;  %4121 = vtanh.f32 %v959_v60  ;;  %v3504_v11 = vmul.f32 -1.442695, %v959_v60 }
 0x4e5   :  { %4123 = vtanh.f32 %v958_v62  ;;  %v3503_v12 = vmul.f32 -1.442695, %v958_v62 }
 0x4e6   :  { %v812_v63 = vpop.f32.mrb[6].mxu0 }
 0x4e7   :  { %v817_v2 = vrot.slane %v812_v63, 7  ;;  %v821_v3 = vadd.f32 %v812_v63, %v5175_v40  ;;  %v3720_v4 = vpop.f32.mrb[7].mxu0 }
 0x4e9   :  { %v820_v5 = vadd.f32 %v817_v2, %v5178_v44  ;;  %4125 = vtanh.f32 %v821_v3  ;;  %v3501_v13 = vmul.f32 -1.442695, %v821_v3 }
 0x4eb   :  { %4127 = vtanh.f32 %v820_v5  ;;  %v3500_v14 = vmul.f32 -1.442695, %v820_v5 }
 0x4ec   :  { %4129 = vpow2.f32 %v3504_v11 }
 0x4ed   :  { %v4122_v6 = vpop.eup %4121  ;;  %4131 = vpow2.f32 %v3503_v12 }
 0x4ee   :  { %986 = vrot.lane.b32.xlu1 %v4122_v6, %s4743_s8  ;;  %4133 = vpow2.f32 %v3501_v13 }
 0x4ef   :  { %v4124_v7 = vpop.eup %4123  ;;  %4135 = vpow2.f32 %v3500_v14 }
 0x4f0   :  { %984 = vrot.lane.b32.xlu0 %v4124_v7, %s4743_s8 }
 0x4f3   :  { %v4126_v9 = vpop.eup %4125 }
 0x4f4   :  { %848 = vrot.lane.b32.xlu1 %v4126_v9, %s4743_s8 }
 0x4f5   :  { %v4128_v10 = vpop.eup %4127 }
 0x4f6   :  { %846 = vrot.lane.b32.xlu0 %v4128_v10, %s4743_s8  ;;  %v4130_v16 = vpop.eup %4129 }
 0x4f7   :  { %v4132_v17 = vpop.eup %4131  ;;  %v967_v18 = vadd.f32 1.0, %v4130_v16 }
 0x4f8   :  { %v966_v19 = vadd.f32 1.0, %v4132_v17  ;;  %v4134_v20 = vpop.eup %4133 }
 0x4f9   :  { %4137 = vrcp.f32 %v967_v18  ;;  %v4136_v22 = vpop.eup %4135  ;;  %v829_v25 = vadd.f32 1.0, %v4134_v20 }
 0x4fa   :  { %4139 = vrcp.f32 %v966_v19  ;;  %v828_v26 = vadd.f32 1.0, %v4136_v22 }
 0x4fb   :  { %4141 = vrcp.f32 %v829_v25 }
 0x4fc   :  { %4143 = vrcp.f32 %v828_v26 }
 0x503   :  { %v4138_v27 = vpop.eup %4137 }
 0x504   :  { %v4140_v32 = vpop.eup %4139  ;;  %v981_v47 = vmul.f32 %v4138_v27, %v977_v46 }
 0x505   :  { %v4142_v37 = vpop.eup %4141  ;;  %v980_v51 = vmul.f32 %v4140_v32, %v976_v48 }
 0x506   :  { %v4144_v42 = vpop.eup %4143  ;;  %v843_v55 = vmul.f32 %v4142_v37, %v839_v54 }
 0x507   :  { %v842_v28 = vmul.f32 %v4144_v42, %v838_v56 }
 0x560   :  { %v987_v29 = vpop.permute.xlu1 %986 }
 0x561   :  { %v991_v30 = vmul.f32 %v4138_v27, %v987_v29 }
 0x562   :  { %v985_v34 = vpop.permute.xlu0 %984 }
 0x563   :  { %996 = vrot.lane.b32.xlu1 %v991_v30, %s4743_s8  ;;  %v990_v36 = vmul.f32 %v4140_v32, %v985_v34 }
 0x565   :  { %994 = vrot.lane.b32.xlu0 %v990_v36, %s4743_s8 }
 0x566   :  { %v849_v39 = vpop.permute.xlu1 %848 }
 0x567   :  { %v853_v41 = vmul.f32 %v4142_v37, %v849_v39 }
 0x568   :  { %v847_v43 = vpop.permute.xlu0 %846 }
 0x569   :  { %858 = vrot.lane.b32.xlu1 %v853_v41, %s4743_s8  ;;  %v852_v45 = vmul.f32 %v4144_v42, %v847_v43 }
 0x56b   :  { %856 = vrot.lane.b32.xlu0 %v852_v45, %s4743_s8 }
 0x5d5   :  { %v997_v49 = vpop.permute.xlu1 %996 }
 0x5d6   :  { %v5241_v50 = vadd.f32 %v997_v49, %v981_v47 }
 0x5d7   :  { %v995_v52 = vpop.permute.xlu0 %994 }
 0x5d8   :  { %4145 = vtanh.f32 %v5241_v50  ;;  %v5244_v53 = vadd.f32 %v995_v52, %v980_v51 }
 0x5da   :  { %4147 = vtanh.f32 %v5244_v53 }
 0x5db   :  { %v859_v23 = vpop.permute.xlu1 %858 }
 0x5dc   :  { %v5249_v57 = vadd.f32 %v859_v23, %v843_v55 }
 0x5dd   :  { %v857_v58 = vpop.permute.xlu0 %856 }
 0x5de   :  { %4149 = vtanh.f32 %v5249_v57  ;;  %v5252_v60 = vadd.f32 %v857_v58, %v842_v28 }
 0x5e0   :  { %4151 = vtanh.f32 %v5252_v60 }
 0x5e2   :  { %v4146_v59 = vpop.eup %4145 }
 0x5e3   :  { %1008 = vrot.lane.b32.xlu1 %v4146_v59, %s4743_s8 }
 0x5e4   :  { %v4148_v33 = vpop.eup %4147 }
 0x5e5   :  { %1006 = vrot.lane.b32.xlu0 %v4148_v33, %s4743_s8 }
 0x5e8   :  { %v4150_v61 = vpop.eup %4149 }
 0x5e9   :  { %870 = vrot.lane.b32.xlu1 %v4150_v61, %s4743_s8 }
 0x5ea   :  { %v4152_v38 = vpop.eup %4151 }
 0x5eb   :  { %868 = vrot.lane.b32.xlu0 %v4152_v38, %s4743_s8 }
 0x655   :  { %v1009_v62 = vpop.permute.xlu1 %1008 }
 0x656   :  { %v1013_v3 = vmul.f32 %v4138_v27, %v1009_v62 }
 0x657   :  { %v1007_v63 = vpop.permute.xlu0 %1006 }
 0x658   :  { %v1012_v2 = vmul.f32 %v4140_v32, %v1007_v63 }
 0x65a   :  { %v1155_v4 = vrot.slane %v1012_v2, 1 }
 0x65b   :  { %v871_v6 = vpop.permute.xlu1 %870 }
 0x65c   :  { %v1156_v5 = vsel %vm740_vm4, %v1013_v3, %v1155_v4  ;;  %v875_v10 = vmul.f32 %v4142_v37, %v871_v6  ;;  %v1254_v4 = vrot.slane %v5244_v53, 7 }
 0x65d   :  { %1157 = vrot.lane.b32.xlu0 %v1156_v5, %s4744_s0  ;;  %v869_v7 = vpop.permute.xlu0 %868  ;;  %v1255_v5 = vrot.slane %v5241_v50, 7 }
 0x65e   :  { %v874_v9 = vmul.f32 %v4144_v42, %v869_v7 }
 0x660   :  { %v1016_v11 = vrot.slane %v874_v9, 1 }
 0x662   :  { %v1017_v12 = vsel %vm740_vm4, %v875_v10, %v1016_v11 }
 0x663   :  { %1018 = vrot.lane.b32.xlu1 %v1017_v12, %s4744_s0 }
 0x6cf   :  { %v1158_v13 = vpop.permute.xlu0 %1157 }
 0x6d0   :  { %3752 = vmatmul.mubr.msk.f32.vlgmr.msra.gmra.mrb[4].mxu1 %vm466_vm3, %v1158_v13  ;;  %v1115_v13 = vrot.slane %v5252_v60, 7 }
 0x6d1   :  { %3981 = vmatpush3.bf16.msra.mxu1 %v5105_v8  ;;  %3773 = vmatprep.mubr.msk.f32.mxu1 %vm4741_vm0, %v4742_v1 }
 0x6d2   :  { %3982 = vmatprep.subr.bf16.mxu1 %v4740_v0 }
 0x6d5   :  { %3984 = vmatpush3.bf16.msra.mxu1 %v5118_v15  ;;  %v1019_v14 = vpop.permute.xlu1 %1018 }
 0x6d6   :  { %3991 = vmatprep.subr.bf16.mxu1 %v4740_v0  ;;  %3741 = vmatmul.mubr.msk.f32.vlgmr.msra.gmra.mrb[8].mxu0 %vm466_vm3, %v1019_v14  ;;  %v1116_v14 = vrot.slane %v5249_v57, 7 }
 0x6d7   :  { %3975 = vmatpush3.bf16.msra.mxu0 %v5135_v21  ;;  %3762 = vmatprep.mubr.msk.f32.mxu0 %vm4741_vm0, %v4742_v1 }
 0x6d8   :  { %3976 = vmatprep.subr.bf16.mxu0 %v4740_v0 }
 0x6db   :  { %3978 = vmatpush3.bf16.msra.mxu0 %v5149_v24 }
 0x6dc   :  { %3985 = vmatprep.subr.bf16.mxu0 %v4740_v0 }
 0x7a3   :  { %v1227_v16 = vpop.f32.mrb[4].mxu1 }
 0x7a4   :  { %v1232_v17 = vrot.slane %v1227_v16, 6  ;;  %v1233_v18 = vrot.slane %v1227_v16, 7  ;;  %v3753_v19 = vpop.f32.mrb[5].mxu1 }
 0x7a6   :  { %v1236_v20 = vadd.f32 %v1232_v17, %v5171_v35  ;;  %v1237_v22 = vadd.f32 %v1233_v18, %v5169_v31 }
 0x7a8   :  { %4153 = vtanh.f32 %v1236_v20  ;;  %v3509_v41 = vmul.f32 -1.442695, %v1236_v20  ;;  %v3510_v42 = vmul.f32 -1.442695, %v1237_v22 }
 0x7a9   :  { %4155 = vtanh.f32 %v1237_v22  ;;  %v1088_v25 = vpop.f32.mrb[8].mxu0 }
 0x7aa   :  { %v1093_v26 = vrot.slane %v1088_v25, 6  ;;  %v1094_v27 = vrot.slane %v1088_v25, 7  ;;  %v3742_v29 = vpop.f32.mrb[9].mxu0 }
 0x7ac   :  { %v1097_v30 = vadd.f32 %v1093_v26, %v5178_v44  ;;  %v1098_v32 = vadd.f32 %v1094_v27, %v5175_v40 }
 0x7ae   :  { %4157 = vtanh.f32 %v1097_v30  ;;  %v3506_v43 = vmul.f32 -1.442695, %v1097_v30  ;;  %v3507_v45 = vmul.f32 -1.442695, %v1098_v32 }
 0x7af   :  { %4159 = vtanh.f32 %v1098_v32 }
 0x7b0   :  { %4161 = vpow2.f32 %v3509_v41 }
 0x7b1   :  { %4163 = vpow2.f32 %v3510_v42 }
 0x7b2   :  { %v4154_v34 = vpop.eup %4153  ;;  %4165 = vpow2.f32 %v3506_v43 }
 0x7b3   :  { %v4156_v36 = vpop.eup %4155  ;;  %1262 = vrot.lane.b32.xlu0 %v4154_v34, %s4743_s8  ;;  %4167 = vpow2.f32 %v3507_v45 }
 0x7b4   :  { %1264 = vrot.lane.b32.xlu1 %v4156_v36, %s4743_s8 }
 0x7b8   :  { %v4158_v37 = vpop.eup %4157 }
 0x7b9   :  { %v4160_v39 = vpop.eup %4159  ;;  %1123 = vrot.lane.b32.xlu0 %v4158_v37, %s4743_s8 }
 0x7ba   :  { %1125 = vrot.lane.b32.xlu1 %v4160_v39, %s4743_s8  ;;  %v4162_v46 = vpop.eup %4161 }
 0x7bb   :  { %v4164_v47 = vpop.eup %4163  ;;  %v1244_v48 = vadd.f32 1.0, %v4162_v46 }
 0x7bc   :  { %v1245_v49 = vadd.f32 1.0, %v4164_v47  ;;  %v4166_v51 = vpop.eup %4165 }
 0x7bd   :  { %4169 = vrcp.f32 %v1244_v48  ;;  %v4168_v52 = vpop.eup %4167  ;;  %v1105_v54 = vadd.f32 1.0, %v4166_v51 }
 0x7be   :  { %4171 = vrcp.f32 %v1245_v49  ;;  %v1106_v55 = vadd.f32 1.0, %v4168_v52 }
 0x7bf   :  { %4173 = vrcp.f32 %v1105_v54 }
 0x7c0   :  { %4175 = vrcp.f32 %v1106_v55 }
 0x7c7   :  { %v4170_v56 = vpop.eup %4169 }
 0x7c8   :  { %v4172_v28 = vpop.eup %4171  ;;  %v1258_v6 = vmul.f32 %v4170_v56, %v1254_v4 }
 0x7c9   :  { %v4174_v61 = vpop.eup %4173  ;;  %v1259_v7 = vmul.f32 %v4172_v28, %v1255_v5 }
 0x7ca   :  { %v4176_v62 = vpop.eup %4175  ;;  %v1119_v16 = vmul.f32 %v4174_v61, %v1115_v13 }
 0x7cb   :  { %v1120_v53 = vmul.f32 %v4176_v62, %v1116_v14 }
 0x825   :  { %v1263_v23 = vpop.permute.xlu0 %1262 }
 0x826   :  { %v1265_v58 = vpop.permute.xlu1 %1264  ;;  %v1268_v59 = vmul.f32 %v4170_v56, %v1263_v23 }
 0x827   :  { %v1269_v33 = vmul.f32 %v4172_v28, %v1265_v58 }
 0x828   :  { %1272 = vrot.lane.b32.xlu0 %v1268_v59, %s4743_s8 }
 0x829   :  { %1274 = vrot.lane.b32.xlu1 %v1269_v33, %s4743_s8 }
 0x82b   :  { %v1124_v38 = vpop.permute.xlu0 %1123 }
 0x82c   :  { %v1126_v63 = vpop.permute.xlu1 %1125  ;;  %v1129_v2 = vmul.f32 %v4174_v61, %v1124_v38 }
 0x82d   :  { %v1130_v3 = vmul.f32 %v4176_v62, %v1126_v63 }
 0x82e   :  { %1133 = vrot.lane.b32.xlu0 %v1129_v2, %s4743_s8 }
 0x82f   :  { %1135 = vrot.lane.b32.xlu1 %v1130_v3, %s4743_s8 }
 0x89a   :  { %v1273_v9 = vpop.permute.xlu0 %1272 }
 0x89b   :  { %v1275_v10 = vpop.permute.xlu1 %1274  ;;  %v5291_v11 = vadd.f32 %v1273_v9, %v1258_v6 }
 0x89c   :  { %v5293_v12 = vadd.f32 %v1275_v10, %v1259_v7 }
 0x89d   :  { %4177 = vtanh.f32 %v5291_v11 }
 0x89e   :  { %4179 = vtanh.f32 %v5293_v12 }
 0x8a0   :  { %v1134_v17 = vpop.permute.xlu0 %1133 }
 0x8a1   :  { %v1136_v50 = vpop.permute.xlu1 %1135  ;;  %v5299_v18 = vadd.f32 %v1134_v17, %v1119_v16 }
 0x8a2   :  { %v5301_v19 = vadd.f32 %v1136_v50, %v1120_v53 }
 0x8a3   :  { %4181 = vtanh.f32 %v5299_v18 }
 0x8a4   :  { %4183 = vtanh.f32 %v5301_v19 }
 0x8a7   :  { %v4178_v20 = vpop.eup %4177 }
 0x8a8   :  { %v4180_v22 = vpop.eup %4179  ;;  %1284 = vrot.lane.b32.xlu0 %v4178_v20, %s4743_s8 }
 0x8a9   :  { %1286 = vrot.lane.b32.xlu1 %v4180_v22, %s4743_s8 }
 0x8ad   :  { %v4182_v60 = vpop.eup %4181 }
 0x8ae   :  { %v4184_v57 = vpop.eup %4183  ;;  %1145 = vrot.lane.b32.xlu0 %v4182_v60, %s4743_s8 }
 0x8af   :  { %1147 = vrot.lane.b32.xlu1 %v4184_v57, %s4743_s8 }
 0x91a   :  { %v1285_v25 = vpop.permute.xlu0 %1284 }
 0x91b   :  { %v1287_v26 = vpop.permute.xlu1 %1286  ;;  %v1290_v27 = vmul.f32 %v4170_v56, %v1285_v25 }
 0x91c   :  { %v1291_v29 = vmul.f32 %v4172_v28, %v1287_v26 }
 0x91d   :  { %v1434_v30 = vrot.slane %v1290_v27, 2 }
 0x91e   :  { %v1435_v32 = vrot.slane %v1291_v29, 1 }
 0x920   :  { %v1436_v34 = vsel %vm740_vm4, %v1435_v32, %v1434_v30  ;;  %v1146_v36 = vpop.permute.xlu0 %1145 }
 0x921   :  { %1437 = vrot.lane.b32.xlu0 %v1436_v34, %s4744_s0  ;;  %v1148_v37 = vpop.permute.xlu1 %1147  ;;  %v1151_v39 = vmul.f32 %v4174_v61, %v1146_v36  ;;  %v1534_v34 = vrot.slane %v5291_v11, 7  ;;  %v1535_v36 = vrot.slane %v5293_v12, 7 }
 0x922   :  { %v1152_v41 = vmul.f32 %v4176_v62, %v1148_v37 }
 0x923   :  { %v1294_v42 = vrot.slane %v1151_v39, 2 }
 0x924   :  { %v1295_v43 = vrot.slane %v1152_v41, 1 }
 0x926   :  { %v1296_v45 = vsel %vm740_vm4, %v1295_v43, %v1294_v42 }
 0x927   :  { %1297 = vrot.lane.b32.xlu1 %v1296_v45, %s4744_s0 }
 0x993   :  { %v1438_v46 = vpop.permute.xlu0 %1437 }
 0x994   :  { %3774 = vmatmul.mubr.msk.f32.vlgmr.msra.gmra.mrb[6].mxu1 %vm466_vm3, %v1438_v46  ;;  %v1394_v46 = vrot.slane %v5299_v18, 7 }
 0x995   :  { %3993 = vmatpush3.bf16.msra.mxu1 %v5105_v8  ;;  %3795 = vmatprep.mubr.msk.f32.mxu1 %vm4741_vm0, %v4742_v1 }
 0x996   :  { %3994 = vmatprep.subr.bf16.mxu1 %v4740_v0 }
 0x999   :  { %3996 = vmatpush3.bf16.msra.mxu1 %v5118_v15  ;;  %v1298_v47 = vpop.permute.xlu1 %1297 }
 0x99a   :  { %4003 = vmatprep.subr.bf16.mxu1 %v4740_v0  ;;  %3763 = vmatmul.mubr.msk.f32.vlgmr.msra.gmra.mrb[10].mxu0 %vm466_vm3, %v1298_v47  ;;  %v1395_v47 = vrot.slane %v5301_v19, 7 }
 0x99b   :  { %3987 = vmatpush3.bf16.msra.mxu0 %v5135_v21  ;;  %3784 = vmatprep.mubr.msk.f32.mxu0 %vm4741_vm0, %v4742_v1 }
 0x99c   :  { %3988 = vmatprep.subr.bf16.mxu0 %v4740_v0 }
 0x99f   :  { %3990 = vmatpush3.bf16.msra.mxu0 %v5149_v24 }
 0x9a0   :  { %3997 = vmatprep.subr.bf16.mxu0 %v4740_v0 }
 0xa67   :  { %v1507_v48 = vpop.f32.mrb[6].mxu1 }
 0xa68   :  { %v1512_v49 = vrot.slane %v1507_v48, 5  ;;  %v1513_v51 = vrot.slane %v1507_v48, 6  ;;  %v3775_v52 = vpop.f32.mrb[7].mxu1 }
 0xa6a   :  { %v1516_v54 = vadd.f32 %v1512_v49, %v5171_v35  ;;  %v1517_v55 = vadd.f32 %v1513_v51, %v5169_v31 }
 0xa6c   :  { %4185 = vtanh.f32 %v1516_v54  ;;  %v3515_v2 = vmul.f32 -1.442695, %v1516_v54  ;;  %v3516_v3 = vmul.f32 -1.442695, %v1517_v55 }
 0xa6d   :  { %4187 = vtanh.f32 %v1517_v55  ;;  %v1367_v56 = vpop.f32.mrb[10].mxu0 }
 0xa6e   :  { %v1372_v23 = vrot.slane %v1367_v56, 5  ;;  %v1373_v28 = vrot.slane %v1367_v56, 6  ;;  %v3764_v58 = vpop.f32.mrb[11].mxu0 }
 0xa70   :  { %v1376_v59 = vadd.f32 %v1372_v23, %v5178_v44  ;;  %v1377_v33 = vadd.f32 %v1373_v28, %v5175_v40 }
 0xa72   :  { %4189 = vtanh.f32 %v1376_v59  ;;  %v3512_v4 = vmul.f32 -1.442695, %v1376_v59  ;;  %v3513_v5 = vmul.f32 -1.442695, %v1377_v33 }
 0xa73   :  { %4191 = vtanh.f32 %v1377_v33 }
 0xa74   :  { %4193 = vpow2.f32 %v3515_v2 }
 0xa75   :  { %4195 = vpow2.f32 %v3516_v3 }
 0xa76   :  { %v4186_v61 = vpop.eup %4185  ;;  %4197 = vpow2.f32 %v3512_v4 }
 0xa77   :  { %v4188_v38 = vpop.eup %4187  ;;  %1542 = vrot.lane.b32.xlu0 %v4186_v61, %s4743_s8  ;;  %4199 = vpow2.f32 %v3513_v5 }
 0xa78   :  { %1544 = vrot.lane.b32.xlu1 %v4188_v38, %s4743_s8 }
 0xa7c   :  { %v4190_v62 = vpop.eup %4189 }
 0xa7d   :  { %v4192_v63 = vpop.eup %4191  ;;  %1402 = vrot.lane.b32.xlu0 %v4190_v62, %s4743_s8 }
 0xa7e   :  { %1404 = vrot.lane.b32.xlu1 %v4192_v63, %s4743_s8  ;;  %v4194_v6 = vpop.eup %4193 }
 0xa7f   :  { %v4196_v7 = vpop.eup %4195  ;;  %v1524_v9 = vadd.f32 1.0, %v4194_v6 }
 0xa80   :  { %v1525_v10 = vadd.f32 1.0, %v4196_v7  ;;  %v4198_v13 = vpop.eup %4197 }
 0xa81   :  { %4201 = vrcp.f32 %v1524_v9  ;;  %v4200_v14 = vpop.eup %4199  ;;  %v1384_v16 = vadd.f32 1.0, %v4198_v13 }
 0xa82   :  { %4203 = vrcp.f32 %v1525_v10  ;;  %v1385_v53 = vadd.f32 1.0, %v4200_v14 }
 0xa83   :  { %4205 = vrcp.f32 %v1384_v16 }
 0xa84   :  { %4207 = vrcp.f32 %v1385_v53 }
 0xa8b   :  { %v4202_v17 = vpop.eup %4201 }
 0xa8c   :  { %v4204_v20 = vpop.eup %4203  ;;  %v1538_v37 = vmul.f32 %v4202_v17, %v1534_v34 }
 0xa8d   :  { %v4206_v25 = vpop.eup %4205  ;;  %v1539_v39 = vmul.f32 %v4204_v20, %v1535_v36 }
 0xa8e   :  { %v4208_v27 = vpop.eup %4207  ;;  %v1398_v48 = vmul.f32 %v4206_v25, %v1394_v46 }
 0xa8f   :  { %v1399_v11 = vmul.f32 %v4208_v27, %v1395_v47 }
 0xae9   :  { %v1543_v50 = vpop.permute.xlu0 %1542 }
 0xaea   :  { %v1545_v22 = vpop.permute.xlu1 %1544  ;;  %v1548_v60 = vmul.f32 %v4202_v17, %v1543_v50 }
 0xaeb   :  { %v1549_v57 = vmul.f32 %v4204_v20, %v1545_v22 }
 0xaec   :  { %1552 = vrot.lane.b32.xlu0 %v1548_v60, %s4743_s8 }
 0xaed   :  { %1554 = vrot.lane.b32.xlu1 %v1549_v57, %s4743_s8 }
 0xaef   :  { %v1403_v26 = vpop.permute.xlu0 %1402 }
 0xaf0   :  { %v1405_v29 = vpop.permute.xlu1 %1404  ;;  %v1408_v30 = vmul.f32 %v4206_v25, %v1403_v26 }
 0xaf1   :  { %v1409_v32 = vmul.f32 %v4208_v27, %v1405_v29 }
 0xaf2   :  { %1412 = vrot.lane.b32.xlu0 %v1408_v30, %s4743_s8 }
 0xaf3   :  { %1414 = vrot.lane.b32.xlu1 %v1409_v32, %s4743_s8 }
 0xb5e   :  { %v1553_v41 = vpop.permute.xlu0 %1552 }
 0xb5f   :  { %v1555_v42 = vpop.permute.xlu1 %1554  ;;  %v5341_v43 = vadd.f32 %v1553_v41, %v1538_v37 }
 0xb60   :  { %v5343_v45 = vadd.f32 %v1555_v42, %v1539_v39 }
 0xb61   :  { %4209 = vtanh.f32 %v5341_v43 }
 0xb62   :  { %4211 = vtanh.f32 %v5343_v45 }
 0xb64   :  { %v1413_v49 = vpop.permute.xlu0 %1412 }
 0xb65   :  { %v1415_v12 = vpop.permute.xlu1 %1414  ;;  %v5349_v51 = vadd.f32 %v1413_v49, %v1398_v48 }
 0xb66   :  { %v5351_v52 = vadd.f32 %v1415_v12, %v1399_v11 }
 0xb67   :  { %4213 = vtanh.f32 %v5349_v51 }
 0xb68   :  { %4215 = vtanh.f32 %v5351_v52 }
 0xb6b   :  { %v4210_v54 = vpop.eup %4209 }
 0xb6c   :  { %v4212_v55 = vpop.eup %4211  ;;  %1564 = vrot.lane.b32.xlu0 %v4210_v54, %s4743_s8 }
 0xb6d   :  { %1566 = vrot.lane.b32.xlu1 %v4212_v55, %s4743_s8 }
 0xb71   :  { %v4214_v18 = vpop.eup %4213 }
 0xb72   :  { %v4216_v19 = vpop.eup %4215  ;;  %1424 = vrot.lane.b32.xlu0 %v4214_v18, %s4743_s8 }
 0xb73   :  { %1426 = vrot.lane.b32.xlu1 %v4216_v19, %s4743_s8 }
 0xbde   :  { %v1565_v56 = vpop.permute.xlu0 %1564 }
 0xbdf   :  { %v1567_v23 = vpop.permute.xlu1 %1566  ;;  %v1570_v28 = vmul.f32 %v4202_v17, %v1565_v56 }
 0xbe0   :  { %v1571_v58 = vmul.f32 %v4204_v20, %v1567_v23 }
 0xbe1   :  { %v1714_v59 = vrot.slane %v1570_v28, 3 }
 0xbe2   :  { %v1715_v33 = vrot.slane %v1571_v58, 2 }
 0xbe4   :  { %v1716_v61 = vsel %vm740_vm4, %v1715_v33, %v1714_v59  ;;  %v1425_v38 = vpop.permute.xlu0 %1424 }
 0xbe5   :  { %1717 = vrot.lane.b32.xlu0 %v1716_v61, %s4744_s0  ;;  %v1427_v62 = vpop.permute.xlu1 %1426  ;;  %v1430_v63 = vmul.f32 %v4206_v25, %v1425_v38  ;;  %v1814_v61 = vrot.slane %v5341_v43, 7  ;;  %v1815_v38 = vrot.slane %v5343_v45, 7 }
 0xbe6   :  { %v1431_v2 = vmul.f32 %v4208_v27, %v1427_v62 }
 0xbe7   :  { %v1574_v3 = vrot.slane %v1430_v63, 3 }
 0xbe8   :  { %v1575_v4 = vrot.slane %v1431_v2, 2 }
 0xbea   :  { %v1576_v5 = vsel %vm740_vm4, %v1575_v4, %v1574_v3 }
 0xbeb   :  { %1577 = vrot.lane.b32.xlu1 %v1576_v5, %s4744_s0 }
 0xc57   :  { %v1718_v6 = vpop.permute.xlu0 %1717 }
 0xc58   :  { %3796 = vmatmul.mubr.msk.f32.vlgmr.msra.gmra.mrb[8].mxu1 %vm466_vm3, %v1718_v6  ;;  %v1674_v6 = vrot.slane %v5349_v51, 7 }
 0xc59   :  { %4005 = vmatpush3.bf16.msra.mxu1 %v5105_v8  ;;  %3817 = vmatprep.mubr.msk.f32.mxu1 %vm4741_vm0, %v4742_v1 }
 0xc5a   :  { %4006 = vmatprep.subr.bf16.mxu1 %v4740_v0 }
 0xc5d   :  { %4008 = vmatpush3.bf16.msra.mxu1 %v5118_v15  ;;  %v1578_v7 = vpop.permute.xlu1 %1577 }
 0xc5e   :  { %4015 = vmatprep.subr.bf16.mxu1 %v4740_v0  ;;  %3785 = vmatmul.mubr.msk.f32.vlgmr.msra.gmra.mrb[12].mxu0 %vm466_vm3, %v1578_v7  ;;  %v1675_v7 = vrot.slane %v5351_v52, 7 }
 0xc5f   :  { %3999 = vmatpush3.bf16.msra.mxu0 %v5135_v21  ;;  %3806 = vmatprep.mubr.msk.f32.mxu0 %vm4741_vm0, %v4742_v1 }
 0xc60   :  { %4000 = vmatprep.subr.bf16.mxu0 %v4740_v0 }
 0xc63   :  { %4002 = vmatpush3.bf16.msra.mxu0 %v5149_v24 }
 0xc64   :  { %4009 = vmatprep.subr.bf16.mxu0 %v4740_v0 }
 0xd2b   :  { %v1787_v9 = vpop.f32.mrb[8].mxu1 }
 0xd2c   :  { %v1792_v10 = vrot.slane %v1787_v9, 4  ;;  %v1793_v13 = vrot.slane %v1787_v9, 5  ;;  %v3797_v14 = vpop.f32.mrb[9].mxu1 }
 0xd2e   :  { %v1796_v16 = vadd.f32 %v1792_v10, %v5171_v35  ;;  %v1797_v53 = vadd.f32 %v1793_v13, %v5169_v31 }
 0xd30   :  { %4217 = vtanh.f32 %v1796_v16  ;;  %v3521_v30 = vmul.f32 -1.442695, %v1796_v16  ;;  %v3522_v32 = vmul.f32 -1.442695, %v1797_v53 }
 0xd31   :  { %4219 = vtanh.f32 %v1797_v53  ;;  %v1647_v17 = vpop.f32.mrb[12].mxu0 }
 0xd32   :  { %v1652_v50 = vrot.slane %v1647_v17, 4  ;;  %v1653_v20 = vrot.slane %v1647_v17, 5  ;;  %v3786_v22 = vpop.f32.mrb[13].mxu0 }
 0xd34   :  { %v1656_v60 = vadd.f32 %v1652_v50, %v5178_v44  ;;  %v1657_v57 = vadd.f32 %v1653_v20, %v5175_v40 }
 0xd36   :  { %4221 = vtanh.f32 %v1656_v60  ;;  %v3518_v34 = vmul.f32 -1.442695, %v1656_v60  ;;  %v3519_v36 = vmul.f32 -1.442695, %v1657_v57 }
 0xd37   :  { %4223 = vtanh.f32 %v1657_v57 }
 0xd38   :  { %4225 = vpow2.f32 %v3521_v30 }
 0xd39   :  { %4227 = vpow2.f32 %v3522_v32 }
 0xd3a   :  { %v4218_v25 = vpop.eup %4217  ;;  %4229 = vpow2.f32 %v3518_v34 }
 0xd3b   :  { %v4220_v26 = vpop.eup %4219  ;;  %1822 = vrot.lane.b32.xlu0 %v4218_v25, %s4743_s8  ;;  %4231 = vpow2.f32 %v3519_v36 }
 0xd3c   :  { %1824 = vrot.lane.b32.xlu1 %v4220_v26, %s4743_s8 }
 0xd40   :  { %v4222_v27 = vpop.eup %4221 }
 0xd41   :  { %v4224_v29 = vpop.eup %4223  ;;  %1682 = vrot.lane.b32.xlu0 %v4222_v27, %s4743_s8 }
 0xd42   :  { %1684 = vrot.lane.b32.xlu1 %v4224_v29, %s4743_s8  ;;  %v4226_v37 = vpop.eup %4225 }
 0xd43   :  { %v4228_v39 = vpop.eup %4227  ;;  %v1804_v41 = vadd.f32 1.0, %v4226_v37 }
 0xd44   :  { %v1805_v42 = vadd.f32 1.0, %v4228_v39  ;;  %v4230_v46 = vpop.eup %4229 }
 0xd45   :  { %4233 = vrcp.f32 %v1804_v41  ;;  %v4232_v47 = vpop.eup %4231  ;;  %v1664_v48 = vadd.f32 1.0, %v4230_v46 }
 0xd46   :  { %4235 = vrcp.f32 %v1805_v42  ;;  %v1665_v11 = vadd.f32 1.0, %v4232_v47 }
 0xd47   :  { %4237 = vrcp.f32 %v1664_v48 }
 0xd48   :  { %4239 = vrcp.f32 %v1665_v11 }
 0xd4f   :  { %v4234_v49 = vpop.eup %4233 }
 0xd50   :  { %v4236_v54 = vpop.eup %4235  ;;  %v1818_v62 = vmul.f32 %v4234_v49, %v1814_v61 }
 0xd51   :  { %v4238_v56 = vpop.eup %4237  ;;  %v1819_v63 = vmul.f32 %v4236_v54, %v1815_v38 }
 0xd52   :  { %v4240_v28 = vpop.eup %4239  ;;  %v1678_v9 = vmul.f32 %v4238_v56, %v1674_v6 }
 0xd53   :  { %v1679_v43 = vmul.f32 %v4240_v28, %v1675_v7 }
 0xdad   :  { %v1823_v12 = vpop.permute.xlu0 %1822 }
 0xdae   :  { %v1825_v55 = vpop.permute.xlu1 %1824  ;;  %v1828_v18 = vmul.f32 %v4234_v49, %v1823_v12 }
 0xdaf   :  { %v1829_v19 = vmul.f32 %v4236_v54, %v1825_v55 }
 0xdb0   :  { %1832 = vrot.lane.b32.xlu0 %v1828_v18, %s4743_s8 }
 0xdb1   :  { %1834 = vrot.lane.b32.xlu1 %v1829_v19, %s4743_s8 }
 0xdb3   :  { %v1683_v23 = vpop.permute.xlu0 %1682 }
 0xdb4   :  { %v1685_v58 = vpop.permute.xlu1 %1684  ;;  %v1688_v59 = vmul.f32 %v4238_v56, %v1683_v23 }
 0xdb5   :  { %v1689_v33 = vmul.f32 %v4240_v28, %v1685_v58 }
 0xdb6   :  { %1692 = vrot.lane.b32.xlu0 %v1688_v59, %s4743_s8 }
 0xdb7   :  { %1694 = vrot.lane.b32.xlu1 %v1689_v33, %s4743_s8 }
 0xe22   :  { %v1833_v2 = vpop.permute.xlu0 %1832 }
 0xe23   :  { %v1835_v3 = vpop.permute.xlu1 %1834  ;;  %v5391_v4 = vadd.f32 %v1833_v2, %v1818_v62 }
 0xe24   :  { %v5393_v5 = vadd.f32 %v1835_v3, %v1819_v63 }
 0xe25   :  { %4241 = vtanh.f32 %v5391_v4 }
 0xe26   :  { %4243 = vtanh.f32 %v5393_v5 }
 0xe28   :  { %v1693_v10 = vpop.permute.xlu0 %1692 }
 0xe29   :  { %v1695_v45 = vpop.permute.xlu1 %1694  ;;  %v5399_v13 = vadd.f32 %v1693_v10, %v1678_v9 }
 0xe2a   :  { %v5401_v14 = vadd.f32 %v1695_v45, %v1679_v43 }
 0xe2b   :  { %4245 = vtanh.f32 %v5399_v13 }
 0xe2c   :  { %4247 = vtanh.f32 %v5401_v14 }
 0xe2f   :  { %v4242_v16 = vpop.eup %4241 }
 0xe30   :  { %v4244_v53 = vpop.eup %4243  ;;  %1844 = vrot.lane.b32.xlu0 %v4242_v16, %s4743_s8 }
 0xe31   :  { %1846 = vrot.lane.b32.xlu1 %v4244_v53, %s4743_s8 }
 0xe35   :  { %v4246_v51 = vpop.eup %4245 }
 0xe36   :  { %v4248_v52 = vpop.eup %4247  ;;  %1704 = vrot.lane.b32.xlu0 %v4246_v51, %s4743_s8 }
 0xe37   :  { %1706 = vrot.lane.b32.xlu1 %v4248_v52, %s4743_s8 }
 0xea2   :  { %v1845_v17 = vpop.permute.xlu0 %1844 }
 0xea3   :  { %v1847_v50 = vpop.permute.xlu1 %1846  ;;  %v1850_v20 = vmul.f32 %v4234_v49, %v1845_v17 }
 0xea4   :  { %v1851_v22 = vmul.f32 %v4236_v54, %v1847_v50 }
 0xea5   :  { %v1994_v60 = vrot.slane %v1850_v20, 4 }
 0xea6   :  { %v1995_v57 = vrot.slane %v1851_v22, 3 }
 0xea8   :  { %v1996_v25 = vsel %vm740_vm4, %v1995_v57, %v1994_v60  ;;  %v1705_v26 = vpop.permute.xlu0 %1704 }
 0xea9   :  { %1997 = vrot.lane.b32.xlu0 %v1996_v25, %s4744_s0  ;;  %v1707_v27 = vpop.permute.xlu1 %1706  ;;  %v1710_v29 = vmul.f32 %v4238_v56, %v1705_v26  ;;  %v2094_v25 = vrot.slane %v5391_v4, 7  ;;  %v2095_v26 = vrot.slane %v5393_v5, 7 }
 0xeaa   :  { %v1711_v30 = vmul.f32 %v4240_v28, %v1707_v27 }
 0xeab   :  { %v1854_v32 = vrot.slane %v1710_v29, 4 }
 0xeac   :  { %v1855_v34 = vrot.slane %v1711_v30, 3 }
 0xeae   :  { %v1856_v36 = vsel %vm740_vm4, %v1855_v34, %v1854_v32 }
 0xeaf   :  { %1857 = vrot.lane.b32.xlu1 %v1856_v36, %s4744_s0 }
 0xf1b   :  { %v1998_v37 = vpop.permute.xlu0 %1997 }
 0xf1c   :  { %3818 = vmatmul.mubr.msk.f32.vlgmr.msra.gmra.mrb[10].mxu1 %vm466_vm3, %v1998_v37  ;;  %v1954_v37 = vrot.slane %v5399_v13, 7 }
 0xf1d   :  { %4017 = vmatpush3.bf16.msra.mxu1 %v5105_v8  ;;  %3839 = vmatprep.mubr.msk.f32.mxu1 %vm4741_vm0, %v4742_v1 }
 0xf1e   :  { %4018 = vmatprep.subr.bf16.mxu1 %v4740_v0 }
 0xf21   :  { %4020 = vmatpush3.bf16.msra.mxu1 %v5118_v15  ;;  %v1858_v39 = vpop.permute.xlu1 %1857 }
 0xf22   :  { %4027 = vmatprep.subr.bf16.mxu1 %v4740_v0  ;;  %3807 = vmatmul.mubr.msk.f32.vlgmr.msra.gmra.mrb[14].mxu0 %vm466_vm3, %v1858_v39  ;;  %v1955_v39 = vrot.slane %v5401_v14, 7 }
 0xf23   :  { %4011 = vmatpush3.bf16.msra.mxu0 %v5135_v21  ;;  %3828 = vmatprep.mubr.msk.f32.mxu0 %vm4741_vm0, %v4742_v1 }
 0xf24   :  { %4012 = vmatprep.subr.bf16.mxu0 %v4740_v0 }
 0xf27   :  { %4014 = vmatpush3.bf16.msra.mxu0 %v5149_v24 }
 0xf28   :  { %4021 = vmatprep.subr.bf16.mxu0 %v4740_v0 }
 0xfef   :  { %v2067_v41 = vpop.f32.mrb[10].mxu1 }
 0xff0   :  { %v2072_v42 = vrot.slane %v2067_v41, 3  ;;  %v2073_v46 = vrot.slane %v2067_v41, 4  ;;  %v3819_v47 = vpop.f32.mrb[11].mxu1 }
 0xff2   :  { %v2076_v48 = vadd.f32 %v2072_v42, %v5171_v35  ;;  %v2077_v11 = vadd.f32 %v2073_v46, %v5169_v31 }
 0xff4   :  { %4249 = vtanh.f32 %v2076_v48  ;;  %v3527_v59 = vmul.f32 -1.442695, %v2076_v48  ;;  %v3528_v33 = vmul.f32 -1.442695, %v2077_v11 }
 0xff5   :  { %4251 = vtanh.f32 %v2077_v11  ;;  %v1927_v49 = vpop.f32.mrb[14].mxu0 }
 0xff6   :  { %v1932_v12 = vrot.slane %v1927_v49, 3  ;;  %v1933_v54 = vrot.slane %v1927_v49, 4  ;;  %v3808_v55 = vpop.f32.mrb[15].mxu0 }
 0xff8   :  { %v1936_v18 = vadd.f32 %v1932_v12, %v5178_v44  ;;  %v1937_v19 = vadd.f32 %v1933_v54, %v5175_v40 }
 0xffa   :  { %4253 = vtanh.f32 %v1936_v18  ;;  %v3524_v61 = vmul.f32 -1.442695, %v1936_v18  ;;  %v3525_v38 = vmul.f32 -1.442695, %v1937_v19 }
 0xffb   :  { %4255 = vtanh.f32 %v1937_v19 }
 0xffc   :  { %4257 = vpow2.f32 %v3527_v59 }
 0xffd   :  { %4259 = vpow2.f32 %v3528_v33 }
 0xffe   :  { %v4250_v56 = vpop.eup %4249  ;;  %4261 = vpow2.f32 %v3524_v61 }
 0xfff   :  { %v4252_v23 = vpop.eup %4251  ;;  %2102 = vrot.lane.b32.xlu0 %v4250_v56, %s4743_s8  ;;  %4263 = vpow2.f32 %v3525_v38 }
0x1000   :  { %2104 = vrot.lane.b32.xlu1 %v4252_v23, %s4743_s8 }
0x1004   :  { %v4254_v28 = vpop.eup %4253 }
0x1005   :  { %v4256_v58 = vpop.eup %4255  ;;  %1962 = vrot.lane.b32.xlu0 %v4254_v28, %s4743_s8 }
0x1006   :  { %1964 = vrot.lane.b32.xlu1 %v4256_v58, %s4743_s8  ;;  %v4258_v62 = vpop.eup %4257 }
0x1007   :  { %v4260_v63 = vpop.eup %4259  ;;  %v2084_v2 = vadd.f32 1.0, %v4258_v62 }
0x1008   :  { %v2085_v3 = vadd.f32 1.0, %v4260_v63  ;;  %v4262_v6 = vpop.eup %4261 }
0x1009   :  { %4265 = vrcp.f32 %v2084_v2  ;;  %v4264_v7 = vpop.eup %4263  ;;  %v1944_v9 = vadd.f32 1.0, %v4262_v6 }
0x100a   :  { %4267 = vrcp.f32 %v2085_v3  ;;  %v1945_v43 = vadd.f32 1.0, %v4264_v7 }
0x100b   :  { %4269 = vrcp.f32 %v1944_v9 }
0x100c   :  { %4271 = vrcp.f32 %v1945_v43 }
0x1013   :  { %v4266_v10 = vpop.eup %4265 }
0x1014   :  { %v4268_v16 = vpop.eup %4267  ;;  %v2098_v27 = vmul.f32 %v4266_v10, %v2094_v25 }
0x1015   :  { %v4270_v17 = vpop.eup %4269  ;;  %v2099_v29 = vmul.f32 %v4268_v16, %v2095_v26 }
0x1016   :  { %v4272_v20 = vpop.eup %4271  ;;  %v1958_v41 = vmul.f32 %v4270_v17, %v1954_v37 }
0x1017   :  { %v1959_v4 = vmul.f32 %v4272_v20, %v1955_v39 }
0x1071   :  { %v2103_v45 = vpop.permute.xlu0 %2102 }
0x1072   :  { %v2105_v53 = vpop.permute.xlu1 %2104  ;;  %v2108_v51 = vmul.f32 %v4266_v10, %v2103_v45 }
0x1073   :  { %v2109_v52 = vmul.f32 %v4268_v16, %v2105_v53 }
0x1074   :  { %2112 = vrot.lane.b32.xlu0 %v2108_v51, %s4743_s8 }
0x1075   :  { %2114 = vrot.lane.b32.xlu1 %v2109_v52, %s4743_s8 }
0x1077   :  { %v1963_v50 = vpop.permute.xlu0 %1962 }
0x1078   :  { %v1965_v22 = vpop.permute.xlu1 %1964  ;;  %v1968_v60 = vmul.f32 %v4270_v17, %v1963_v50 }
0x1079   :  { %v1969_v57 = vmul.f32 %v4272_v20, %v1965_v22 }
0x107a   :  { %1972 = vrot.lane.b32.xlu0 %v1968_v60, %s4743_s8 }
0x107b   :  { %1974 = vrot.lane.b32.xlu1 %v1969_v57, %s4743_s8 }
0x10e6   :  { %v2113_v30 = vpop.permute.xlu0 %2112 }
0x10e7   :  { %v2115_v32 = vpop.permute.xlu1 %2114  ;;  %v5441_v34 = vadd.f32 %v2113_v30, %v2098_v27 }
0x10e8   :  { %v5443_v36 = vadd.f32 %v2115_v32, %v2099_v29 }
0x10e9   :  { %4273 = vtanh.f32 %v5441_v34 }
0x10ea   :  { %4275 = vtanh.f32 %v5443_v36 }
0x10ec   :  { %v1973_v42 = vpop.permute.xlu0 %1972 }
0x10ed   :  { %v1975_v5 = vpop.permute.xlu1 %1974  ;;  %v5449_v46 = vadd.f32 %v1973_v42, %v1958_v41 }
0x10ee   :  { %v5451_v47 = vadd.f32 %v1975_v5, %v1959_v4 }
0x10ef   :  { %4277 = vtanh.f32 %v5449_v46 }
0x10f0   :  { %4279 = vtanh.f32 %v5451_v47 }
0x10f3   :  { %v4274_v48 = vpop.eup %4273 }
0x10f4   :  { %v4276_v11 = vpop.eup %4275  ;;  %2124 = vrot.lane.b32.xlu0 %v4274_v48, %s4743_s8 }
0x10f5   :  { %2126 = vrot.lane.b32.xlu1 %v4276_v11, %s4743_s8 }
0x10f9   :  { %v4278_v13 = vpop.eup %4277 }
0x10fa   :  { %v4280_v14 = vpop.eup %4279  ;;  %1984 = vrot.lane.b32.xlu0 %v4278_v13, %s4743_s8 }
0x10fb   :  { %1986 = vrot.lane.b32.xlu1 %v4280_v14, %s4743_s8 }
0x1166   :  { %v2125_v49 = vpop.permute.xlu0 %2124 }
0x1167   :  { %v2127_v12 = vpop.permute.xlu1 %2126  ;;  %v2130_v54 = vmul.f32 %v4266_v10, %v2125_v49 }
0x1168   :  { %v2131_v55 = vmul.f32 %v4268_v16, %v2127_v12 }
0x1169   :  { %v2274_v18 = vrot.slane %v2130_v54, 5  ;;  %v2374_v54 = vrot.slane %v5441_v34, 7 }
0x116a   :  { %v2275_v19 = vrot.slane %v2131_v55, 4  ;;  %v2375_v55 = vrot.slane %v5443_v36, 7 }
0x116c   :  { %v2276_v56 = vsel %vm740_vm4, %v2275_v19, %v2274_v18  ;;  %v1985_v23 = vpop.permute.xlu0 %1984 }
0x116d   :  { %2277 = vrot.lane.b32.xlu0 %v2276_v56, %s4744_s0  ;;  %v1987_v28 = vpop.permute.xlu1 %1986  ;;  %v1990_v58 = vmul.f32 %v4270_v17, %v1985_v23 }
0x116e   :  { %v1991_v59 = vmul.f32 %v4272_v20, %v1987_v28 }
0x116f   :  { %v2134_v33 = vrot.slane %v1990_v58, 5 }
0x1170   :  { %v2135_v61 = vrot.slane %v1991_v59, 4  ;;  %v2234_v59 = vrot.slane %v5449_v46, 7 }
0x1172   :  { %v2136_v38 = vsel %vm740_vm4, %v2135_v61, %v2134_v33  ;;  %v2235_v33 = vrot.slane %v5451_v47, 7 }
0x1173   :  { %2137 = vrot.lane.b32.xlu1 %v2136_v38, %s4744_s0 }
0x11df   :  { %v2278_v62 = vpop.permute.xlu0 %2277 }
0x11e0   :  { %3840 = vmatmul.mubr.msk.f32.vlgmr.msra.gmra.mrb[12].mxu1 %vm466_vm3, %v2278_v62 }
0x11e1   :  { %4029 = vmatpush3.bf16.msra.mxu1 %v5105_v8  ;;  %3861 = vmatprep.mubr.msk.f32.mxu1 %vm4741_vm0, %v4742_v1 }
0x11e2   :  { %4030 = vmatprep.subr.bf16.mxu1 %v4740_v0 }
0x11e5   :  { %4032 = vmatpush3.bf16.msra.mxu1 %v5118_v15  ;;  %v2138_v63 = vpop.permute.xlu1 %2137 }
0x11e6   :  { %4033 = vmatprep.subr.bf16.mxu1 %v4740_v0  ;;  %3829 = vmatmul.mubr.msk.f32.vlgmr.msra.gmra.mrb[16].mxu0 %vm466_vm3, %v2138_v63 }
0x11e7   :  { %4023 = vmatpush3.bf16.msra.mxu0 %v5135_v21  ;;  %3850 = vmatprep.mubr.msk.f32.mxu0 %vm4741_vm0, %v4742_v1 }
0x11e8   :  { %4024 = vmatprep.subr.bf16.mxu0 %v4740_v0 }
0x11eb   :  { %4026 = vmatpush3.bf16.msra.mxu0 %v5149_v24 }
0x11ec   :  { %3864 = vmatprep.subr.mxu0 %v4742_v1 }
0x12b3   :  { %v2347_v8 = vpop.f32.mrb[12].mxu1 }
0x12b4   :  { %v2352_v2 = vrot.slane %v2347_v8, 2  ;;  %v2353_v3 = vrot.slane %v2347_v8, 3  ;;  %v3841_v15 = vpop.f32.mrb[13].mxu1 }
0x12b6   :  { %v2356_v6 = vadd.f32 %v2352_v2, %v5171_v35  ;;  %v2357_v7 = vadd.f32 %v2353_v3, %v5169_v31 }
0x12b8   :  { %4281 = vtanh.f32 %v2356_v6  ;;  %v3533_v17 = vmul.f32 -1.442695, %v2356_v6  ;;  %v3534_v50 = vmul.f32 -1.442695, %v2357_v7 }
0x12b9   :  { %4283 = vtanh.f32 %v2357_v7  ;;  %v2207_v21 = vpop.f32.mrb[16].mxu0 }
0x12ba   :  { %v2212_v9 = vrot.slane %v2207_v21, 2  ;;  %v2213_v43 = vrot.slane %v2207_v21, 3  ;;  %v3830_v10 = vpop.f32.mrb[17].mxu0 }
0x12bc   :  { %v2216_v45 = vadd.f32 %v2212_v9, %v5178_v44  ;;  %v2217_v24 = vadd.f32 %v2213_v43, %v5175_v40 }
0x12be   :  { %4285 = vtanh.f32 %v2216_v45  ;;  %v3530_v20 = vmul.f32 -1.442695, %v2216_v45  ;;  %v3531_v22 = vmul.f32 -1.442695, %v2217_v24 }
0x12bf   :  { %4287 = vtanh.f32 %v2217_v24 }
0x12c0   :  { %4289 = vpow2.f32 %v3533_v17 }
0x12c1   :  { %4291 = vpow2.f32 %v3534_v50 }
0x12c2   :  { %v4282_v16 = vpop.eup %4281  ;;  %4293 = vpow2.f32 %v3530_v20 }
0x12c3   :  { %v4284_v53 = vpop.eup %4283  ;;  %2382 = vrot.lane.b32.xlu0 %v4282_v16, %s4743_s8  ;;  %4295 = vpow2.f32 %v3531_v22 }
0x12c4   :  { %2384 = vrot.lane.b32.xlu1 %v4284_v53, %s4743_s8 }
0x12c8   :  { %v4286_v51 = vpop.eup %4285 }
0x12c9   :  { %v4288_v52 = vpop.eup %4287  ;;  %2242 = vrot.lane.b32.xlu0 %v4286_v51, %s4743_s8 }
0x12ca   :  { %2244 = vrot.lane.b32.xlu1 %v4288_v52, %s4743_s8  ;;  %v4290_v60 = vpop.eup %4289 }
0x12cb   :  { %v4292_v57 = vpop.eup %4291  ;;  %v2364_v25 = vadd.f32 1.0, %v4290_v60 }
0x12cc   :  { %v2365_v26 = vadd.f32 1.0, %v4292_v57  ;;  %v4294_v27 = vpop.eup %4293 }
0x12cd   :  { %4297 = vrcp.f32 %v2364_v25  ;;  %v4296_v29 = vpop.eup %4295  ;;  %v2224_v30 = vadd.f32 1.0, %v4294_v27 }
0x12ce   :  { %4299 = vrcp.f32 %v2365_v26  ;;  %v2225_v32 = vadd.f32 1.0, %v4296_v29 }
0x12cf   :  { %4301 = vrcp.f32 %v2224_v30 }
0x12d0   :  { %4303 = vrcp.f32 %v2225_v32 }
0x12d7   :  { %v4298_v37 = vpop.eup %4297 }
0x12d8   :  { %v4300_v41 = vpop.eup %4299  ;;  %v2378_v18 = vmul.f32 %v4298_v37, %v2374_v54 }
0x12d9   :  { %v4302_v48 = vpop.eup %4301  ;;  %v2379_v19 = vmul.f32 %v4300_v41, %v2375_v55 }
0x12da   :  { %v4304_v13 = vpop.eup %4303  ;;  %v2238_v61 = vmul.f32 %v4302_v48, %v2234_v59 }
0x12db   :  { %v2239_v34 = vmul.f32 %v4304_v13, %v2235_v33 }
0x1335   :  { %v2383_v39 = vpop.permute.xlu0 %2382 }
0x1336   :  { %v2385_v4 = vpop.permute.xlu1 %2384  ;;  %v2388_v42 = vmul.f32 %v4298_v37, %v2383_v39 }
0x1337   :  { %v2389_v5 = vmul.f32 %v4300_v41, %v2385_v4 }
0x1338   :  { %2392 = vrot.lane.b32.xlu0 %v2388_v42, %s4743_s8 }
0x1339   :  { %2394 = vrot.lane.b32.xlu1 %v2389_v5, %s4743_s8 }
0x133b   :  { %v2243_v11 = vpop.permute.xlu0 %2242 }
0x133c   :  { %v2245_v14 = vpop.permute.xlu1 %2244  ;;  %v2248_v49 = vmul.f32 %v4302_v48, %v2243_v11 }
0x133d   :  { %v2249_v12 = vmul.f32 %v4304_v13, %v2245_v14 }
0x133e   :  { %2252 = vrot.lane.b32.xlu0 %v2248_v49, %s4743_s8 }
0x133f   :  { %2254 = vrot.lane.b32.xlu1 %v2249_v12, %s4743_s8 }
0x13aa   :  { %v2393_v56 = vpop.permute.xlu0 %2392 }
0x13ab   :  { %v2395_v23 = vpop.permute.xlu1 %2394  ;;  %v5491_v28 = vadd.f32 %v2393_v56, %v2378_v18 }
0x13ac   :  { %v5493_v58 = vadd.f32 %v2395_v23, %v2379_v19 }
0x13ad   :  { %4305 = vtanh.f32 %v5491_v28 }
0x13ae   :  { %4307 = vtanh.f32 %v5493_v58 }
0x13b0   :  { %v2253_v38 = vpop.permute.xlu0 %2252 }
0x13b1   :  { %v2255_v36 = vpop.permute.xlu1 %2254  ;;  %v5499_v62 = vadd.f32 %v2253_v38, %v2238_v61 }
0x13b2   :  { %v5501_v63 = vadd.f32 %v2255_v36, %v2239_v34 }
0x13b3   :  { %4309 = vtanh.f32 %v5499_v62 }
0x13b4   :  { %4311 = vtanh.f32 %v5501_v63 }
0x13b7   :  { %v4306_v8 = vpop.eup %4305 }
0x13b8   :  { %v4308_v2 = vpop.eup %4307  ;;  %2404 = vrot.lane.b32.xlu0 %v4306_v8, %s4743_s8 }
0x13b9   :  { %2406 = vrot.lane.b32.xlu1 %v4308_v2, %s4743_s8 }
0x13bd   :  { %v4310_v46 = vpop.eup %4309 }
0x13be   :  { %v4312_v47 = vpop.eup %4311  ;;  %2264 = vrot.lane.b32.xlu0 %v4310_v46, %s4743_s8  ;;  %v2655_v46 = vrot.slane %v5493_v58, 7  ;;  %v2514_v58 = vrot.slane %v5499_v62, 7 }
0x13bf   :  { %2266 = vrot.lane.b32.xlu1 %v4312_v47, %s4743_s8 }
0x142a   :  { %v2405_v3 = vpop.permute.xlu0 %2404 }
0x142b   :  { %v2407_v15 = vpop.permute.xlu1 %2406  ;;  %v2410_v6 = vmul.f32 %v4298_v37, %v2405_v3 }
0x142c   :  { %v2411_v7 = vmul.f32 %v4300_v41, %v2407_v15  ;;  %v2654_v15 = vrot.slane %v5491_v28, 7 }
0x142d   :  { %v2554_v21 = vrot.slane %v2410_v6, 6 }
0x142e   :  { %v2555_v9 = vrot.slane %v2411_v7, 5 }
0x1430   :  { %v2556_v43 = vsel %vm740_vm4, %v2555_v9, %v2554_v21  ;;  %v2265_v10 = vpop.permute.xlu0 %2264 }
0x1431   :  { %2557 = vrot.lane.b32.xlu0 %v2556_v43, %s4744_s0  ;;  %v2267_v45 = vpop.permute.xlu1 %2266  ;;  %v2270_v24 = vmul.f32 %v4302_v48, %v2265_v10  ;;  %v2515_v43 = vrot.slane %v5501_v63, 7 }
0x1432   :  { %v2271_v16 = vmul.f32 %v4304_v13, %v2267_v45 }
0x1433   :  { %v2414_v53 = vrot.slane %v2270_v24, 6 }
0x1434   :  { %v2415_v51 = vrot.slane %v2271_v16, 5 }
0x1436   :  { %v2416_v52 = vsel %vm740_vm4, %v2415_v51, %v2414_v53 }
0x1437   :  { %2417 = vrot.lane.b32.xlu1 %v2416_v52, %s4744_s0 }
0x14a3   :  { %v2558_v17 = vpop.permute.xlu0 %2557 }
0x14a4   :  { %3862 = vmatmul.mubr.msk.f32.vlgmr.msra.gmra.mrb[14].mxu1 %vm466_vm3, %v2558_v17 }
0x14a5   :  { %3877 = vmatprep.mubr.msk.f32.mxu1 %vm4741_vm0, %v4742_v1 }
0x14a9   :  { %v2418_v50 = vpop.permute.xlu1 %2417 }
0x14aa   :  { %3851 = vmatmul.mubr.msk.f32.vlgmr.msra.gmra.mrb[18].mxu0 %vm466_vm3, %v2418_v50 }
0x14ab   :  { %3866 = vmatprep.mubr.msk.f32.mxu0 %vm4741_vm0, %v4742_v1 }
0x1577   :  { %v2627_v20 = vpop.f32.mrb[14].mxu1 }
0x1578   :  { %v2633_v22 = vrot.slane %v2627_v20, 2  ;;  %v3863_v60 = vpop.f32.mrb[15].mxu1  ;;  %v2632_v57 = vrot.slane %v2627_v20, 1 }
0x1579   :  { %v2877_v60 = vld [vmem:[#allocation20] sm:$0xff] }
0x157a   :  { %v2637_v25 = vadd.f32 %v2633_v22, %v5169_v31  ;;  %v2636_v26 = vadd.f32 %v2632_v57, %v5171_v35  ;;  %v2876_v57 = vld [vmem:[%s5763_s4] sm:$0x3]  ;;  %3865 = vmatpush3.msra.mxu0 %v2877_v60  ;;  %v3544_v60 = vld [vmem:[#allocation18] ss:$0 sm:$0xff] }
0x157b   :  { %3867 = vmatmul.mubr.msk.f32.vlgmr.msra.gmra.mrb[20].mxu0 %vm2885_vm5, %v2876_v57  ;;  %4039 = vmatprep.subr.bf16.mxu0 %v4740_v0  ;;  %v3049_v57 = vld [vmem:[%s5724_s19] sm:$0xff] }
0x157c   :  { %4313 = vtanh.f32 %v2637_v25  ;;  %v3540_v42 = vmul.f32 -1.442695, %v2637_v25  ;;  %v3539_v5 = vmul.f32 -1.442695, %v2636_v26  ;;  %3888 = vmatprep.mubr.msk.f32.mxu0 %vm4741_vm0, %v4742_v1 }
0x157d   :  { %v2487_v27 = vpop.f32.mrb[18].mxu0  ;;  %4315 = vtanh.f32 %v2636_v26 }
0x157e   :  { %v2493_v29 = vrot.slane %v2487_v27, 2  ;;  %v3852_v30 = vpop.f32.mrb[19].mxu0  ;;  %v2492_v32 = vrot.slane %v2487_v27, 1 }
0x1580   :  { %v2497_v37 = vadd.f32 %v2493_v29, %v5175_v40  ;;  %v2496_v39 = vadd.f32 %v2492_v32, %v5178_v44 }
0x1582   :  { %4317 = vtanh.f32 %v2497_v37  ;;  %v3537_v40 = vmul.f32 -1.442695, %v2497_v37  ;;  %v3536_v44 = vmul.f32 -1.442695, %v2496_v39 }
0x1583   :  { %4319 = vtanh.f32 %v2496_v39 }
0x1584   :  { %4321 = vpow2.f32 %v3540_v42 }
0x1585   :  { %4323 = vpow2.f32 %v3539_v5 }
0x1586   :  { %v4314_v41 = vpop.eup %4313  ;;  %4325 = vpow2.f32 %v3537_v40 }
0x1587   :  { %2664 = vrot.lane.b32.xlu0 %v4314_v41, %s4743_s8  ;;  %v4316_v4 = vpop.eup %4315  ;;  %4327 = vpow2.f32 %v3536_v44 }
0x158b   :  { %2662 = vrot.lane.b32.xlu0 %v4316_v4, %s4743_s8 }
0x158c   :  { %v4318_v31 = vpop.eup %4317 }
0x158d   :  { %2524 = vrot.lane.b32.xlu1 %v4318_v31, %s4743_s8  ;;  %v4320_v35 = vpop.eup %4319 }
0x158e   :  { %v4322_v48 = vpop.eup %4321 }
0x158f   :  { %v2645_v11 = vadd.f32 1.0, %v4322_v48  ;;  %v4324_v13 = vpop.eup %4323 }
0x1590   :  { %v2644_v14 = vadd.f32 1.0, %v4324_v13  ;;  %v4326_v49 = vpop.eup %4325 }
0x1591   :  { %2522 = vrot.lane.b32.xlu1 %v4320_v35, %s4743_s8  ;;  %4329 = vrcp.f32 %v2645_v11  ;;  %v2505_v12 = vadd.f32 1.0, %v4326_v49  ;;  %v4328_v54 = vpop.eup %4327 }
0x1592   :  { %4331 = vrcp.f32 %v2644_v14  ;;  %v2504_v55 = vadd.f32 1.0, %v4328_v54 }
0x1593   :  { %4333 = vrcp.f32 %v2505_v12 }
0x1594   :  { %4335 = vrcp.f32 %v2504_v55 }
0x159b   :  { %v4330_v18 = vpop.eup %4329 }
0x159c   :  { %v4332_v23 = vpop.eup %4331  ;;  %v2659_v47 = vmul.f32 %v4330_v18, %v2655_v46 }
0x159d   :  { %v4334_v61 = vpop.eup %4333  ;;  %v2658_v7 = vmul.f32 %v4332_v23, %v2654_v15 }
0x159e   :  { %v4336_v36 = vpop.eup %4335  ;;  %v2519_v10 = vmul.f32 %v4334_v61, %v2515_v43  ;;  %v2963_v43 = vld [vmem:[%s5721_s16 + $0x18] sm:$0xff] }
0x159f   :  { %v2518_v28 = vmul.f32 %v4336_v36, %v2514_v58 }
0x15f9   :  { %v2665_v19 = vpop.permute.xlu0 %2664 }
0x15fa   :  { %v2669_v56 = vmul.f32 %v4330_v18, %v2665_v19 }
0x15fc   :  { %2674 = vrot.lane.b32.xlu0 %v2669_v56, %s4743_s8 }
0x15fd   :  { %v2663_v59 = vpop.permute.xlu0 %2662 }
0x15fe   :  { %v2668_v33 = vmul.f32 %v4332_v23, %v2663_v59 }
0x15ff   :  { %v2525_v34 = vpop.permute.xlu1 %2524 }
0x1600   :  { %2672 = vrot.lane.b32.xlu0 %v2668_v33, %s4743_s8  ;;  %v2529_v38 = vmul.f32 %v4334_v61, %v2525_v34 }
0x1602   :  { %2534 = vrot.lane.b32.xlu1 %v2529_v38, %s4743_s8 }
0x1603   :  { %v2523_v8 = vpop.permute.xlu1 %2522 }
0x1604   :  { %v2528_v2 = vmul.f32 %v4336_v36, %v2523_v8  ;;  %v3543_v8 = vld [vmem:[#allocation17] ss:$0 sm:$0xff] }
0x1606   :  { %2532 = vrot.lane.b32.xlu1 %v2528_v2, %s4743_s8  ;;  %v2960_v2 = vld [vmem:[%s5721_s16] sm:$0xff] }
0x164e   :  { %v2955_v46 = vpop.f32.mrb[20].mxu0 }
0x164f   :  { %v3868_v15 = vpop.f32.mrb[21].mxu0 }
0x166e   :  { %v2675_v3 = vpop.permute.xlu0 %2674 }
0x166f   :  { %v5533_v6 = vadd.f32 %v2675_v3, %v2659_v47  ;;  %v2961_v47 = vld [vmem:[%s5721_s16 + $0x8] sm:$0xff]  ;;  %v3545_v3 = vld [vmem:[#allocation21] ss:$0 sm:$0xff] }
0x1671   :  { %4337 = vtanh.f32 %v5533_v6 }
0x1672   :  { %v2673_v21 = vpop.permute.xlu0 %2672 }
0x1673   :  { %v5536_v9 = vadd.f32 %v2673_v21, %v2658_v7  ;;  %v2962_v7 = vld [vmem:[%s5721_s16 + $0x10] sm:$0xff]  ;;  %v4034_v21 = vpack.c.bf16 %v2961_v47, %v2960_v2 }
0x1674   :  { %v2535_v45 = vpop.permute.xlu1 %2534 }
0x1675   :  { %4339 = vtanh.f32 %v5536_v9  ;;  %v5541_v24 = vadd.f32 %v2535_v45, %v2519_v10  ;;  %v2956_v10 = vadd.f32 %v3545_v3, %v2955_v46  ;;  %4035 = vmatpush3.bf16.msra.mxu1 %v4034_v21  ;;  %v4037_v45 = vpack.c.bf16 %v2963_v43, %v2962_v7  ;;  %v3048_v46 = vld [vmem:[%s5723_s18 + $0x18] sm:$0xff] }
0x1676   :  { %4036 = vmatprep.subr.bf16.mxu1 %v4740_v0 }
0x1677   :  { %4341 = vtanh.f32 %v5541_v24  ;;  %v2959_v58 = vmax.f32 %v2956_v10, 0.0 }
0x1678   :  { %v2533_v53 = vpop.permute.xlu1 %2532 }
0x1679   :  { %v5544_v51 = vadd.f32 %v2533_v53, %v2518_v28  ;;  %4038 = vmatpush3.bf16.msra.mxu1 %v4037_v45 }
0x167a   :  { %4045 = vmatprep.subr.bf16.mxu1 %v4740_v0 }
0x167b   :  { %v4338_v16 = vpop.eup %4337  ;;  %4343 = vtanh.f32 %v5544_v51 }
0x167c   :  { %2686 = vrot.lane.b32.xlu0 %v4338_v16, %s4743_s8  ;;  %3878 = vmatmul.mubr.msk.f32.vlgmr.msra.gmra.mrb[16].mxu1 %vm466_vm3, %v2959_v58 }
0x167d   :  { %3899 = vmatprep.mubr.msk.f32.mxu1 %vm4741_vm0, %v4742_v1 }
0x167f   :  { %v4340_v63 = vpop.eup %4339 }
0x1680   :  { %2684 = vrot.lane.b32.xlu0 %v4340_v63, %s4743_s8 }
0x1681   :  { %v4342_v52 = vpop.eup %4341 }
0x1682   :  { %2546 = vrot.lane.b32.xlu1 %v4342_v52, %s4743_s8 }
0x1685   :  { %v4344_v62 = vpop.eup %4343 }
0x1686   :  { %2544 = vrot.lane.b32.xlu1 %v4344_v62, %s4743_s8 }
0x16ee   :  { %v2687_v17 = vpop.permute.xlu0 %2686 }
0x16ef   :  { %v2691_v50 = vmul.f32 %v4330_v18, %v2687_v17 }
0x16f1   :  { %v2718_v20 = vrot.slane %v2691_v50, 7 }
0x16f2   :  { %v2685_v22 = vpop.permute.xlu0 %2684 }
0x16f3   :  { %2721 = vrot.lane.b32.xlu0 %v2718_v20, %s4744_s0  ;;  %v2690_v25 = vmul.f32 %v4332_v23, %v2685_v22  ;;  %v3542_v22 = vld [vmem:[#allocation15] ss:$0 sm:$0xff] }
0x16f4   :  { %v2547_v26 = vpop.permute.xlu1 %2546 }
0x16f5   :  { %v2551_v27 = vmul.f32 %v4334_v61, %v2547_v26  ;;  %v3051_v26 = vld [vmem:[%s5724_s19 + $0x10] sm:$0xff] }
0x16f7   :  { %2719 = vrot.lane.b32.xlu0 %v2690_v25, %s4744_s0  ;;  %v2694_v29 = vrot.slane %v2551_v27, 7 }
0x16f8   :  { %v2545_v30 = vpop.permute.xlu1 %2544 }
0x16f9   :  { %2697 = vrot.lane.b32.xlu1 %v2694_v29, %s4744_s0  ;;  %v2550_v32 = vmul.f32 %v4336_v36, %v2545_v30  ;;  %v3052_v29 = vld [vmem:[%s5724_s19 + $0x18] sm:$0xff] }
0x16fa   :  { %v4043_v30 = vpack.c.bf16 %v3052_v29, %v3051_v26 }
0x16fd   :  { %2695 = vrot.lane.b32.xlu1 %v2550_v32, %s4744_s0 }
0x1765   :  { %v2722_v37 = vpop.permute.xlu0 %2721 }
0x1766   :  { %2726 = vst.msk [vmem:[#allocation4 + $0x1] sm:$0x1] %vm2703_vm6, %v2722_v37  ;;  %v2814_v39 = vsel %vm2703_vm6, %v2722_v37, 0.0 }
0x1767   :  { %2815 = vadd.xlane.f32.xlu0 %v2814_v39 }
0x1769   :  { %v2720_v41 = vpop.permute.xlu0 %2719 }
0x176a   :  { %2725 = vst.msk [vmem:[#allocation4 - $0x7] sm:$0x80] %vm2701_vm7, %v2720_v41  ;;  %v2811_v4 = vsel %vm2701_vm7, %v2720_v41, 0.0 }
0x176b   :  { %2812 = vadd.xlane.f32.xlu0 %v2811_v4  ;;  %v2698_v31 = vpop.permute.xlu1 %2697 }
0x176c   :  { %2704 = vst.msk [vmem:[#allocation2 + $0x1] sm:$0x1] %vm2703_vm6, %v2698_v31  ;;  %v2746_v35 = vsel %vm2703_vm6, %v2698_v31, 0.0 }
0x176d   :  { %2747 = vadd.xlane.f32.xlu1 %v2746_v35 }
0x176f   :  { %v2696_v42 = vpop.permute.xlu1 %2695 }
0x1770   :  { %2702 = vst.msk [vmem:[#allocation2 - $0x7] sm:$0x80] %vm2701_vm7, %v2696_v42  ;;  %v2743_v5 = vsel %vm2701_vm7, %v2696_v42, 0.0 }
0x1771   :  { %2744 = vadd.xlane.f32.xlu0 %v2743_v5 }
0x17f4   :  { %v2816_v40 = vpop.xlane.xlu0 %2815 }
0x17f5   :  { %v2818_v44 = vmul.f32 0.03125, %v2816_v40 }
0x17f7   :  { %v2821_v48 = vrot.slane %v2818_v44, 1 }
0x17f8   :  { %v2813_v11 = vpop.xlane.xlu0 %2812 }
0x17f9   :  { %v5570_v13 = vsub.f32 %v2691_v50, %v2821_v48  ;;  %v2817_v14 = vmul.f32 0.03125, %v2813_v11  ;;  %v3541_v50 = vld [vmem:[#allocation14] ss:$0 sm:$0xff] }
0x17fa   :  { %v2748_v18 = vpop.xlane.xlu1 %2747 }
0x17fb   :  { %v2827_v49 = vmul.f32 %v5570_v13, %v5570_v13  ;;  %v5574_v12 = vsub.f32 %v2690_v25, %v2817_v14  ;;  %v2751_v19 = vmul.f32 0.03125, %v2748_v18  ;;  %v3050_v25 = vld [vmem:[%s5724_s19 + $0x8] sm:$0xff] }
0x17fd   :  { %v2830_v54 = vrot.slane %v2827_v49, 7  ;;  %v2826_v55 = vmul.f32 %v5574_v12, %v5574_v12  ;;  %v2754_v56 = vrot.slane %v2751_v19, 1 }
0x17fe   :  { %v2745_v23 = vpop.xlane.xlu0 %2744 }
0x17ff   :  { %2833 = vrot.lane.b32.xlu1 %v2830_v54, %s4744_s0  ;;  %2831 = vrot.lane.b32.xlu0 %v2826_v55, %s4744_s0  ;;  %v5580_v59 = vsub.f32 %v2551_v27, %v2754_v56  ;;  %v2750_v33 = vmul.f32 0.03125, %v2745_v23  ;;  %v4040_v27 = vpack.c.bf16 %v3050_v25, %v3049_v57 }
0x1801   :  { %v2760_v61 = vmul.f32 %v5580_v59, %v5580_v59  ;;  %v5584_v38 = vsub.f32 %v2550_v32, %v2750_v33  ;;  %4041 = vmatpush3.bf16.msra.mxu0 %v4040_v27  ;;  %v3045_v33 = vld [vmem:[%s5723_s18] sm:$0xff] }
0x1802   :  { %4042 = vmatprep.subr.bf16.mxu0 %v4740_v0 }
0x1803   :  { %v2763_v34 = vrot.slane %v2760_v61, 7  ;;  %v2759_v36 = vmul.f32 %v5584_v38, %v5584_v38  ;;  %v3046_v61 = vld [vmem:[%s5723_s18 + $0x8] sm:$0xff] }
0x1805   :  { %2766 = vrot.lane.b32.xlu1 %v2763_v34, %s4744_s0  ;;  %4044 = vmatpush3.bf16.msra.mxu0 %v4043_v30 }
0x1806   :  { %4051 = vmatprep.subr.bf16.mxu0 %v4740_v0 }
0x1809   :  { %2764 = vrot.lane.b32.xlu1 %v2759_v36, %s4744_s0 }
0x180d   :  { %2861 = vrot.lane.b32.xlu1 %v3543_v8, %s4744_s0  ;;  %v3040_v8 = vpop.f32.mrb[16].mxu1 }
0x180e   :  { %v3879_v2 = vpop.f32.mrb[17].mxu1 }
0x1871   :  { %v2832_v28 = vpop.permute.xlu0 %2831  ;;  %v2834_v16 = vpop.permute.xlu1 %2833 }
0x1872   :  { %v2837_v53 = vsel %vm2701_vm7, %v2832_v28, 0.0  ;;  %v2840_v63 = vsel %vm2703_vm6, %v2834_v16, 0.0 }
0x1873   :  { %2838 = vadd.xlane.f32.xlu1 %v2837_v53  ;;  %2841 = vadd.xlane.f32.xlu0 %v2840_v63 }
0x1877   :  { %v2767_v52 = vpop.permute.xlu1 %2766 }
0x1878   :  { %v2773_v20 = vsel %vm2703_vm6, %v2767_v52, 0.0 }
0x187b   :  { %v2765_v62 = vpop.permute.xlu1 %2764 }
0x187c   :  { %v2770_v17 = vsel %vm2701_vm7, %v2765_v62, 0.0 }
0x187d   :  { %2771 = vadd.xlane.f32.xlu0 %v2770_v17 }
0x187f   :  { %v2862_v32 = vpop.permute.xlu1 %2861 }
0x1881   :  { %2774 = vadd.xlane.f32.xlu0 %v2773_v20  ;;  %v2707_v20 = vrot.slane %v5541_v24, 7  ;;  %v3288_v24 = vld [vmem:[#allocation26] sm:$0xff] }
0x1884   :  { %2794 = vrot.lane.b32.xlu1 %v3541_v50, %s4744_s0 }
0x1888   :  { %2804 = vrot.lane.b32.xlu1 %v3542_v22, %s4744_s0  ;;  %v3547_v22 = vld [vmem:[#allocation23] ss:$0 sm:$0xff] }
0x1889   :  { %v3041_v57 = vadd.f32 %v3547_v22, %v3040_v8 }
0x188b   :  { %v3044_v26 = vmax.f32 %v3041_v57, 0.0 }
0x1897   :  { %2871 = vrot.lane.b32.xlu0 %v3544_v60, %s4744_s0  ;;  %v3211_v60 = vld [vmem:[#allocation24] sm:$0xff] }
0x1900   :  { %v2842_v37 = vpop.xlane.xlu0 %2841  ;;  %v2839_v39 = vpop.xlane.xlu1 %2838 }
0x1901   :  { %v2844_v41 = vmul.f32 0.03125, %v2842_v37  ;;  %v2843_v4 = vmul.f32 0.03125, %v2839_v39  ;;  %v3372_v39 = vld [vmem:[%s5728_s23] sm:$0xff] }
0x1903   :  { %v2846_v31 = vadd.f32 1e-05, %v2844_v41  ;;  %v2845_v35 = vadd.f32 1e-05, %v2843_v4  ;;  %v3373_v41 = vld [vmem:[%s5728_s23 + $0x8] sm:$0xff] }
0x1904   :  { %v2795_v43 = vpop.permute.xlu1 %2794  ;;  %v4055_v4 = vpack.c.bf16 %v3373_v41, %v3372_v39 }
0x1905   :  { %4345 = vrsqrt.f32 %v2846_v31  ;;  %v3375_v31 = vld [vmem:[%s5728_s23 + $0x18] sm:$0xff] }
0x1906   :  { %4347 = vrsqrt.f32 %v2845_v35 }
0x1908   :  { %v2805_v16 = vpop.permute.xlu1 %2804 }
0x190a   :  { %v2772_v42 = vpop.xlane.xlu0 %2771 }
0x190b   :  { %v2776_v5 = vmul.f32 0.03125, %v2772_v42  ;;  %v3376_v42 = vld [vmem:[%s5728_s23 + $0x20] sm:$0xff] }
0x190d   :  { %v2778_v11 = vadd.f32 1e-05, %v2776_v5  ;;  %v3377_v5 = vld [vmem:[%s5728_s23 + $0x28] sm:$0xf] }
0x190e   :  { %v2775_v14 = vpop.xlane.xlu0 %2774 }
0x190f   :  { %v4346_v40 = vpop.eup %4345  ;;  %4349 = vrsqrt.f32 %v2778_v11  ;;  %v2777_v54 = vmul.f32 0.03125, %v2775_v14 }
0x1910   :  { %v4348_v44 = vpop.eup %4347  ;;  %v2851_v48 = vrot.slane %v4346_v40, 1  ;;  %v4061_v40 = vpack.c.bf16 %v3377_v5, %v3376_v42 }
0x1911   :  { %v2854_v49 = vmul.f32 %v4348_v44, %v5574_v12  ;;  %v2779_v19 = vadd.f32 1e-05, %v2777_v54  ;;  %v4046_v12 = vpack.c.bf16 %v3046_v61, %v3045_v33 }
0x1912   :  { %v2855_v55 = vmul.f32 %v2851_v48, %v5570_v13  ;;  %v2872_v23 = vpop.permute.xlu0 %2871  ;;  %v3047_v13 = vld [vmem:[%s5723_s18 + $0x10] sm:$0xff] }
0x1913   :  { %v2864_v18 = vmul.f32 %v2862_v32, %v2854_v49  ;;  %4351 = vrsqrt.f32 %v2779_v19  ;;  %4047 = vmatpush3.bf16.msra.mxu1 %v4046_v12  ;;  %v4049_v15 = vpack.c.bf16 %v3048_v46, %v3047_v13 }
0x1914   :  { %v2865_v56 = vmul.f32 %v2862_v32, %v2855_v55  ;;  %4048 = vmatprep.subr.bf16.mxu1 %v4740_v0 }
0x1915   :  { %v2874_v34 = vadd.f32 %v2872_v23, %v2864_v18 }
0x1916   :  { %v2875_v36 = vadd.f32 %v2872_v23, %v2865_v56  ;;  %v3553_v56 = vld [vmem:[#allocation27] ss:$0 sm:$0xff] }
0x1917   :  { %v3055_v47 = vrot.slane %v2874_v34, 7  ;;  %4050 = vmatpush3.bf16.msra.mxu1 %v4049_v15  ;;  %v3554_v34 = vld [vmem:[#allocation29] ss:$0 sm:$0xff] }
0x1918   :  { %v3056_v3 = vrot.slane %v2875_v36, 6  ;;  %4054 = vmatprep.subr.bf16.mxu1 %v4740_v0 }
0x1919   :  { %v4350_v21 = vpop.eup %4349 }
0x191a   :  { %v3057_v7 = vsel %vm740_vm4, %v3056_v3, %v3055_v47  ;;  %v2787_v10 = vmul.f32 %v4350_v21, %v5584_v38 }
0x191b   :  { %3058 = vrot.lane.b32.xlu0 %v3057_v7, %s4744_s0 }
0x191c   :  { %v2797_v28 = vmul.f32 %v2795_v43, %v2787_v10 }
0x191d   :  { %v4352_v45 = vpop.eup %4351 }
0x191e   :  { %v2784_v58 = vrot.slane %v4352_v45, 1  ;;  %v2807_v52 = vadd.f32 %v2805_v16, %v2797_v28 }
0x191f   :  { %2708 = vrot.lane.b32.xlu0 %v5544_v51, %s4745_s28  ;;  %v2729_v51 = vrot.slane %v5533_v6, 7  ;;  %v3287_v6 = vld [vmem:[%s5764_s7] sm:$0x3] }
0x1920   :  { %v2788_v53 = vmul.f32 %v2784_v58, %v5580_v59  ;;  %v3134_v17 = vrot.slane %v2807_v52, 7  ;;  %v3212_v59 = vld [vmem:[#allocation24 + $0x8] sm:$0xff] }
0x1922   :  { %v2798_v63 = vmul.f32 %v2795_v43, %v2788_v53 }
0x1923   :  { %2730 = vrot.lane.b32.xlu0 %v5536_v9, %s4745_s28  ;;  %v4052_v9 = vpack.c.bf16 %v3212_v59, %v3211_v60 }
0x1924   :  { %v2808_v62 = vadd.f32 %v2805_v16, %v2798_v63 }
0x1926   :  { %v3135_v50 = vrot.slane %v2808_v62, 6 }
0x1928   :  { %v3136_v38 = vsel %vm740_vm4, %v3135_v50, %v3134_v17 }
0x1929   :  { %3137 = vrot.lane.b32.xlu1 %v3136_v38, %s4744_s0 }
0x192d   :  { %2710 = vrot.lane.b32.xlu1 %v2707_v20, %s4745_s28 }
0x1931   :  { %2732 = vrot.lane.b32.xlu1 %v2729_v51, %s4745_s28 }
0x198d   :  { %v3059_v25 = vpop.permute.xlu0 %3058 }
0x198e   :  { %3889 = vmatmul.mubr.msk.f32.vlgmr.msra.gmra.mrb[22].mxu0 %vm466_vm3, %v3059_v25 }
0x198f   :  { %4053 = vmatpush3.bf16.msra.mxu0 %v4052_v9  ;;  %3906 = vmatprep.mubr.msk.f32.mxu0 %vm4741_vm0, %v4742_v1 }
0x1990   :  { %3909 = vmatprep.subr.mxu0 %v4742_v1 }
0x1991   :  { %v2709_v27 = vpop.permute.xlu0 %2708 }
0x1992   :  { %2714 = vst.msk [vmem:[#allocation3 - $0x7] sm:$0x80] %vm2701_vm7, %v2709_v27  ;;  %3907 = vmatmul.mubr.msk.f32.vlgmr.msra.gmra.mrb[24].mxu0 %vm282_vm2, %v3044_v26 }
0x1993   :  { %3910 = vmatpush3.msra.mxu0 %v3288_v24  ;;  %3911 = vmatprep.mubr.msk.f32.mxu0 %vm4741_vm0, %v4742_v1 }
0x1995   :  { %v2731_v29 = vpop.permute.xlu0 %2730 }
0x1996   :  { %2736 = vst.msk [vmem:[#allocation5 - $0x7] sm:$0x80] %vm2701_vm7, %v2731_v29  ;;  %3912 = vmatmul.mubr.msk.f32.vlgmr.msra.gmra.mrb[26].mxu0 %vm2885_vm5, %v3287_v6 }
0x199b   :  { %v3138_v30 = vpop.permute.xlu1 %3137 }
0x199c   :  { %3900 = vmatmul.mubr.msk.f32.vlgmr.msra.gmra.mrb[18].mxu1 %vm466_vm3, %v3138_v30 }
0x199d   :  { %3926 = vmatprep.mubr.msk.f32.mxu1 %vm4741_vm0, %v4742_v1  ;;  %4056 = vmatpush3.bf16.msra.mxu1 %v4055_v4  ;;  %v3374_v1 = vld [vmem:[%s5728_s23 + $0x10] sm:$0xff]  ;;  %s4747_s23 = smov [#allocation30]  }
0x199e   :  { %4057 = vmatprep.subr.bf16.mxu1 %v4740_v0  ;;  %v4058_v35 = vpack.c.bf16 %v3375_v31, %v3374_v1  ;;  %s3471_s22 = sshll.u32 %s4747_s23, 4  ;;  %s3472_s22 = int_to_ptr.vmem [resolvable:$true] %s3471_s22 }
0x199f   :  { %v2711_v32 = vpop.permute.xlu1 %2710  ;;  %s4683_s10 = scalar_lea.vmem %s3472_s22, 32  ;;  %p4688_p9 = scmp.lt.s32.totalorder %s3472_s22, %s3472_s22 }
0x19a0   :  { %2715 = vst.msk [vmem:[#allocation3 + $0x1] sm:$0x1] %vm2703_vm6, %v2711_v32  ;;  %p4684_p8 = scmp.ne.s32.totalorder %s3472_s22, %s4683_s10  ;;  %p4689_p10 = scmp.lt.s32.totalorder %s4683_s10, %s4683_s10 }
0x19a1   :  { %4059 = vmatpush3.bf16.msra.mxu1 %v4058_v35 }
0x19a2   :  { %4060 = vmatprep.subr.bf16.mxu1 %v4740_v0  ;;  %p4690_p11 = por %p4689_p10, %p4688_p9 }
0x19a3   :  { %v2733_v37 = vpop.permute.xlu1 %2732 }
0x19a4   :  { %2737 = vst.msk [vmem:[#allocation5 + $0x1] sm:$0x1] %vm2703_vm6, %v2733_v37  ;;  %p4691_p12 = pnand %p4690_p11, %p4684_p8 }
0x19a5   :  { %4063 = vmatpush3.bf16.msk.msra.mxu1 %vm4062_vm10, %v4061_v40 }
0x1a61   :  { %v3128_v44 = vpop.f32.mrb[22].mxu0 }
0x1a62   :  { %v3890_v48 = vpop.f32.mrb[23].mxu0 }
0x1a65   :  { %v3282_v11 = vpop.f32.mrb[24].mxu0 }
0x1a66   :  { %v3908_v14 = vpop.f32.mrb[25].mxu0 }
0x1a69   :  { %v3358_v49 = vpop.f32.mrb[26].mxu0 }
0x1a6a   :  { %v3913_v54 = vpop.f32.mrb[27].mxu0 }
0x1a6f   :  { %v3207_v0 = vpop.f32.mrb[18].mxu1 }
0x1a70   :  { %v3208_v55 = vadd.f32 %v3207_v0, %v3128_v44  ;;  %v3901_v18 = vpop.f32.mrb[19].mxu1 }
0x1a72   :  { %v3286_v19 = vadd.f32 %v3282_v11, %v3208_v55 }
0x1a74   :  { %v3362_v23 = vadd.f32 %v3358_v49, %v3286_v19 }
0x1a76   :  { %v3370_v33 = vadd.f32 %v3553_v56, %v3362_v23 }
0x1a78   :  { %v3371_v61 = vmax.f32 %v3370_v33, 0.0 }
0x1a7a   :  { %3927 = vmatmul.mubr.msk.f32.vlgmr.msra.gmra.mrb[20].mxu1 %vm3385_vm11, %v3371_v61 }
0x1b4d   :  { %v3459_v36 = vpop.f32.mrb[20].mxu1 }
0x1b4e   :  { %v3460_v12 = vadd.f32 %v3554_v34, %v3459_v36  ;;  %v3928_v8 = vpop.f32.mrb[21].mxu1 }
0x1b50   :  { %3464 = vst.msk [vmem:[#allocation30] sm:$0x3] %vm3463_vm12, %v3460_v12 }
0x1b51   :  { %4694 = shalt.err (!%p4691_p12)
}
0x1b52   :  { %s4695_s5 = scalar_lea.hbm %s5730_s25, 32 }
0x1b53   :  { %p4696_p13 = scmp.ne.s32.totalorder %s5730_s25, %s4695_s5  ;;  %p4699_p0 = scmp.lt.u32.totalorder %s4695_s5, %s5730_s25 }
0x1b55   :  { %p4701_p1 = pnand %p4699_p0, %p4696_p13 }
0x1b57   :  { %4704 = shalt.err (!%p4701_p1)
}
0x1b58   :  { %3474 = dma.vmem_to_hbm [thread:$0]  %s3472_s22, 32, %s5730_s25, [#allocation8]  }
0x1b59   :  { %4721 = dma.done.wait [#allocation8], 32  }
0x1b5a   :  { %4722 = vsyncadd [#allocation8], 4294967264 }
0x1b5b   :  { %3478 = vsyncpa [#allocation7], 1 }
0x1b5c   :  { %3479 = vsyncpa [#allocation10], 1 }
0x1b5d   :  { %3480 = vsyncpa [#allocation13], 1 }
0x1b5e   :  { %3481 = vsyncpa [#allocation16], 1 }
0x1b5f   :  { %3482 = vsyncpa [#allocation19], 1 }
0x1b60   :  { %3483 = vsyncpa [#allocation22], 1 }
0x1b61   :  { %3484 = vsyncpa [#allocation25], 1 }
0x1b62   :  { %3485 = vsyncpa [#allocation28], 1 }
0x1b63   :  { %3486 = vsyncpa [#allocation8], 1 }

</bundles_post_ra>
